<compile_context>
chip_gen: v6e
topology: v6e:2x2x1
jax: 0.10.0
libtpu: 0.0.40
codegen_flags: <defaults>
</compile_context>

<pallas_src>
import functools

import jax
import jax.numpy as jnp
import numpy as np
from jax.experimental import pallas as pl
from jax.experimental.pallas import tpu as pltpu

# -----------------------------------------------------------------------------
# model config (small, consistent with the module defaults but shrunk)
# -----------------------------------------------------------------------------
IN_C, IN_H, IN_W = 1, 64, 32          # input_shape
PATCH_H, PATCH_W = 16, 16             # patch_size
EMBED_DIM = 128
NUM_BLOCKS = 2
NUM_HEADS = 4
NUM_CLASSES = 8
NC_PAD = 128                          # head output padded to a full lane group
MLP_HIDDEN = 4 * EMBED_DIM
NUM_PATCHES = (IN_H // PATCH_H) * (IN_W // PATCH_W)   # 8
SEQ_LEN = NUM_PATCHES + 1                             # 9 (cls token)
S_PAD = 16                            # padded per-batch sequence (8-aligned)
BATCH = 2


# -----------------------------------------------------------------------------
# in-kernel helpers
# -----------------------------------------------------------------------------
def _layernorm(x, g, b, eps=1e-5):
    mu = jnp.mean(x, axis=-1, keepdims=True)
    xc = x - mu
    var = jnp.mean(xc * xc, axis=-1, keepdims=True)
    return xc * jax.lax.rsqrt(var + eps) * g + b


# -----------------------------------------------------------------------------
# single fused kernel: patch embed -> +pos/cls -> N blocks -> LN -> head
# -----------------------------------------------------------------------------
def fused_forward_kernel(num_heads, batch, s_pad, seq_len,
                         xp_ref, wp_ref, pos_ref,
                         g1_ref, b1_ref, wqkv_ref, bqkv_ref, wo_ref, bo_ref,
                         g2_ref, b2_ref, w1_ref, bm1_ref, w2_ref, bm2_ref,
                         gn_ref, bn_ref, wh_ref, bh_ref,
                         o_ref, attn_scratch):
    D = pos_ref.shape[1]
    NB = wqkv_ref.shape[0]
    hd = D // num_heads
    bf16 = jnp.bfloat16

    # --- patch embedding (bf16 MXU, f32 accumulate) + folded cls/pos/bias table
    x = (jnp.dot(xp_ref[...], wp_ref[...],
                 preferred_element_type=jnp.float32) + pos_ref[...])

    # key-padding bias (padded key columns -> -inf), shared by all blocks
    key_bias = jnp.where(
        jax.lax.broadcasted_iota(jnp.int32, (1, s_pad), 1) < seq_len,
        0.0, -1e30).astype(jnp.float32)

    for blk in range(NB):
        # ---- MHSA (pre-norm); 1/sqrt(hd) already folded into Q weights ----
        h = _layernorm(x, g1_ref[blk], b1_ref[blk])
        qkv = (jnp.dot(h.astype(bf16), wqkv_ref[blk],
                       preferred_element_type=jnp.float32) + bqkv_ref[blk])
        qkv_b = qkv.astype(bf16)

        for b in range(batch):
            r0 = b * s_pad
            for hh in range(num_heads):
                c = hh * hd
                qh = qkv_b[r0:r0 + s_pad, c:c + hd]
                kh = qkv_b[r0:r0 + s_pad, D + c:D + c + hd]
                vh = qkv_b[r0:r0 + s_pad, 2 * D + c:2 * D + c + hd]
                s = jax.lax.dot_general(qh, kh, (((1,), (1,)), ((), ())),
                                        preferred_element_type=jnp.float32)
                s = s + key_bias
                s = s - jnp.max(s, axis=-1, keepdims=True)
                p = jnp.exp(s)
                p = p * pl.reciprocal(jnp.sum(p, axis=-1, keepdims=True),
                                      approx=True)
                pv = jnp.dot(p.astype(bf16), vh,
                             preferred_element_type=jnp.float32)
                # aligned (16-row, 32-lane) tile write; heads fill the D lanes
                attn_scratch[r0:r0 + s_pad, c:c + hd] = pv

        # single K=128 bf16 matmul against W_o for all rows / heads
        attn = (jnp.dot(attn_scratch[...].astype(bf16), wo_ref[blk],
                        preferred_element_type=jnp.float32) + bo_ref[blk])
        x = x + attn

        # ---- MLP (pre-norm) ----
        h2 = _layernorm(x, g2_ref[blk], b2_ref[blk])
        m = (jnp.dot(h2.astype(bf16), w1_ref[blk],
                     preferred_element_type=jnp.float32) + bm1_ref[blk])
        # TODO(synk): PyTorch nn.GELU defaults to exact erf; tanh approximation used.
        m = jax.nn.gelu(m, approximate=True)
        m = (jnp.dot(m.astype(bf16), w2_ref[blk],
                     preferred_element_type=jnp.float32) + bm2_ref[blk])
        x = x + m

    # --- final LayerNorm + padded (D,128) head over ALL rows: dense 128-lane
    #     store; wrapper extracts the cls rows (b * S_PAD).
    hall = _layernorm(x, gn_ref[...], bn_ref[...])
    o_ref[...] = (jnp.dot(hall.astype(bf16), wh_ref[...],
                          preferred_element_type=jnp.float32)
                  + bh_ref[...]).astype(o_ref.dtype)


def _full_spec(shape):
    n = len(shape)
    return pl.BlockSpec(shape, lambda i, n=n: (0,) * n)


def fused_forward(xp, prep, batch):
    arg_names = ["w_patch", "pos",
                 "g1", "b1", "wqkv", "bqkv", "wo", "bo",
                 "g2", "b2", "w1", "bm1", "w2", "bm2",
                 "g_norm", "b_norm", "w_head", "b_head"]
    args = [xp] + [prep[k] for k in arg_names]
    rows = batch * S_PAD
    return pl.pallas_call(
        functools.partial(fused_forward_kernel, NUM_HEADS, batch, S_PAD, SEQ_LEN),
        out_shape=jax.ShapeDtypeStruct((rows, NC_PAD), jnp.float32),
        grid=(1,),
        in_specs=[_full_spec(a.shape) for a in args],
        out_specs=_full_spec((rows, NC_PAD)),
        scratch_shapes=[pltpu.VMEM((rows, EMBED_DIM), jnp.float32)],
        compiler_params=pltpu.CompilerParams(
            dimension_semantics=("arbitrary",)),
    )(*args)


# -----------------------------------------------------------------------------
# glue: patch extraction, parameter prep, full forward
# -----------------------------------------------------------------------------
def extract_patches(x, ph, pw):
    # x: (B, C, H, W) NCHW -> (B, N, C*ph*pw), each patch flattened (C, ph, pw)
    B, C, H, W = x.shape
    x = x.reshape(B, C, H // ph, ph, W // pw, pw)
    x = x.transpose(0, 2, 4, 1, 3, 5)
    return x.reshape(B, (H // ph) * (W // pw), C * ph * pw)


def prepare_params(params, batch):
    """Stack per-block weights, fold scale/cls/pos/bias, cast matmul weights."""
    bf16 = jnp.bfloat16
    blocks = params["blocks"]
    D = EMBED_DIM
    hd = D // NUM_HEADS
    scale = 1.0 / float(np.sqrt(hd))

    def stack(k, dtype=None):
        a = jnp.stack([blk[k] for blk in blocks], axis=0)
        return a.astype(dtype) if dtype is not None else a

    # fold attention scale into the Q columns of wqkv / bqkv (zero runtime cost)
    wqkv = stack("wqkv")
    wqkv = wqkv.at[:, :, :D].multiply(scale)
    bqkv = stack("bqkv")
    bqkv = bqkv.at[:, :, :D].multiply(scale)

    # fold cls token, pos embedding and patch-embed bias into one additive
    # (batch*S_PAD, D) table.  Padded xp rows are exactly zero, so:
    #   row 0      : cls + pos[0]
    #   rows 1..8  : pos[1..8] + b_patch   (patch rows)
    #   rows 9..15 : 0                     (padding, masked as keys)
    pos = params["pos_embed"][0]          # (SEQ_LEN, D)
    cls = params["cls_token"][0, 0]       # (D,)
    bp = params["b_patch"][0]             # (D,)
    pos_one = jnp.zeros((S_PAD, D), jnp.float32)
    pos_one = pos_one.at[0].set(cls + pos[0])
    pos_one = pos_one.at[1:SEQ_LEN].set(pos[1:] + bp)
    pos_tiled = jnp.tile(pos_one, (batch, 1))          # (batch*S_PAD, D)

    w_head = jnp.zeros((D, NC_PAD), jnp.float32)
    w_head = w_head.at[:, :NUM_CLASSES].set(params["w_head"])
    b_head = jnp.zeros((1, NC_PAD), jnp.float32)
    b_head = b_head.at[:, :NUM_CLASSES].set(params["b_head"])

    return {
        "w_patch": params["w_patch"].astype(bf16),
        "pos": pos_tiled,
        "g1": stack("g1"), "b1": stack("b1"),
        "wqkv": wqkv.astype(bf16), "bqkv": bqkv,
        "wo": stack("wo", bf16), "bo": stack("bo"),
        "g2": stack("g2"), "b2": stack("b2"),
        "w1": stack("w1", bf16), "bm1": stack("bm1"),
        "w2": stack("w2", bf16), "bm2": stack("bm2"),
        "g_norm": params["g_norm"], "b_norm": params["b_norm"],
        "w_head": w_head.astype(bf16), "b_head": b_head,
    }


@jax.jit
def forward(x, prep):
    B = x.shape[0]
    patches = extract_patches(x, PATCH_H, PATCH_W)               # (B, N, P)
    P = patches.shape[-1]
    # pad each batch to S_PAD rows: row 0 = cls slot (zeros), rows 9..15 pad
    xp = jnp.zeros((B, S_PAD, P), jnp.float32)
    xp = xp.at[:, 1:1 + NUM_PATCHES, :].set(patches)
    xp = xp.reshape(B * S_PAD, P).astype(jnp.bfloat16)
    logits_pad = fused_forward(xp, prep, B)                      # (B*S_PAD, 128)
    return logits_pad[::S_PAD, :NUM_CLASSES]


# -----------------------------------------------------------------------------
# pure-JAX reference (same math, no Pallas, no padding) for a sanity check
# -----------------------------------------------------------------------------
def _ln_ref(x, g, b, eps=1e-5):
    mu = jnp.mean(x, axis=-1, keepdims=True)
    xc = x - mu
    var = jnp.mean(xc * xc, axis=-1, keepdims=True)
    return xc * jax.lax.rsqrt(var + eps) * g + b


def forward_ref(x, params):
    B = x.shape[0]
    D = EMBED_DIM
    hd = D // NUM_HEADS
    xp = extract_patches(x, PATCH_H, PATCH_W)
    tokens = xp @ params["w_patch"] + params["b_patch"]
    cls = jnp.broadcast_to(params["cls_token"], (B, 1, D))
    xs = jnp.concatenate([cls, tokens], axis=1) + params["pos_embed"]
    for blk in params["blocks"]:
        h = _ln_ref(xs, blk["g1"], blk["b1"])
        qkv = h @ blk["wqkv"] + blk["bqkv"]
        q, k, v = jnp.split(qkv, 3, axis=-1)
        S = xs.shape[1]
        q = q.reshape(B, S, NUM_HEADS, hd).transpose(0, 2, 1, 3)
        k = k.reshape(B, S, NUM_HEADS, hd).transpose(0, 2, 1, 3)
        v = v.reshape(B, S, NUM_HEADS, hd).transpose(0, 2, 1, 3)
        s = jnp.einsum("bhqd,bhkd->bhqk", q, k) / np.sqrt(hd)
        p = jax.nn.softmax(s, axis=-1)
        o = jnp.einsum("bhqk,bhkd->bhqd", p, v).transpose(0, 2, 1, 3).reshape(B, S, D)
        xs = xs + (o @ blk["wo"] + blk["bo"])
        h2 = _ln_ref(xs, blk["g2"], blk["b2"])
        m = jax.nn.gelu(h2 @ blk["w1"] + blk["bm1"], approximate=True)
        xs = xs + (m @ blk["w2"] + blk["bm2"])
    cls_out = _ln_ref(xs[:, 0], params["g_norm"], params["b_norm"])
    return cls_out @ params["w_head"] + params["b_head"]


# -----------------------------------------------------------------------------
# deterministic parameter init
# -----------------------------------------------------------------------------
def init_params(key):
    D, P = EMBED_DIM, IN_C * PATCH_H * PATCH_W
    ks = iter(jax.random.split(key, 8 + 6 * NUM_BLOCKS))
    std = 0.02
    params = {
        "w_patch": jax.random.normal(next(ks), (P, D), jnp.float32) * std,
        "b_patch": jnp.zeros((1, D), jnp.float32),
        "cls_token": jax.random.normal(next(ks), (1, 1, D), jnp.float32),
        "pos_embed": jax.random.normal(next(ks), (1, SEQ_LEN, D), jnp.float32),
        "g_norm": jnp.ones((1, D), jnp.float32),
        "b_norm": jnp.zeros((1, D), jnp.float32),
        "w_head": jax.random.normal(next(ks), (D, NUM_CLASSES), jnp.float32) * std,
        "b_head": jnp.zeros((1, NUM_CLASSES), jnp.float32),
        "blocks": [],
    }
    for _ in range(NUM_BLOCKS):
        params["blocks"].append({
            "g1": jnp.ones((1, D), jnp.float32),
            "b1": jnp.zeros((1, D), jnp.float32),
            "wqkv": jax.random.normal(next(ks), (D, 3 * D), jnp.float32) * std,
            "bqkv": jnp.zeros((1, 3 * D), jnp.float32),
            "wo": jax.random.normal(next(ks), (D, D), jnp.float32) * std,
            "bo": jnp.zeros((1, D), jnp.float32),
            "g2": jnp.ones((1, D), jnp.float32),
            "b2": jnp.zeros((1, D), jnp.float32),
            "w1": jax.random.normal(next(ks), (D, MLP_HIDDEN), jnp.float32) * std,
            "bm1": jnp.zeros((1, MLP_HIDDEN), jnp.float32),
            "w2": jax.random.normal(next(ks), (MLP_HIDDEN, D), jnp.float32) * std,
            "bm2": jnp.zeros((1, D), jnp.float32),
        })
    return params


# -----------------------------------------------------------------------------
if __name__ == "__main__":
    key = jax.random.PRNGKey(0)
    k_x, k_p = jax.random.split(key)
    x = jax.random.normal(k_x, (BATCH, IN_C, IN_H, IN_W), jnp.float32)
    params = init_params(k_p)
    prep = prepare_params(params, BATCH)

    logits = jax.block_until_ready(forward(x, prep))
    assert logits.shape == (BATCH, NUM_CLASSES)

    ref = jax.block_until_ready(forward_ref(x, params))
    # bf16 MXU operands + approx reciprocal in the kernel vs. f32 reference.
    np.testing.assert_allclose(np.asarray(logits), np.asarray(ref),
                               rtol=2e-2, atol=2e-2)
    print("KERNEL_OK")
</pallas_src>

<mosaic_0001>
module attributes {stable_mosaic.version = 11 : i64} {
  func.func @fused_forward_kernel(%arg0: i32, %arg1: memref<32x256xbf16, #tpu.memory_space<vmem>>, %arg2: memref<256x128xbf16, #tpu.memory_space<vmem>>, %arg3: memref<32x128xf32, #tpu.memory_space<vmem>>, %arg4: memref<2x1x128xf32, #tpu.memory_space<vmem>>, %arg5: memref<2x1x128xf32, #tpu.memory_space<vmem>>, %arg6: memref<2x128x384xbf16, #tpu.memory_space<vmem>>, %arg7: memref<2x1x384xf32, #tpu.memory_space<vmem>>, %arg8: memref<2x128x128xbf16, #tpu.memory_space<vmem>>, %arg9: memref<2x1x128xf32, #tpu.memory_space<vmem>>, %arg10: memref<2x1x128xf32, #tpu.memory_space<vmem>>, %arg11: memref<2x1x128xf32, #tpu.memory_space<vmem>>, %arg12: memref<2x128x512xbf16, #tpu.memory_space<vmem>>, %arg13: memref<2x1x512xf32, #tpu.memory_space<vmem>>, %arg14: memref<2x512x128xbf16, #tpu.memory_space<vmem>>, %arg15: memref<2x1x128xf32, #tpu.memory_space<vmem>>, %arg16: memref<1x128xf32, #tpu.memory_space<vmem>>, %arg17: memref<1x128xf32, #tpu.memory_space<vmem>>, %arg18: memref<128x128xbf16, #tpu.memory_space<vmem>>, %arg19: memref<1x128xf32, #tpu.memory_space<vmem>>, %arg20: memref<32x128xf32, #tpu.memory_space<vmem>>, %arg21: memref<32x128xf32, #tpu.memory_space<vmem>>) attributes {dimension_semantics = [#tpu.dimension_semantics<arbitrary>], iteration_bounds = array<i64: 1>, scalar_prefetch = 0 : i64, scratch_operands = 1 : i64, tpu.core_type = #tpu.core_type<tc>, window_params = [{pipeline_mode = #tpu.pipeline_mode<synchronous>, transform_indices = @transform_0, window_bounds = array<i64: 32, 256>}, {pipeline_mode = #tpu.pipeline_mode<synchronous>, transform_indices = @transform_1, window_bounds = array<i64: 256, 128>}, {pipeline_mode = #tpu.pipeline_mode<synchronous>, transform_indices = @transform_2, window_bounds = array<i64: 32, 128>}, {pipeline_mode = #tpu.pipeline_mode<synchronous>, transform_indices = @transform_3, window_bounds = array<i64: 2, 1, 128>}, {pipeline_mode = #tpu.pipeline_mode<synchronous>, transform_indices = @transform_4, window_bounds = array<i64: 2, 1, 128>}, {pipeline_mode = #tpu.pipeline_mode<synchronous>, transform_indices = @transform_5, window_bounds = array<i64: 2, 128, 384>}, {pipeline_mode = #tpu.pipeline_mode<synchronous>, transform_indices = @transform_6, window_bounds = array<i64: 2, 1, 384>}, {pipeline_mode = #tpu.pipeline_mode<synchronous>, transform_indices = @transform_7, window_bounds = array<i64: 2, 128, 128>}, {pipeline_mode = #tpu.pipeline_mode<synchronous>, transform_indices = @transform_8, window_bounds = array<i64: 2, 1, 128>}, {pipeline_mode = #tpu.pipeline_mode<synchronous>, transform_indices = @transform_9, window_bounds = array<i64: 2, 1, 128>}, {pipeline_mode = #tpu.pipeline_mode<synchronous>, transform_indices = @transform_10, window_bounds = array<i64: 2, 1, 128>}, {pipeline_mode = #tpu.pipeline_mode<synchronous>, transform_indices = @transform_11, window_bounds = array<i64: 2, 128, 512>}, {pipeline_mode = #tpu.pipeline_mode<synchronous>, transform_indices = @transform_12, window_bounds = array<i64: 2, 1, 512>}, {pipeline_mode = #tpu.pipeline_mode<synchronous>, transform_indices = @transform_13, window_bounds = array<i64: 2, 512, 128>}, {pipeline_mode = #tpu.pipeline_mode<synchronous>, transform_indices = @transform_14, window_bounds = array<i64: 2, 1, 128>}, {pipeline_mode = #tpu.pipeline_mode<synchronous>, transform_indices = @transform_15, window_bounds = array<i64: 1, 128>}, {pipeline_mode = #tpu.pipeline_mode<synchronous>, transform_indices = @transform_16, window_bounds = array<i64: 1, 128>}, {pipeline_mode = #tpu.pipeline_mode<synchronous>, transform_indices = @transform_17, window_bounds = array<i64: 128, 128>}, {pipeline_mode = #tpu.pipeline_mode<synchronous>, transform_indices = @transform_18, window_bounds = array<i64: 1, 128>}, {pipeline_mode = #tpu.pipeline_mode<synchronous>, transform_indices = @transform_19, window_bounds = array<i64: 32, 128>}]} {
    %c0 = arith.constant 0 : index
    %c0_0 = arith.constant 0 : index
    %0 = vector.load %arg1[%c0, %c0_0] : memref<32x256xbf16, #tpu.memory_space<vmem>>, vector<32x256xbf16>
    %c0_1 = arith.constant 0 : index
    %c0_2 = arith.constant 0 : index
    %1 = vector.load %arg2[%c0_1, %c0_2] : memref<256x128xbf16, #tpu.memory_space<vmem>>, vector<256x128xbf16>
    %cst = arith.constant dense<0.000000e+00> : vector<32x128xf32>
    %2 = tpu.matmul %0, %1, %cst {dimension_numbers = #tpu.dot_dimension_numbers<[1], [0], [0], [1], [0, 0, 1, 1], [], []>} : vector<32x256xbf16>, vector<256x128xbf16>, vector<32x128xf32> -> vector<32x128xf32>
    %c0_3 = arith.constant 0 : index
    %c0_4 = arith.constant 0 : index
    %3 = vector.load %arg3[%c0_3, %c0_4] : memref<32x128xf32, #tpu.memory_space<vmem>>, vector<32x128xf32>
    %4 = arith.addf %2, %3 : vector<32x128xf32>
    %5 = tpu.iota {dimensions = array<i32: 1>} : vector<1x16xi32>
    %c9_i32 = arith.constant 9 : i32
    %6 = vector.broadcast %c9_i32 : i32 to vector<1x16xi32>
    %7 = arith.cmpi slt, %5, %6 : vector<1x16xi32>
    %cst_5 = arith.constant 0.000000e+00 : f32
    %cst_6 = arith.constant -1.000000e+30 : f32
    %8 = vector.broadcast %cst_5 : f32 to vector<1x16xf32>
    %9 = vector.broadcast %cst_6 : f32 to vector<1x16xf32>
    %10 = arith.select %7, %8, %9 : vector<1x16xi1>, vector<1x16xf32>
    %c0_7 = arith.constant 0 : index
    %c0_8 = arith.constant 0 : index
    %c0_9 = arith.constant 0 : index
    %11 = vector.load %arg4[%c0_7, %c0_8, %c0_9] : memref<2x1x128xf32, #tpu.memory_space<vmem>>, vector<1x1x128xf32>
    %12 = vector.shape_cast %11 : vector<1x1x128xf32> to vector<1x128xf32>
    %c0_10 = arith.constant 0 : index
    %c0_11 = arith.constant 0 : index
    %c0_12 = arith.constant 0 : index
    %13 = vector.load %arg5[%c0_10, %c0_11, %c0_12] : memref<2x1x128xf32, #tpu.memory_space<vmem>>, vector<1x1x128xf32>
    %14 = vector.shape_cast %13 : vector<1x1x128xf32> to vector<1x128xf32>
    %cst_13 = arith.constant dense<0.000000e+00> : vector<32xf32>
    %15 = vector.multi_reduction <add>, %4, %cst_13 [1] : vector<32x128xf32> to vector<32xf32>
    %16 = vector.shape_cast %15 : vector<32xf32> to vector<32x1xf32>
    %cst_14 = arith.constant 1.280000e+02 : f32
    %17 = vector.broadcast %cst_14 : f32 to vector<32x1xf32>
    %18 = arith.divf %16, %17 : vector<32x1xf32>
    %19 = vector.broadcast %18 : vector<32x1xf32> to vector<32x128xf32>
    %20 = arith.subf %4, %19 : vector<32x128xf32>
    %21 = arith.mulf %20, %20 : vector<32x128xf32>
    %cst_15 = arith.constant dense<0.000000e+00> : vector<32xf32>
    %22 = vector.multi_reduction <add>, %21, %cst_15 [1] : vector<32x128xf32> to vector<32xf32>
    %23 = vector.shape_cast %22 : vector<32xf32> to vector<32x1xf32>
    %cst_16 = arith.constant 1.280000e+02 : f32
    %24 = vector.broadcast %cst_16 : f32 to vector<32x1xf32>
    %25 = arith.divf %23, %24 : vector<32x1xf32>
    %cst_17 = arith.constant 9.99999974E-6 : f32
    %26 = vector.broadcast %cst_17 : f32 to vector<32x1xf32>
    %27 = arith.addf %25, %26 : vector<32x1xf32>
    %28 = math.rsqrt %27 : vector<32x1xf32>
    %29 = vector.broadcast %28 : vector<32x1xf32> to vector<32x128xf32>
    %30 = arith.mulf %20, %29 : vector<32x128xf32>
    %31 = vector.broadcast %12 : vector<1x128xf32> to vector<32x128xf32>
    %32 = arith.mulf %30, %31 : vector<32x128xf32>
    %33 = vector.broadcast %14 : vector<1x128xf32> to vector<32x128xf32>
    %34 = arith.addf %32, %33 : vector<32x128xf32>
    %35 = arith.truncf %34 : vector<32x128xf32> to vector<32x128xbf16>
    %c0_18 = arith.constant 0 : index
    %c0_19 = arith.constant 0 : index
    %c0_20 = arith.constant 0 : index
    %36 = vector.load %arg6[%c0_18, %c0_19, %c0_20] : memref<2x128x384xbf16, #tpu.memory_space<vmem>>, vector<1x128x384xbf16>
    %37 = vector.shape_cast %36 : vector<1x128x384xbf16> to vector<128x384xbf16>
    %cst_21 = arith.constant dense<0.000000e+00> : vector<32x384xf32>
    %38 = tpu.matmul %35, %37, %cst_21 {dimension_numbers = #tpu.dot_dimension_numbers<[1], [0], [0], [1], [0, 0, 1, 1], [], []>} : vector<32x128xbf16>, vector<128x384xbf16>, vector<32x384xf32> -> vector<32x384xf32>
    %c0_22 = arith.constant 0 : index
    %c0_23 = arith.constant 0 : index
    %c0_24 = arith.constant 0 : index
    %39 = vector.load %arg7[%c0_22, %c0_23, %c0_24] : memref<2x1x384xf32, #tpu.memory_space<vmem>>, vector<1x1x384xf32>
    %40 = vector.shape_cast %39 : vector<1x1x384xf32> to vector<1x384xf32>
    %41 = vector.broadcast %40 : vector<1x384xf32> to vector<32x384xf32>
    %42 = arith.addf %38, %41 : vector<32x384xf32>
    %43 = arith.truncf %42 : vector<32x384xf32> to vector<32x384xbf16>
    %44 = vector.extract_strided_slice %43 {offsets = [0, 0], sizes = [16, 32], strides = [1, 1]} : vector<32x384xbf16> to vector<16x32xbf16>
    %45 = vector.extract_strided_slice %43 {offsets = [0, 128], sizes = [16, 32], strides = [1, 1]} : vector<32x384xbf16> to vector<16x32xbf16>
    %46 = vector.extract_strided_slice %43 {offsets = [0, 256], sizes = [16, 32], strides = [1, 1]} : vector<32x384xbf16> to vector<16x32xbf16>
    %cst_25 = arith.constant dense<0.000000e+00> : vector<16x16xf32>
    %47 = tpu.matmul %44, %45, %cst_25 {dimension_numbers = #tpu.dot_dimension_numbers<[1], [1], [0], [0], [0, 0, 1, 0], [], []>} : vector<16x32xbf16>, vector<16x32xbf16>, vector<16x16xf32> -> vector<16x16xf32>
    %48 = vector.broadcast %10 : vector<1x16xf32> to vector<16x16xf32>
    %49 = arith.addf %47, %48 : vector<16x16xf32>
    %cst_26 = arith.constant dense<0xFF800000> : vector<16xf32>
    %50 = vector.multi_reduction <maximumf>, %49, %cst_26 [1] : vector<16x16xf32> to vector<16xf32>
    %51 = vector.shape_cast %50 : vector<16xf32> to vector<16x1xf32>
    %52 = vector.broadcast %51 : vector<16x1xf32> to vector<16x16xf32>
    %53 = arith.subf %49, %52 : vector<16x16xf32>
    %54 = math.exp %53 : vector<16x16xf32>
    %cst_27 = arith.constant dense<0.000000e+00> : vector<16xf32>
    %55 = vector.multi_reduction <add>, %54, %cst_27 [1] : vector<16x16xf32> to vector<16xf32>
    %56 = vector.shape_cast %55 : vector<16xf32> to vector<16x1xf32>
    %57 = tpu.reciprocal %56 {approx = true} : vector<16x1xf32> -> vector<16x1xf32>
    %58 = vector.broadcast %57 : vector<16x1xf32> to vector<16x16xf32>
    %59 = arith.mulf %54, %58 : vector<16x16xf32>
    %60 = arith.truncf %59 : vector<16x16xf32> to vector<16x16xbf16>
    %cst_28 = arith.constant dense<0.000000e+00> : vector<16x32xf32>
    %61 = tpu.matmul %60, %46, %cst_28 {dimension_numbers = #tpu.dot_dimension_numbers<[1], [0], [0], [1], [0, 0, 1, 1], [], []>} : vector<16x16xbf16>, vector<16x32xbf16>, vector<16x32xf32> -> vector<16x32xf32>
    %c0_29 = arith.constant 0 : index
    %c0_30 = arith.constant 0 : index
    %62 = vector.load %arg21[%c0_29, %c0_30] : memref<32x128xf32, #tpu.memory_space<vmem>>, vector<16x32xf32>
    tpu.vector_store %arg21[%c0_29, %c0_30], %61 {strides = array<i32>} : memref<32x128xf32, #tpu.memory_space<vmem>>, vector<16x32xf32>,
    %63 = vector.extract_strided_slice %43 {offsets = [0, 32], sizes = [16, 32], strides = [1, 1]} : vector<32x384xbf16> to vector<16x32xbf16>
    %64 = vector.extract_strided_slice %43 {offsets = [0, 160], sizes = [16, 32], strides = [1, 1]} : vector<32x384xbf16> to vector<16x32xbf16>
    %65 = vector.extract_strided_slice %43 {offsets = [0, 288], sizes = [16, 32], strides = [1, 1]} : vector<32x384xbf16> to vector<16x32xbf16>
    %cst_31 = arith.constant dense<0.000000e+00> : vector<16x16xf32>
    %66 = tpu.matmul %63, %64, %cst_31 {dimension_numbers = #tpu.dot_dimension_numbers<[1], [1], [0], [0], [0, 0, 1, 0], [], []>} : vector<16x32xbf16>, vector<16x32xbf16>, vector<16x16xf32> -> vector<16x16xf32>
    %67 = vector.broadcast %10 : vector<1x16xf32> to vector<16x16xf32>
    %68 = arith.addf %66, %67 : vector<16x16xf32>
    %cst_32 = arith.constant dense<0xFF800000> : vector<16xf32>
    %69 = vector.multi_reduction <maximumf>, %68, %cst_32 [1] : vector<16x16xf32> to vector<16xf32>
    %70 = vector.shape_cast %69 : vector<16xf32> to vector<16x1xf32>
    %71 = vector.broadcast %70 : vector<16x1xf32> to vector<16x16xf32>
    %72 = arith.subf %68, %71 : vector<16x16xf32>
    %73 = math.exp %72 : vector<16x16xf32>
    %cst_33 = arith.constant dense<0.000000e+00> : vector<16xf32>
    %74 = vector.multi_reduction <add>, %73, %cst_33 [1] : vector<16x16xf32> to vector<16xf32>
    %75 = vector.shape_cast %74 : vector<16xf32> to vector<16x1xf32>
    %76 = tpu.reciprocal %75 {approx = true} : vector<16x1xf32> -> vector<16x1xf32>
    %77 = vector.broadcast %76 : vector<16x1xf32> to vector<16x16xf32>
    %78 = arith.mulf %73, %77 : vector<16x16xf32>
    %79 = arith.truncf %78 : vector<16x16xf32> to vector<16x16xbf16>
    %cst_34 = arith.constant dense<0.000000e+00> : vector<16x32xf32>
    %80 = tpu.matmul %79, %65, %cst_34 {dimension_numbers = #tpu.dot_dimension_numbers<[1], [0], [0], [1], [0, 0, 1, 1], [], []>} : vector<16x16xbf16>, vector<16x32xbf16>, vector<16x32xf32> -> vector<16x32xf32>
    %c0_35 = arith.constant 0 : index
    %c32 = arith.constant 32 : index
    %81 = vector.load %arg21[%c0_35, %c32] : memref<32x128xf32, #tpu.memory_space<vmem>>, vector<16x32xf32>
    tpu.vector_store %arg21[%c0_35, %c32], %80 {strides = array<i32>} : memref<32x128xf32, #tpu.memory_space<vmem>>, vector<16x32xf32>,
    %82 = vector.extract_strided_slice %43 {offsets = [0, 64], sizes = [16, 32], strides = [1, 1]} : vector<32x384xbf16> to vector<16x32xbf16>
    %83 = vector.extract_strided_slice %43 {offsets = [0, 192], sizes = [16, 32], strides = [1, 1]} : vector<32x384xbf16> to vector<16x32xbf16>
    %84 = vector.extract_strided_slice %43 {offsets = [0, 320], sizes = [16, 32], strides = [1, 1]} : vector<32x384xbf16> to vector<16x32xbf16>
    %cst_36 = arith.constant dense<0.000000e+00> : vector<16x16xf32>
    %85 = tpu.matmul %82, %83, %cst_36 {dimension_numbers = #tpu.dot_dimension_numbers<[1], [1], [0], [0], [0, 0, 1, 0], [], []>} : vector<16x32xbf16>, vector<16x32xbf16>, vector<16x16xf32> -> vector<16x16xf32>
    %86 = vector.broadcast %10 : vector<1x16xf32> to vector<16x16xf32>
    %87 = arith.addf %85, %86 : vector<16x16xf32>
    %cst_37 = arith.constant dense<0xFF800000> : vector<16xf32>
    %88 = vector.multi_reduction <maximumf>, %87, %cst_37 [1] : vector<16x16xf32> to vector<16xf32>
    %89 = vector.shape_cast %88 : vector<16xf32> to vector<16x1xf32>
    %90 = vector.broadcast %89 : vector<16x1xf32> to vector<16x16xf32>
    %91 = arith.subf %87, %90 : vector<16x16xf32>
    %92 = math.exp %91 : vector<16x16xf32>
    %cst_38 = arith.constant dense<0.000000e+00> : vector<16xf32>
    %93 = vector.multi_reduction <add>, %92, %cst_38 [1] : vector<16x16xf32> to vector<16xf32>
    %94 = vector.shape_cast %93 : vector<16xf32> to vector<16x1xf32>
    %95 = tpu.reciprocal %94 {approx = true} : vector<16x1xf32> -> vector<16x1xf32>
    %96 = vector.broadcast %95 : vector<16x1xf32> to vector<16x16xf32>
    %97 = arith.mulf %92, %96 : vector<16x16xf32>
    %98 = arith.truncf %97 : vector<16x16xf32> to vector<16x16xbf16>
    %cst_39 = arith.constant dense<0.000000e+00> : vector<16x32xf32>
    %99 = tpu.matmul %98, %84, %cst_39 {dimension_numbers = #tpu.dot_dimension_numbers<[1], [0], [0], [1], [0, 0, 1, 1], [], []>} : vector<16x16xbf16>, vector<16x32xbf16>, vector<16x32xf32> -> vector<16x32xf32>
    %c0_40 = arith.constant 0 : index
    %c64 = arith.constant 64 : index
    %100 = vector.load %arg21[%c0_40, %c64] : memref<32x128xf32, #tpu.memory_space<vmem>>, vector<16x32xf32>
    tpu.vector_store %arg21[%c0_40, %c64], %99 {strides = array<i32>} : memref<32x128xf32, #tpu.memory_space<vmem>>, vector<16x32xf32>,
    %101 = vector.extract_strided_slice %43 {offsets = [0, 96], sizes = [16, 32], strides = [1, 1]} : vector<32x384xbf16> to vector<16x32xbf16>
    %102 = vector.extract_strided_slice %43 {offsets = [0, 224], sizes = [16, 32], strides = [1, 1]} : vector<32x384xbf16> to vector<16x32xbf16>
    %103 = vector.extract_strided_slice %43 {offsets = [0, 352], sizes = [16, 32], strides = [1, 1]} : vector<32x384xbf16> to vector<16x32xbf16>
    %cst_41 = arith.constant dense<0.000000e+00> : vector<16x16xf32>
    %104 = tpu.matmul %101, %102, %cst_41 {dimension_numbers = #tpu.dot_dimension_numbers<[1], [1], [0], [0], [0, 0, 1, 0], [], []>} : vector<16x32xbf16>, vector<16x32xbf16>, vector<16x16xf32> -> vector<16x16xf32>
    %105 = vector.broadcast %10 : vector<1x16xf32> to vector<16x16xf32>
    %106 = arith.addf %104, %105 : vector<16x16xf32>
    %cst_42 = arith.constant dense<0xFF800000> : vector<16xf32>
    %107 = vector.multi_reduction <maximumf>, %106, %cst_42 [1] : vector<16x16xf32> to vector<16xf32>
    %108 = vector.shape_cast %107 : vector<16xf32> to vector<16x1xf32>
    %109 = vector.broadcast %108 : vector<16x1xf32> to vector<16x16xf32>
    %110 = arith.subf %106, %109 : vector<16x16xf32>
    %111 = math.exp %110 : vector<16x16xf32>
    %cst_43 = arith.constant dense<0.000000e+00> : vector<16xf32>
    %112 = vector.multi_reduction <add>, %111, %cst_43 [1] : vector<16x16xf32> to vector<16xf32>
    %113 = vector.shape_cast %112 : vector<16xf32> to vector<16x1xf32>
    %114 = tpu.reciprocal %113 {approx = true} : vector<16x1xf32> -> vector<16x1xf32>
    %115 = vector.broadcast %114 : vector<16x1xf32> to vector<16x16xf32>
    %116 = arith.mulf %111, %115 : vector<16x16xf32>
    %117 = arith.truncf %116 : vector<16x16xf32> to vector<16x16xbf16>
    %cst_44 = arith.constant dense<0.000000e+00> : vector<16x32xf32>
    %118 = tpu.matmul %117, %103, %cst_44 {dimension_numbers = #tpu.dot_dimension_numbers<[1], [0], [0], [1], [0, 0, 1, 1], [], []>} : vector<16x16xbf16>, vector<16x32xbf16>, vector<16x32xf32> -> vector<16x32xf32>
    %c0_45 = arith.constant 0 : index
    %c96 = arith.constant 96 : index
    %119 = vector.load %arg21[%c0_45, %c96] : memref<32x128xf32, #tpu.memory_space<vmem>>, vector<16x32xf32>
    tpu.vector_store %arg21[%c0_45, %c96], %118 {strides = array<i32>} : memref<32x128xf32, #tpu.memory_space<vmem>>, vector<16x32xf32>,
    %120 = vector.extract_strided_slice %43 {offsets = [16, 0], sizes = [16, 32], strides = [1, 1]} : vector<32x384xbf16> to vector<16x32xbf16>
    %121 = vector.extract_strided_slice %43 {offsets = [16, 128], sizes = [16, 32], strides = [1, 1]} : vector<32x384xbf16> to vector<16x32xbf16>
    %122 = vector.extract_strided_slice %43 {offsets = [16, 256], sizes = [16, 32], strides = [1, 1]} : vector<32x384xbf16> to vector<16x32xbf16>
    %cst_46 = arith.constant dense<0.000000e+00> : vector<16x16xf32>
    %123 = tpu.matmul %120, %121, %cst_46 {dimension_numbers = #tpu.dot_dimension_numbers<[1], [1], [0], [0], [0, 0, 1, 0], [], []>} : vector<16x32xbf16>, vector<16x32xbf16>, vector<16x16xf32> -> vector<16x16xf32>
    %124 = vector.broadcast %10 : vector<1x16xf32> to vector<16x16xf32>
    %125 = arith.addf %123, %124 : vector<16x16xf32>
    %cst_47 = arith.constant dense<0xFF800000> : vector<16xf32>
    %126 = vector.multi_reduction <maximumf>, %125, %cst_47 [1] : vector<16x16xf32> to vector<16xf32>
    %127 = vector.shape_cast %126 : vector<16xf32> to vector<16x1xf32>
    %128 = vector.broadcast %127 : vector<16x1xf32> to vector<16x16xf32>
    %129 = arith.subf %125, %128 : vector<16x16xf32>
    %130 = math.exp %129 : vector<16x16xf32>
    %cst_48 = arith.constant dense<0.000000e+00> : vector<16xf32>
    %131 = vector.multi_reduction <add>, %130, %cst_48 [1] : vector<16x16xf32> to vector<16xf32>
    %132 = vector.shape_cast %131 : vector<16xf32> to vector<16x1xf32>
    %133 = tpu.reciprocal %132 {approx = true} : vector<16x1xf32> -> vector<16x1xf32>
    %134 = vector.broadcast %133 : vector<16x1xf32> to vector<16x16xf32>
    %135 = arith.mulf %130, %134 : vector<16x16xf32>
    %136 = arith.truncf %135 : vector<16x16xf32> to vector<16x16xbf16>
    %cst_49 = arith.constant dense<0.000000e+00> : vector<16x32xf32>
    %137 = tpu.matmul %136, %122, %cst_49 {dimension_numbers = #tpu.dot_dimension_numbers<[1], [0], [0], [1], [0, 0, 1, 1], [], []>} : vector<16x16xbf16>, vector<16x32xbf16>, vector<16x32xf32> -> vector<16x32xf32>
    %c16 = arith.constant 16 : index
    %c0_50 = arith.constant 0 : index
    %138 = vector.load %arg21[%c16, %c0_50] : memref<32x128xf32, #tpu.memory_space<vmem>>, vector<16x32xf32>
    tpu.vector_store %arg21[%c16, %c0_50], %137 {strides = array<i32>} : memref<32x128xf32, #tpu.memory_space<vmem>>, vector<16x32xf32>,
    %139 = vector.extract_strided_slice %43 {offsets = [16, 32], sizes = [16, 32], strides = [1, 1]} : vector<32x384xbf16> to vector<16x32xbf16>
    %140 = vector.extract_strided_slice %43 {offsets = [16, 160], sizes = [16, 32], strides = [1, 1]} : vector<32x384xbf16> to vector<16x32xbf16>
    %141 = vector.extract_strided_slice %43 {offsets = [16, 288], sizes = [16, 32], strides = [1, 1]} : vector<32x384xbf16> to vector<16x32xbf16>
    %cst_51 = arith.constant dense<0.000000e+00> : vector<16x16xf32>
    %142 = tpu.matmul %139, %140, %cst_51 {dimension_numbers = #tpu.dot_dimension_numbers<[1], [1], [0], [0], [0, 0, 1, 0], [], []>} : vector<16x32xbf16>, vector<16x32xbf16>, vector<16x16xf32> -> vector<16x16xf32>
    %143 = vector.broadcast %10 : vector<1x16xf32> to vector<16x16xf32>
    %144 = arith.addf %142, %143 : vector<16x16xf32>
    %cst_52 = arith.constant dense<0xFF800000> : vector<16xf32>
    %145 = vector.multi_reduction <maximumf>, %144, %cst_52 [1] : vector<16x16xf32> to vector<16xf32>
    %146 = vector.shape_cast %145 : vector<16xf32> to vector<16x1xf32>
    %147 = vector.broadcast %146 : vector<16x1xf32> to vector<16x16xf32>
    %148 = arith.subf %144, %147 : vector<16x16xf32>
    %149 = math.exp %148 : vector<16x16xf32>
    %cst_53 = arith.constant dense<0.000000e+00> : vector<16xf32>
    %150 = vector.multi_reduction <add>, %149, %cst_53 [1] : vector<16x16xf32> to vector<16xf32>
    %151 = vector.shape_cast %150 : vector<16xf32> to vector<16x1xf32>
    %152 = tpu.reciprocal %151 {approx = true} : vector<16x1xf32> -> vector<16x1xf32>
    %153 = vector.broadcast %152 : vector<16x1xf32> to vector<16x16xf32>
    %154 = arith.mulf %149, %153 : vector<16x16xf32>
    %155 = arith.truncf %154 : vector<16x16xf32> to vector<16x16xbf16>
    %cst_54 = arith.constant dense<0.000000e+00> : vector<16x32xf32>
    %156 = tpu.matmul %155, %141, %cst_54 {dimension_numbers = #tpu.dot_dimension_numbers<[1], [0], [0], [1], [0, 0, 1, 1], [], []>} : vector<16x16xbf16>, vector<16x32xbf16>, vector<16x32xf32> -> vector<16x32xf32>
    %c16_55 = arith.constant 16 : index
    %c32_56 = arith.constant 32 : index
    %157 = vector.load %arg21[%c16_55, %c32_56] : memref<32x128xf32, #tpu.memory_space<vmem>>, vector<16x32xf32>
    tpu.vector_store %arg21[%c16_55, %c32_56], %156 {strides = array<i32>} : memref<32x128xf32, #tpu.memory_space<vmem>>, vector<16x32xf32>,
    %158 = vector.extract_strided_slice %43 {offsets = [16, 64], sizes = [16, 32], strides = [1, 1]} : vector<32x384xbf16> to vector<16x32xbf16>
    %159 = vector.extract_strided_slice %43 {offsets = [16, 192], sizes = [16, 32], strides = [1, 1]} : vector<32x384xbf16> to vector<16x32xbf16>
    %160 = vector.extract_strided_slice %43 {offsets = [16, 320], sizes = [16, 32], strides = [1, 1]} : vector<32x384xbf16> to vector<16x32xbf16>
    %cst_57 = arith.constant dense<0.000000e+00> : vector<16x16xf32>
    %161 = tpu.matmul %158, %159, %cst_57 {dimension_numbers = #tpu.dot_dimension_numbers<[1], [1], [0], [0], [0, 0, 1, 0], [], []>} : vector<16x32xbf16>, vector<16x32xbf16>, vector<16x16xf32> -> vector<16x16xf32>
    %162 = vector.broadcast %10 : vector<1x16xf32> to vector<16x16xf32>
    %163 = arith.addf %161, %162 : vector<16x16xf32>
    %cst_58 = arith.constant dense<0xFF800000> : vector<16xf32>
    %164 = vector.multi_reduction <maximumf>, %163, %cst_58 [1] : vector<16x16xf32> to vector<16xf32>
    %165 = vector.shape_cast %164 : vector<16xf32> to vector<16x1xf32>
    %166 = vector.broadcast %165 : vector<16x1xf32> to vector<16x16xf32>
    %167 = arith.subf %163, %166 : vector<16x16xf32>
    %168 = math.exp %167 : vector<16x16xf32>
    %cst_59 = arith.constant dense<0.000000e+00> : vector<16xf32>
    %169 = vector.multi_reduction <add>, %168, %cst_59 [1] : vector<16x16xf32> to vector<16xf32>
    %170 = vector.shape_cast %169 : vector<16xf32> to vector<16x1xf32>
    %171 = tpu.reciprocal %170 {approx = true} : vector<16x1xf32> -> vector<16x1xf32>
    %172 = vector.broadcast %171 : vector<16x1xf32> to vector<16x16xf32>
    %173 = arith.mulf %168, %172 : vector<16x16xf32>
    %174 = arith.truncf %173 : vector<16x16xf32> to vector<16x16xbf16>
    %cst_60 = arith.constant dense<0.000000e+00> : vector<16x32xf32>
    %175 = tpu.matmul %174, %160, %cst_60 {dimension_numbers = #tpu.dot_dimension_numbers<[1], [0], [0], [1], [0, 0, 1, 1], [], []>} : vector<16x16xbf16>, vector<16x32xbf16>, vector<16x32xf32> -> vector<16x32xf32>
    %c16_61 = arith.constant 16 : index
    %c64_62 = arith.constant 64 : index
    %176 = vector.load %arg21[%c16_61, %c64_62] : memref<32x128xf32, #tpu.memory_space<vmem>>, vector<16x32xf32>
    tpu.vector_store %arg21[%c16_61, %c64_62], %175 {strides = array<i32>} : memref<32x128xf32, #tpu.memory_space<vmem>>, vector<16x32xf32>,
    %177 = vector.extract_strided_slice %43 {offsets = [16, 96], sizes = [16, 32], strides = [1, 1]} : vector<32x384xbf16> to vector<16x32xbf16>
    %178 = vector.extract_strided_slice %43 {offsets = [16, 224], sizes = [16, 32], strides = [1, 1]} : vector<32x384xbf16> to vector<16x32xbf16>
    %179 = vector.extract_strided_slice %43 {offsets = [16, 352], sizes = [16, 32], strides = [1, 1]} : vector<32x384xbf16> to vector<16x32xbf16>
    %cst_63 = arith.constant dense<0.000000e+00> : vector<16x16xf32>
    %180 = tpu.matmul %177, %178, %cst_63 {dimension_numbers = #tpu.dot_dimension_numbers<[1], [1], [0], [0], [0, 0, 1, 0], [], []>} : vector<16x32xbf16>, vector<16x32xbf16>, vector<16x16xf32> -> vector<16x16xf32>
    %181 = vector.broadcast %10 : vector<1x16xf32> to vector<16x16xf32>
    %182 = arith.addf %180, %181 : vector<16x16xf32>
    %cst_64 = arith.constant dense<0xFF800000> : vector<16xf32>
    %183 = vector.multi_reduction <maximumf>, %182, %cst_64 [1] : vector<16x16xf32> to vector<16xf32>
    %184 = vector.shape_cast %183 : vector<16xf32> to vector<16x1xf32>
    %185 = vector.broadcast %184 : vector<16x1xf32> to vector<16x16xf32>
    %186 = arith.subf %182, %185 : vector<16x16xf32>
    %187 = math.exp %186 : vector<16x16xf32>
    %cst_65 = arith.constant dense<0.000000e+00> : vector<16xf32>
    %188 = vector.multi_reduction <add>, %187, %cst_65 [1] : vector<16x16xf32> to vector<16xf32>
    %189 = vector.shape_cast %188 : vector<16xf32> to vector<16x1xf32>
    %190 = tpu.reciprocal %189 {approx = true} : vector<16x1xf32> -> vector<16x1xf32>
    %191 = vector.broadcast %190 : vector<16x1xf32> to vector<16x16xf32>
    %192 = arith.mulf %187, %191 : vector<16x16xf32>
    %193 = arith.truncf %192 : vector<16x16xf32> to vector<16x16xbf16>
    %cst_66 = arith.constant dense<0.000000e+00> : vector<16x32xf32>
    %194 = tpu.matmul %193, %179, %cst_66 {dimension_numbers = #tpu.dot_dimension_numbers<[1], [0], [0], [1], [0, 0, 1, 1], [], []>} : vector<16x16xbf16>, vector<16x32xbf16>, vector<16x32xf32> -> vector<16x32xf32>
    %c16_67 = arith.constant 16 : index
    %c96_68 = arith.constant 96 : index
    %195 = vector.load %arg21[%c16_67, %c96_68] : memref<32x128xf32, #tpu.memory_space<vmem>>, vector<16x32xf32>
    tpu.vector_store %arg21[%c16_67, %c96_68], %194 {strides = array<i32>} : memref<32x128xf32, #tpu.memory_space<vmem>>, vector<16x32xf32>,
    %c0_69 = arith.constant 0 : index
    %c0_70 = arith.constant 0 : index
    %196 = vector.load %arg21[%c0_69, %c0_70] : memref<32x128xf32, #tpu.memory_space<vmem>>, vector<32x128xf32>
    %197 = arith.truncf %196 : vector<32x128xf32> to vector<32x128xbf16>
    %c0_71 = arith.constant 0 : index
    %c0_72 = arith.constant 0 : index
    %c0_73 = arith.constant 0 : index
    %198 = vector.load %arg8[%c0_71, %c0_72, %c0_73] : memref<2x128x128xbf16, #tpu.memory_space<vmem>>, vector<1x128x128xbf16>
    %199 = vector.shape_cast %198 : vector<1x128x128xbf16> to vector<128x128xbf16>
    %cst_74 = arith.constant dense<0.000000e+00> : vector<32x128xf32>
    %200 = tpu.matmul %197, %199, %cst_74 {dimension_numbers = #tpu.dot_dimension_numbers<[1], [0], [0], [1], [0, 0, 1, 1], [], []>} : vector<32x128xbf16>, vector<128x128xbf16>, vector<32x128xf32> -> vector<32x128xf32>
    %c0_75 = arith.constant 0 : index
    %c0_76 = arith.constant 0 : index
    %c0_77 = arith.constant 0 : index
    %201 = vector.load %arg9[%c0_75, %c0_76, %c0_77] : memref<2x1x128xf32, #tpu.memory_space<vmem>>, vector<1x1x128xf32>
    %202 = vector.shape_cast %201 : vector<1x1x128xf32> to vector<1x128xf32>
    %203 = vector.broadcast %202 : vector<1x128xf32> to vector<32x128xf32>
    %204 = arith.addf %200, %203 : vector<32x128xf32>
    %205 = arith.addf %4, %204 : vector<32x128xf32>
    %c0_78 = arith.constant 0 : index
    %c0_79 = arith.constant 0 : index
    %c0_80 = arith.constant 0 : index
    %206 = vector.load %arg10[%c0_78, %c0_79, %c0_80] : memref<2x1x128xf32, #tpu.memory_space<vmem>>, vector<1x1x128xf32>
    %207 = vector.shape_cast %206 : vector<1x1x128xf32> to vector<1x128xf32>
    %c0_81 = arith.constant 0 : index
    %c0_82 = arith.constant 0 : index
    %c0_83 = arith.constant 0 : index
    %208 = vector.load %arg11[%c0_81, %c0_82, %c0_83] : memref<2x1x128xf32, #tpu.memory_space<vmem>>, vector<1x1x128xf32>
    %209 = vector.shape_cast %208 : vector<1x1x128xf32> to vector<1x128xf32>
    %cst_84 = arith.constant dense<0.000000e+00> : vector<32xf32>
    %210 = vector.multi_reduction <add>, %205, %cst_84 [1] : vector<32x128xf32> to vector<32xf32>
    %211 = vector.shape_cast %210 : vector<32xf32> to vector<32x1xf32>
    %cst_85 = arith.constant 1.280000e+02 : f32
    %212 = vector.broadcast %cst_85 : f32 to vector<32x1xf32>
    %213 = arith.divf %211, %212 : vector<32x1xf32>
    %214 = vector.broadcast %213 : vector<32x1xf32> to vector<32x128xf32>
    %215 = arith.subf %205, %214 : vector<32x128xf32>
    %216 = arith.mulf %215, %215 : vector<32x128xf32>
    %cst_86 = arith.constant dense<0.000000e+00> : vector<32xf32>
    %217 = vector.multi_reduction <add>, %216, %cst_86 [1] : vector<32x128xf32> to vector<32xf32>
    %218 = vector.shape_cast %217 : vector<32xf32> to vector<32x1xf32>
    %cst_87 = arith.constant 1.280000e+02 : f32
    %219 = vector.broadcast %cst_87 : f32 to vector<32x1xf32>
    %220 = arith.divf %218, %219 : vector<32x1xf32>
    %cst_88 = arith.constant 9.99999974E-6 : f32
    %221 = vector.broadcast %cst_88 : f32 to vector<32x1xf32>
    %222 = arith.addf %220, %221 : vector<32x1xf32>
    %223 = math.rsqrt %222 : vector<32x1xf32>
    %224 = vector.broadcast %223 : vector<32x1xf32> to vector<32x128xf32>
    %225 = arith.mulf %215, %224 : vector<32x128xf32>
    %226 = vector.broadcast %207 : vector<1x128xf32> to vector<32x128xf32>
    %227 = arith.mulf %225, %226 : vector<32x128xf32>
    %228 = vector.broadcast %209 : vector<1x128xf32> to vector<32x128xf32>
    %229 = arith.addf %227, %228 : vector<32x128xf32>
    %230 = arith.truncf %229 : vector<32x128xf32> to vector<32x128xbf16>
    %c0_89 = arith.constant 0 : index
    %c0_90 = arith.constant 0 : index
    %c0_91 = arith.constant 0 : index
    %231 = vector.load %arg12[%c0_89, %c0_90, %c0_91] : memref<2x128x512xbf16, #tpu.memory_space<vmem>>, vector<1x128x512xbf16>
    %232 = vector.shape_cast %231 : vector<1x128x512xbf16> to vector<128x512xbf16>
    %cst_92 = arith.constant dense<0.000000e+00> : vector<32x512xf32>
    %233 = tpu.matmul %230, %232, %cst_92 {dimension_numbers = #tpu.dot_dimension_numbers<[1], [0], [0], [1], [0, 0, 1, 1], [], []>} : vector<32x128xbf16>, vector<128x512xbf16>, vector<32x512xf32> -> vector<32x512xf32>
    %c0_93 = arith.constant 0 : index
    %c0_94 = arith.constant 0 : index
    %c0_95 = arith.constant 0 : index
    %234 = vector.load %arg13[%c0_93, %c0_94, %c0_95] : memref<2x1x512xf32, #tpu.memory_space<vmem>>, vector<1x1x512xf32>
    %235 = vector.shape_cast %234 : vector<1x1x512xf32> to vector<1x512xf32>
    %236 = vector.broadcast %235 : vector<1x512xf32> to vector<32x512xf32>
    %237 = arith.addf %233, %236 : vector<32x512xf32>
    %238 = arith.mulf %237, %237 : vector<32x512xf32>
    %239 = arith.mulf %237, %238 : vector<32x512xf32>
    %cst_96 = arith.constant 4.471500e-02 : f32
    %240 = vector.broadcast %cst_96 : f32 to vector<32x512xf32>
    %241 = arith.mulf %240, %239 : vector<32x512xf32>
    %242 = arith.addf %237, %241 : vector<32x512xf32>
    %cst_97 = arith.constant 0.797884583 : f32
    %243 = vector.broadcast %cst_97 : f32 to vector<32x512xf32>
    %244 = arith.mulf %243, %242 : vector<32x512xf32>
    %245 = math.tanh %244 : vector<32x512xf32>
    %cst_98 = arith.constant 1.000000e+00 : f32
    %246 = vector.broadcast %cst_98 : f32 to vector<32x512xf32>
    %247 = arith.addf %246, %245 : vector<32x512xf32>
    %cst_99 = arith.constant 5.000000e-01 : f32
    %248 = vector.broadcast %cst_99 : f32 to vector<32x512xf32>
    %249 = arith.mulf %248, %247 : vector<32x512xf32>
    %250 = arith.mulf %237, %249 : vector<32x512xf32>
    %251 = arith.truncf %250 : vector<32x512xf32> to vector<32x512xbf16>
    %c0_100 = arith.constant 0 : index
    %c0_101 = arith.constant 0 : index
    %c0_102 = arith.constant 0 : index
    %252 = vector.load %arg14[%c0_100, %c0_101, %c0_102] : memref<2x512x128xbf16, #tpu.memory_space<vmem>>, vector<1x512x128xbf16>
    %253 = vector.shape_cast %252 : vector<1x512x128xbf16> to vector<512x128xbf16>
    %cst_103 = arith.constant dense<0.000000e+00> : vector<32x128xf32>
    %254 = tpu.matmul %251, %253, %cst_103 {dimension_numbers = #tpu.dot_dimension_numbers<[1], [0], [0], [1], [0, 0, 1, 1], [], []>} : vector<32x512xbf16>, vector<512x128xbf16>, vector<32x128xf32> -> vector<32x128xf32>
    %c0_104 = arith.constant 0 : index
    %c0_105 = arith.constant 0 : index
    %c0_106 = arith.constant 0 : index
    %255 = vector.load %arg15[%c0_104, %c0_105, %c0_106] : memref<2x1x128xf32, #tpu.memory_space<vmem>>, vector<1x1x128xf32>
    %256 = vector.shape_cast %255 : vector<1x1x128xf32> to vector<1x128xf32>
    %257 = vector.broadcast %256 : vector<1x128xf32> to vector<32x128xf32>
    %258 = arith.addf %254, %257 : vector<32x128xf32>
    %259 = arith.addf %205, %258 : vector<32x128xf32>
    %c1 = arith.constant 1 : index
    %c0_107 = arith.constant 0 : index
    %c0_108 = arith.constant 0 : index
    %260 = vector.load %arg4[%c1, %c0_107, %c0_108] : memref<2x1x128xf32, #tpu.memory_space<vmem>>, vector<1x1x128xf32>
    %261 = vector.shape_cast %260 : vector<1x1x128xf32> to vector<1x128xf32>
    %c1_109 = arith.constant 1 : index
    %c0_110 = arith.constant 0 : index
    %c0_111 = arith.constant 0 : index
    %262 = vector.load %arg5[%c1_109, %c0_110, %c0_111] : memref<2x1x128xf32, #tpu.memory_space<vmem>>, vector<1x1x128xf32>
    %263 = vector.shape_cast %262 : vector<1x1x128xf32> to vector<1x128xf32>
    %cst_112 = arith.constant dense<0.000000e+00> : vector<32xf32>
    %264 = vector.multi_reduction <add>, %259, %cst_112 [1] : vector<32x128xf32> to vector<32xf32>
    %265 = vector.shape_cast %264 : vector<32xf32> to vector<32x1xf32>
    %cst_113 = arith.constant 1.280000e+02 : f32
    %266 = vector.broadcast %cst_113 : f32 to vector<32x1xf32>
    %267 = arith.divf %265, %266 : vector<32x1xf32>
    %268 = vector.broadcast %267 : vector<32x1xf32> to vector<32x128xf32>
    %269 = arith.subf %259, %268 : vector<32x128xf32>
    %270 = arith.mulf %269, %269 : vector<32x128xf32>
    %cst_114 = arith.constant dense<0.000000e+00> : vector<32xf32>
    %271 = vector.multi_reduction <add>, %270, %cst_114 [1] : vector<32x128xf32> to vector<32xf32>
    %272 = vector.shape_cast %271 : vector<32xf32> to vector<32x1xf32>
    %cst_115 = arith.constant 1.280000e+02 : f32
    %273 = vector.broadcast %cst_115 : f32 to vector<32x1xf32>
    %274 = arith.divf %272, %273 : vector<32x1xf32>
    %cst_116 = arith.constant 9.99999974E-6 : f32
    %275 = vector.broadcast %cst_116 : f32 to vector<32x1xf32>
    %276 = arith.addf %274, %275 : vector<32x1xf32>
    %277 = math.rsqrt %276 : vector<32x1xf32>
    %278 = vector.broadcast %277 : vector<32x1xf32> to vector<32x128xf32>
    %279 = arith.mulf %269, %278 : vector<32x128xf32>
    %280 = vector.broadcast %261 : vector<1x128xf32> to vector<32x128xf32>
    %281 = arith.mulf %279, %280 : vector<32x128xf32>
    %282 = vector.broadcast %263 : vector<1x128xf32> to vector<32x128xf32>
    %283 = arith.addf %281, %282 : vector<32x128xf32>
    %284 = arith.truncf %283 : vector<32x128xf32> to vector<32x128xbf16>
    %c1_117 = arith.constant 1 : index
    %c0_118 = arith.constant 0 : index
    %c0_119 = arith.constant 0 : index
    %285 = vector.load %arg6[%c1_117, %c0_118, %c0_119] : memref<2x128x384xbf16, #tpu.memory_space<vmem>>, vector<1x128x384xbf16>
    %286 = vector.shape_cast %285 : vector<1x128x384xbf16> to vector<128x384xbf16>
    %cst_120 = arith.constant dense<0.000000e+00> : vector<32x384xf32>
    %287 = tpu.matmul %284, %286, %cst_120 {dimension_numbers = #tpu.dot_dimension_numbers<[1], [0], [0], [1], [0, 0, 1, 1], [], []>} : vector<32x128xbf16>, vector<128x384xbf16>, vector<32x384xf32> -> vector<32x384xf32>
    %c1_121 = arith.constant 1 : index
    %c0_122 = arith.constant 0 : index
    %c0_123 = arith.constant 0 : index
    %288 = vector.load %arg7[%c1_121, %c0_122, %c0_123] : memref<2x1x384xf32, #tpu.memory_space<vmem>>, vector<1x1x384xf32>
    %289 = vector.shape_cast %288 : vector<1x1x384xf32> to vector<1x384xf32>
    %290 = vector.broadcast %289 : vector<1x384xf32> to vector<32x384xf32>
    %291 = arith.addf %287, %290 : vector<32x384xf32>
    %292 = arith.truncf %291 : vector<32x384xf32> to vector<32x384xbf16>
    %293 = vector.extract_strided_slice %292 {offsets = [0, 0], sizes = [16, 32], strides = [1, 1]} : vector<32x384xbf16> to vector<16x32xbf16>
    %294 = vector.extract_strided_slice %292 {offsets = [0, 128], sizes = [16, 32], strides = [1, 1]} : vector<32x384xbf16> to vector<16x32xbf16>
    %295 = vector.extract_strided_slice %292 {offsets = [0, 256], sizes = [16, 32], strides = [1, 1]} : vector<32x384xbf16> to vector<16x32xbf16>
    %cst_124 = arith.constant dense<0.000000e+00> : vector<16x16xf32>
    %296 = tpu.matmul %293, %294, %cst_124 {dimension_numbers = #tpu.dot_dimension_numbers<[1], [1], [0], [0], [0, 0, 1, 0], [], []>} : vector<16x32xbf16>, vector<16x32xbf16>, vector<16x16xf32> -> vector<16x16xf32>
    %297 = vector.broadcast %10 : vector<1x16xf32> to vector<16x16xf32>
    %298 = arith.addf %296, %297 : vector<16x16xf32>
    %cst_125 = arith.constant dense<0xFF800000> : vector<16xf32>
    %299 = vector.multi_reduction <maximumf>, %298, %cst_125 [1] : vector<16x16xf32> to vector<16xf32>
    %300 = vector.shape_cast %299 : vector<16xf32> to vector<16x1xf32>
    %301 = vector.broadcast %300 : vector<16x1xf32> to vector<16x16xf32>
    %302 = arith.subf %298, %301 : vector<16x16xf32>
    %303 = math.exp %302 : vector<16x16xf32>
    %cst_126 = arith.constant dense<0.000000e+00> : vector<16xf32>
    %304 = vector.multi_reduction <add>, %303, %cst_126 [1] : vector<16x16xf32> to vector<16xf32>
    %305 = vector.shape_cast %304 : vector<16xf32> to vector<16x1xf32>
    %306 = tpu.reciprocal %305 {approx = true} : vector<16x1xf32> -> vector<16x1xf32>
    %307 = vector.broadcast %306 : vector<16x1xf32> to vector<16x16xf32>
    %308 = arith.mulf %303, %307 : vector<16x16xf32>
    %309 = arith.truncf %308 : vector<16x16xf32> to vector<16x16xbf16>
    %cst_127 = arith.constant dense<0.000000e+00> : vector<16x32xf32>
    %310 = tpu.matmul %309, %295, %cst_127 {dimension_numbers = #tpu.dot_dimension_numbers<[1], [0], [0], [1], [0, 0, 1, 1], [], []>} : vector<16x16xbf16>, vector<16x32xbf16>, vector<16x32xf32> -> vector<16x32xf32>
    %c0_128 = arith.constant 0 : index
    %c0_129 = arith.constant 0 : index
    %311 = vector.load %arg21[%c0_128, %c0_129] : memref<32x128xf32, #tpu.memory_space<vmem>>, vector<16x32xf32>
    tpu.vector_store %arg21[%c0_128, %c0_129], %310 {strides = array<i32>} : memref<32x128xf32, #tpu.memory_space<vmem>>, vector<16x32xf32>,
    %312 = vector.extract_strided_slice %292 {offsets = [0, 32], sizes = [16, 32], strides = [1, 1]} : vector<32x384xbf16> to vector<16x32xbf16>
    %313 = vector.extract_strided_slice %292 {offsets = [0, 160], sizes = [16, 32], strides = [1, 1]} : vector<32x384xbf16> to vector<16x32xbf16>
    %314 = vector.extract_strided_slice %292 {offsets = [0, 288], sizes = [16, 32], strides = [1, 1]} : vector<32x384xbf16> to vector<16x32xbf16>
    %cst_130 = arith.constant dense<0.000000e+00> : vector<16x16xf32>
    %315 = tpu.matmul %312, %313, %cst_130 {dimension_numbers = #tpu.dot_dimension_numbers<[1], [1], [0], [0], [0, 0, 1, 0], [], []>} : vector<16x32xbf16>, vector<16x32xbf16>, vector<16x16xf32> -> vector<16x16xf32>
    %316 = vector.broadcast %10 : vector<1x16xf32> to vector<16x16xf32>
    %317 = arith.addf %315, %316 : vector<16x16xf32>
    %cst_131 = arith.constant dense<0xFF800000> : vector<16xf32>
    %318 = vector.multi_reduction <maximumf>, %317, %cst_131 [1] : vector<16x16xf32> to vector<16xf32>
    %319 = vector.shape_cast %318 : vector<16xf32> to vector<16x1xf32>
    %320 = vector.broadcast %319 : vector<16x1xf32> to vector<16x16xf32>
    %321 = arith.subf %317, %320 : vector<16x16xf32>
    %322 = math.exp %321 : vector<16x16xf32>
    %cst_132 = arith.constant dense<0.000000e+00> : vector<16xf32>
    %323 = vector.multi_reduction <add>, %322, %cst_132 [1] : vector<16x16xf32> to vector<16xf32>
    %324 = vector.shape_cast %323 : vector<16xf32> to vector<16x1xf32>
    %325 = tpu.reciprocal %324 {approx = true} : vector<16x1xf32> -> vector<16x1xf32>
    %326 = vector.broadcast %325 : vector<16x1xf32> to vector<16x16xf32>
    %327 = arith.mulf %322, %326 : vector<16x16xf32>
    %328 = arith.truncf %327 : vector<16x16xf32> to vector<16x16xbf16>
    %cst_133 = arith.constant dense<0.000000e+00> : vector<16x32xf32>
    %329 = tpu.matmul %328, %314, %cst_133 {dimension_numbers = #tpu.dot_dimension_numbers<[1], [0], [0], [1], [0, 0, 1, 1], [], []>} : vector<16x16xbf16>, vector<16x32xbf16>, vector<16x32xf32> -> vector<16x32xf32>
    %c0_134 = arith.constant 0 : index
    %c32_135 = arith.constant 32 : index
    %330 = vector.load %arg21[%c0_134, %c32_135] : memref<32x128xf32, #tpu.memory_space<vmem>>, vector<16x32xf32>
    tpu.vector_store %arg21[%c0_134, %c32_135], %329 {strides = array<i32>} : memref<32x128xf32, #tpu.memory_space<vmem>>, vector<16x32xf32>,
    %331 = vector.extract_strided_slice %292 {offsets = [0, 64], sizes = [16, 32], strides = [1, 1]} : vector<32x384xbf16> to vector<16x32xbf16>
    %332 = vector.extract_strided_slice %292 {offsets = [0, 192], sizes = [16, 32], strides = [1, 1]} : vector<32x384xbf16> to vector<16x32xbf16>
    %333 = vector.extract_strided_slice %292 {offsets = [0, 320], sizes = [16, 32], strides = [1, 1]} : vector<32x384xbf16> to vector<16x32xbf16>
    %cst_136 = arith.constant dense<0.000000e+00> : vector<16x16xf32>
    %334 = tpu.matmul %331, %332, %cst_136 {dimension_numbers = #tpu.dot_dimension_numbers<[1], [1], [0], [0], [0, 0, 1, 0], [], []>} : vector<16x32xbf16>, vector<16x32xbf16>, vector<16x16xf32> -> vector<16x16xf32>
    %335 = vector.broadcast %10 : vector<1x16xf32> to vector<16x16xf32>
    %336 = arith.addf %334, %335 : vector<16x16xf32>
    %cst_137 = arith.constant dense<0xFF800000> : vector<16xf32>
    %337 = vector.multi_reduction <maximumf>, %336, %cst_137 [1] : vector<16x16xf32> to vector<16xf32>
    %338 = vector.shape_cast %337 : vector<16xf32> to vector<16x1xf32>
    %339 = vector.broadcast %338 : vector<16x1xf32> to vector<16x16xf32>
    %340 = arith.subf %336, %339 : vector<16x16xf32>
    %341 = math.exp %340 : vector<16x16xf32>
    %cst_138 = arith.constant dense<0.000000e+00> : vector<16xf32>
    %342 = vector.multi_reduction <add>, %341, %cst_138 [1] : vector<16x16xf32> to vector<16xf32>
    %343 = vector.shape_cast %342 : vector<16xf32> to vector<16x1xf32>
    %344 = tpu.reciprocal %343 {approx = true} : vector<16x1xf32> -> vector<16x1xf32>
    %345 = vector.broadcast %344 : vector<16x1xf32> to vector<16x16xf32>
    %346 = arith.mulf %341, %345 : vector<16x16xf32>
    %347 = arith.truncf %346 : vector<16x16xf32> to vector<16x16xbf16>
    %cst_139 = arith.constant dense<0.000000e+00> : vector<16x32xf32>
    %348 = tpu.matmul %347, %333, %cst_139 {dimension_numbers = #tpu.dot_dimension_numbers<[1], [0], [0], [1], [0, 0, 1, 1], [], []>} : vector<16x16xbf16>, vector<16x32xbf16>, vector<16x32xf32> -> vector<16x32xf32>
    %c0_140 = arith.constant 0 : index
    %c64_141 = arith.constant 64 : index
    %349 = vector.load %arg21[%c0_140, %c64_141] : memref<32x128xf32, #tpu.memory_space<vmem>>, vector<16x32xf32>
    tpu.vector_store %arg21[%c0_140, %c64_141], %348 {strides = array<i32>} : memref<32x128xf32, #tpu.memory_space<vmem>>, vector<16x32xf32>,
    %350 = vector.extract_strided_slice %292 {offsets = [0, 96], sizes = [16, 32], strides = [1, 1]} : vector<32x384xbf16> to vector<16x32xbf16>
    %351 = vector.extract_strided_slice %292 {offsets = [0, 224], sizes = [16, 32], strides = [1, 1]} : vector<32x384xbf16> to vector<16x32xbf16>
    %352 = vector.extract_strided_slice %292 {offsets = [0, 352], sizes = [16, 32], strides = [1, 1]} : vector<32x384xbf16> to vector<16x32xbf16>
    %cst_142 = arith.constant dense<0.000000e+00> : vector<16x16xf32>
    %353 = tpu.matmul %350, %351, %cst_142 {dimension_numbers = #tpu.dot_dimension_numbers<[1], [1], [0], [0], [0, 0, 1, 0], [], []>} : vector<16x32xbf16>, vector<16x32xbf16>, vector<16x16xf32> -> vector<16x16xf32>
    %354 = vector.broadcast %10 : vector<1x16xf32> to vector<16x16xf32>
    %355 = arith.addf %353, %354 : vector<16x16xf32>
    %cst_143 = arith.constant dense<0xFF800000> : vector<16xf32>
    %356 = vector.multi_reduction <maximumf>, %355, %cst_143 [1] : vector<16x16xf32> to vector<16xf32>
    %357 = vector.shape_cast %356 : vector<16xf32> to vector<16x1xf32>
    %358 = vector.broadcast %357 : vector<16x1xf32> to vector<16x16xf32>
    %359 = arith.subf %355, %358 : vector<16x16xf32>
    %360 = math.exp %359 : vector<16x16xf32>
    %cst_144 = arith.constant dense<0.000000e+00> : vector<16xf32>
    %361 = vector.multi_reduction <add>, %360, %cst_144 [1] : vector<16x16xf32> to vector<16xf32>
    %362 = vector.shape_cast %361 : vector<16xf32> to vector<16x1xf32>
    %363 = tpu.reciprocal %362 {approx = true} : vector<16x1xf32> -> vector<16x1xf32>
    %364 = vector.broadcast %363 : vector<16x1xf32> to vector<16x16xf32>
    %365 = arith.mulf %360, %364 : vector<16x16xf32>
    %366 = arith.truncf %365 : vector<16x16xf32> to vector<16x16xbf16>
    %cst_145 = arith.constant dense<0.000000e+00> : vector<16x32xf32>
    %367 = tpu.matmul %366, %352, %cst_145 {dimension_numbers = #tpu.dot_dimension_numbers<[1], [0], [0], [1], [0, 0, 1, 1], [], []>} : vector<16x16xbf16>, vector<16x32xbf16>, vector<16x32xf32> -> vector<16x32xf32>
    %c0_146 = arith.constant 0 : index
    %c96_147 = arith.constant 96 : index
    %368 = vector.load %arg21[%c0_146, %c96_147] : memref<32x128xf32, #tpu.memory_space<vmem>>, vector<16x32xf32>
    tpu.vector_store %arg21[%c0_146, %c96_147], %367 {strides = array<i32>} : memref<32x128xf32, #tpu.memory_space<vmem>>, vector<16x32xf32>,
    %369 = vector.extract_strided_slice %292 {offsets = [16, 0], sizes = [16, 32], strides = [1, 1]} : vector<32x384xbf16> to vector<16x32xbf16>
    %370 = vector.extract_strided_slice %292 {offsets = [16, 128], sizes = [16, 32], strides = [1, 1]} : vector<32x384xbf16> to vector<16x32xbf16>
    %371 = vector.extract_strided_slice %292 {offsets = [16, 256], sizes = [16, 32], strides = [1, 1]} : vector<32x384xbf16> to vector<16x32xbf16>
    %cst_148 = arith.constant dense<0.000000e+00> : vector<16x16xf32>
    %372 = tpu.matmul %369, %370, %cst_148 {dimension_numbers = #tpu.dot_dimension_numbers<[1], [1], [0], [0], [0, 0, 1, 0], [], []>} : vector<16x32xbf16>, vector<16x32xbf16>, vector<16x16xf32> -> vector<16x16xf32>
    %373 = vector.broadcast %10 : vector<1x16xf32> to vector<16x16xf32>
    %374 = arith.addf %372, %373 : vector<16x16xf32>
    %cst_149 = arith.constant dense<0xFF800000> : vector<16xf32>
    %375 = vector.multi_reduction <maximumf>, %374, %cst_149 [1] : vector<16x16xf32> to vector<16xf32>
    %376 = vector.shape_cast %375 : vector<16xf32> to vector<16x1xf32>
    %377 = vector.broadcast %376 : vector<16x1xf32> to vector<16x16xf32>
    %378 = arith.subf %374, %377 : vector<16x16xf32>
    %379 = math.exp %378 : vector<16x16xf32>
    %cst_150 = arith.constant dense<0.000000e+00> : vector<16xf32>
    %380 = vector.multi_reduction <add>, %379, %cst_150 [1] : vector<16x16xf32> to vector<16xf32>
    %381 = vector.shape_cast %380 : vector<16xf32> to vector<16x1xf32>
    %382 = tpu.reciprocal %381 {approx = true} : vector<16x1xf32> -> vector<16x1xf32>
    %383 = vector.broadcast %382 : vector<16x1xf32> to vector<16x16xf32>
    %384 = arith.mulf %379, %383 : vector<16x16xf32>
    %385 = arith.truncf %384 : vector<16x16xf32> to vector<16x16xbf16>
    %cst_151 = arith.constant dense<0.000000e+00> : vector<16x32xf32>
    %386 = tpu.matmul %385, %371, %cst_151 {dimension_numbers = #tpu.dot_dimension_numbers<[1], [0], [0], [1], [0, 0, 1, 1], [], []>} : vector<16x16xbf16>, vector<16x32xbf16>, vector<16x32xf32> -> vector<16x32xf32>
    %c16_152 = arith.constant 16 : index
    %c0_153 = arith.constant 0 : index
    %387 = vector.load %arg21[%c16_152, %c0_153] : memref<32x128xf32, #tpu.memory_space<vmem>>, vector<16x32xf32>
    tpu.vector_store %arg21[%c16_152, %c0_153], %386 {strides = array<i32>} : memref<32x128xf32, #tpu.memory_space<vmem>>, vector<16x32xf32>,
    %388 = vector.extract_strided_slice %292 {offsets = [16, 32], sizes = [16, 32], strides = [1, 1]} : vector<32x384xbf16> to vector<16x32xbf16>
    %389 = vector.extract_strided_slice %292 {offsets = [16, 160], sizes = [16, 32], strides = [1, 1]} : vector<32x384xbf16> to vector<16x32xbf16>
    %390 = vector.extract_strided_slice %292 {offsets = [16, 288], sizes = [16, 32], strides = [1, 1]} : vector<32x384xbf16> to vector<16x32xbf16>
    %cst_154 = arith.constant dense<0.000000e+00> : vector<16x16xf32>
    %391 = tpu.matmul %388, %389, %cst_154 {dimension_numbers = #tpu.dot_dimension_numbers<[1], [1], [0], [0], [0, 0, 1, 0], [], []>} : vector<16x32xbf16>, vector<16x32xbf16>, vector<16x16xf32> -> vector<16x16xf32>
    %392 = vector.broadcast %10 : vector<1x16xf32> to vector<16x16xf32>
    %393 = arith.addf %391, %392 : vector<16x16xf32>
    %cst_155 = arith.constant dense<0xFF800000> : vector<16xf32>
    %394 = vector.multi_reduction <maximumf>, %393, %cst_155 [1] : vector<16x16xf32> to vector<16xf32>
    %395 = vector.shape_cast %394 : vector<16xf32> to vector<16x1xf32>
    %396 = vector.broadcast %395 : vector<16x1xf32> to vector<16x16xf32>
    %397 = arith.subf %393, %396 : vector<16x16xf32>
    %398 = math.exp %397 : vector<16x16xf32>
    %cst_156 = arith.constant dense<0.000000e+00> : vector<16xf32>
    %399 = vector.multi_reduction <add>, %398, %cst_156 [1] : vector<16x16xf32> to vector<16xf32>
    %400 = vector.shape_cast %399 : vector<16xf32> to vector<16x1xf32>
    %401 = tpu.reciprocal %400 {approx = true} : vector<16x1xf32> -> vector<16x1xf32>
    %402 = vector.broadcast %401 : vector<16x1xf32> to vector<16x16xf32>
    %403 = arith.mulf %398, %402 : vector<16x16xf32>
    %404 = arith.truncf %403 : vector<16x16xf32> to vector<16x16xbf16>
    %cst_157 = arith.constant dense<0.000000e+00> : vector<16x32xf32>
    %405 = tpu.matmul %404, %390, %cst_157 {dimension_numbers = #tpu.dot_dimension_numbers<[1], [0], [0], [1], [0, 0, 1, 1], [], []>} : vector<16x16xbf16>, vector<16x32xbf16>, vector<16x32xf32> -> vector<16x32xf32>
    %c16_158 = arith.constant 16 : index
    %c32_159 = arith.constant 32 : index
    %406 = vector.load %arg21[%c16_158, %c32_159] : memref<32x128xf32, #tpu.memory_space<vmem>>, vector<16x32xf32>
    tpu.vector_store %arg21[%c16_158, %c32_159], %405 {strides = array<i32>} : memref<32x128xf32, #tpu.memory_space<vmem>>, vector<16x32xf32>,
    %407 = vector.extract_strided_slice %292 {offsets = [16, 64], sizes = [16, 32], strides = [1, 1]} : vector<32x384xbf16> to vector<16x32xbf16>
    %408 = vector.extract_strided_slice %292 {offsets = [16, 192], sizes = [16, 32], strides = [1, 1]} : vector<32x384xbf16> to vector<16x32xbf16>
    %409 = vector.extract_strided_slice %292 {offsets = [16, 320], sizes = [16, 32], strides = [1, 1]} : vector<32x384xbf16> to vector<16x32xbf16>
    %cst_160 = arith.constant dense<0.000000e+00> : vector<16x16xf32>
    %410 = tpu.matmul %407, %408, %cst_160 {dimension_numbers = #tpu.dot_dimension_numbers<[1], [1], [0], [0], [0, 0, 1, 0], [], []>} : vector<16x32xbf16>, vector<16x32xbf16>, vector<16x16xf32> -> vector<16x16xf32>
    %411 = vector.broadcast %10 : vector<1x16xf32> to vector<16x16xf32>
    %412 = arith.addf %410, %411 : vector<16x16xf32>
    %cst_161 = arith.constant dense<0xFF800000> : vector<16xf32>
    %413 = vector.multi_reduction <maximumf>, %412, %cst_161 [1] : vector<16x16xf32> to vector<16xf32>
    %414 = vector.shape_cast %413 : vector<16xf32> to vector<16x1xf32>
    %415 = vector.broadcast %414 : vector<16x1xf32> to vector<16x16xf32>
    %416 = arith.subf %412, %415 : vector<16x16xf32>
    %417 = math.exp %416 : vector<16x16xf32>
    %cst_162 = arith.constant dense<0.000000e+00> : vector<16xf32>
    %418 = vector.multi_reduction <add>, %417, %cst_162 [1] : vector<16x16xf32> to vector<16xf32>
    %419 = vector.shape_cast %418 : vector<16xf32> to vector<16x1xf32>
    %420 = tpu.reciprocal %419 {approx = true} : vector<16x1xf32> -> vector<16x1xf32>
    %421 = vector.broadcast %420 : vector<16x1xf32> to vector<16x16xf32>
    %422 = arith.mulf %417, %421 : vector<16x16xf32>
    %423 = arith.truncf %422 : vector<16x16xf32> to vector<16x16xbf16>
    %cst_163 = arith.constant dense<0.000000e+00> : vector<16x32xf32>
    %424 = tpu.matmul %423, %409, %cst_163 {dimension_numbers = #tpu.dot_dimension_numbers<[1], [0], [0], [1], [0, 0, 1, 1], [], []>} : vector<16x16xbf16>, vector<16x32xbf16>, vector<16x32xf32> -> vector<16x32xf32>
    %c16_164 = arith.constant 16 : index
    %c64_165 = arith.constant 64 : index
    %425 = vector.load %arg21[%c16_164, %c64_165] : memref<32x128xf32, #tpu.memory_space<vmem>>, vector<16x32xf32>
    tpu.vector_store %arg21[%c16_164, %c64_165], %424 {strides = array<i32>} : memref<32x128xf32, #tpu.memory_space<vmem>>, vector<16x32xf32>,
    %426 = vector.extract_strided_slice %292 {offsets = [16, 96], sizes = [16, 32], strides = [1, 1]} : vector<32x384xbf16> to vector<16x32xbf16>
    %427 = vector.extract_strided_slice %292 {offsets = [16, 224], sizes = [16, 32], strides = [1, 1]} : vector<32x384xbf16> to vector<16x32xbf16>
    %428 = vector.extract_strided_slice %292 {offsets = [16, 352], sizes = [16, 32], strides = [1, 1]} : vector<32x384xbf16> to vector<16x32xbf16>
    %cst_166 = arith.constant dense<0.000000e+00> : vector<16x16xf32>
    %429 = tpu.matmul %426, %427, %cst_166 {dimension_numbers = #tpu.dot_dimension_numbers<[1], [1], [0], [0], [0, 0, 1, 0], [], []>} : vector<16x32xbf16>, vector<16x32xbf16>, vector<16x16xf32> -> vector<16x16xf32>
    %430 = vector.broadcast %10 : vector<1x16xf32> to vector<16x16xf32>
    %431 = arith.addf %429, %430 : vector<16x16xf32>
    %cst_167 = arith.constant dense<0xFF800000> : vector<16xf32>
    %432 = vector.multi_reduction <maximumf>, %431, %cst_167 [1] : vector<16x16xf32> to vector<16xf32>
    %433 = vector.shape_cast %432 : vector<16xf32> to vector<16x1xf32>
    %434 = vector.broadcast %433 : vector<16x1xf32> to vector<16x16xf32>
    %435 = arith.subf %431, %434 : vector<16x16xf32>
    %436 = math.exp %435 : vector<16x16xf32>
    %cst_168 = arith.constant dense<0.000000e+00> : vector<16xf32>
    %437 = vector.multi_reduction <add>, %436, %cst_168 [1] : vector<16x16xf32> to vector<16xf32>
    %438 = vector.shape_cast %437 : vector<16xf32> to vector<16x1xf32>
    %439 = tpu.reciprocal %438 {approx = true} : vector<16x1xf32> -> vector<16x1xf32>
    %440 = vector.broadcast %439 : vector<16x1xf32> to vector<16x16xf32>
    %441 = arith.mulf %436, %440 : vector<16x16xf32>
    %442 = arith.truncf %441 : vector<16x16xf32> to vector<16x16xbf16>
    %cst_169 = arith.constant dense<0.000000e+00> : vector<16x32xf32>
    %443 = tpu.matmul %442, %428, %cst_169 {dimension_numbers = #tpu.dot_dimension_numbers<[1], [0], [0], [1], [0, 0, 1, 1], [], []>} : vector<16x16xbf16>, vector<16x32xbf16>, vector<16x32xf32> -> vector<16x32xf32>
    %c16_170 = arith.constant 16 : index
    %c96_171 = arith.constant 96 : index
    %444 = vector.load %arg21[%c16_170, %c96_171] : memref<32x128xf32, #tpu.memory_space<vmem>>, vector<16x32xf32>
    tpu.vector_store %arg21[%c16_170, %c96_171], %443 {strides = array<i32>} : memref<32x128xf32, #tpu.memory_space<vmem>>, vector<16x32xf32>,
    %c0_172 = arith.constant 0 : index
    %c0_173 = arith.constant 0 : index
    %445 = vector.load %arg21[%c0_172, %c0_173] : memref<32x128xf32, #tpu.memory_space<vmem>>, vector<32x128xf32>
    %446 = arith.truncf %445 : vector<32x128xf32> to vector<32x128xbf16>
    %c1_174 = arith.constant 1 : index
    %c0_175 = arith.constant 0 : index
    %c0_176 = arith.constant 0 : index
    %447 = vector.load %arg8[%c1_174, %c0_175, %c0_176] : memref<2x128x128xbf16, #tpu.memory_space<vmem>>, vector<1x128x128xbf16>
    %448 = vector.shape_cast %447 : vector<1x128x128xbf16> to vector<128x128xbf16>
    %cst_177 = arith.constant dense<0.000000e+00> : vector<32x128xf32>
    %449 = tpu.matmul %446, %448, %cst_177 {dimension_numbers = #tpu.dot_dimension_numbers<[1], [0], [0], [1], [0, 0, 1, 1], [], []>} : vector<32x128xbf16>, vector<128x128xbf16>, vector<32x128xf32> -> vector<32x128xf32>
    %c1_178 = arith.constant 1 : index
    %c0_179 = arith.constant 0 : index
    %c0_180 = arith.constant 0 : index
    %450 = vector.load %arg9[%c1_178, %c0_179, %c0_180] : memref<2x1x128xf32, #tpu.memory_space<vmem>>, vector<1x1x128xf32>
    %451 = vector.shape_cast %450 : vector<1x1x128xf32> to vector<1x128xf32>
    %452 = vector.broadcast %451 : vector<1x128xf32> to vector<32x128xf32>
    %453 = arith.addf %449, %452 : vector<32x128xf32>
    %454 = arith.addf %259, %453 : vector<32x128xf32>
    %c1_181 = arith.constant 1 : index
    %c0_182 = arith.constant 0 : index
    %c0_183 = arith.constant 0 : index
    %455 = vector.load %arg10[%c1_181, %c0_182, %c0_183] : memref<2x1x128xf32, #tpu.memory_space<vmem>>, vector<1x1x128xf32>
    %456 = vector.shape_cast %455 : vector<1x1x128xf32> to vector<1x128xf32>
    %c1_184 = arith.constant 1 : index
    %c0_185 = arith.constant 0 : index
    %c0_186 = arith.constant 0 : index
    %457 = vector.load %arg11[%c1_184, %c0_185, %c0_186] : memref<2x1x128xf32, #tpu.memory_space<vmem>>, vector<1x1x128xf32>
    %458 = vector.shape_cast %457 : vector<1x1x128xf32> to vector<1x128xf32>
    %cst_187 = arith.constant dense<0.000000e+00> : vector<32xf32>
    %459 = vector.multi_reduction <add>, %454, %cst_187 [1] : vector<32x128xf32> to vector<32xf32>
    %460 = vector.shape_cast %459 : vector<32xf32> to vector<32x1xf32>
    %cst_188 = arith.constant 1.280000e+02 : f32
    %461 = vector.broadcast %cst_188 : f32 to vector<32x1xf32>
    %462 = arith.divf %460, %461 : vector<32x1xf32>
    %463 = vector.broadcast %462 : vector<32x1xf32> to vector<32x128xf32>
    %464 = arith.subf %454, %463 : vector<32x128xf32>
    %465 = arith.mulf %464, %464 : vector<32x128xf32>
    %cst_189 = arith.constant dense<0.000000e+00> : vector<32xf32>
    %466 = vector.multi_reduction <add>, %465, %cst_189 [1] : vector<32x128xf32> to vector<32xf32>
    %467 = vector.shape_cast %466 : vector<32xf32> to vector<32x1xf32>
    %cst_190 = arith.constant 1.280000e+02 : f32
    %468 = vector.broadcast %cst_190 : f32 to vector<32x1xf32>
    %469 = arith.divf %467, %468 : vector<32x1xf32>
    %cst_191 = arith.constant 9.99999974E-6 : f32
    %470 = vector.broadcast %cst_191 : f32 to vector<32x1xf32>
    %471 = arith.addf %469, %470 : vector<32x1xf32>
    %472 = math.rsqrt %471 : vector<32x1xf32>
    %473 = vector.broadcast %472 : vector<32x1xf32> to vector<32x128xf32>
    %474 = arith.mulf %464, %473 : vector<32x128xf32>
    %475 = vector.broadcast %456 : vector<1x128xf32> to vector<32x128xf32>
    %476 = arith.mulf %474, %475 : vector<32x128xf32>
    %477 = vector.broadcast %458 : vector<1x128xf32> to vector<32x128xf32>
    %478 = arith.addf %476, %477 : vector<32x128xf32>
    %479 = arith.truncf %478 : vector<32x128xf32> to vector<32x128xbf16>
    %c1_192 = arith.constant 1 : index
    %c0_193 = arith.constant 0 : index
    %c0_194 = arith.constant 0 : index
    %480 = vector.load %arg12[%c1_192, %c0_193, %c0_194] : memref<2x128x512xbf16, #tpu.memory_space<vmem>>, vector<1x128x512xbf16>
    %481 = vector.shape_cast %480 : vector<1x128x512xbf16> to vector<128x512xbf16>
    %cst_195 = arith.constant dense<0.000000e+00> : vector<32x512xf32>
    %482 = tpu.matmul %479, %481, %cst_195 {dimension_numbers = #tpu.dot_dimension_numbers<[1], [0], [0], [1], [0, 0, 1, 1], [], []>} : vector<32x128xbf16>, vector<128x512xbf16>, vector<32x512xf32> -> vector<32x512xf32>
    %c1_196 = arith.constant 1 : index
    %c0_197 = arith.constant 0 : index
    %c0_198 = arith.constant 0 : index
    %483 = vector.load %arg13[%c1_196, %c0_197, %c0_198] : memref<2x1x512xf32, #tpu.memory_space<vmem>>, vector<1x1x512xf32>
    %484 = vector.shape_cast %483 : vector<1x1x512xf32> to vector<1x512xf32>
    %485 = vector.broadcast %484 : vector<1x512xf32> to vector<32x512xf32>
    %486 = arith.addf %482, %485 : vector<32x512xf32>
    %487 = arith.mulf %486, %486 : vector<32x512xf32>
    %488 = arith.mulf %486, %487 : vector<32x512xf32>
    %cst_199 = arith.constant 4.471500e-02 : f32
    %489 = vector.broadcast %cst_199 : f32 to vector<32x512xf32>
    %490 = arith.mulf %489, %488 : vector<32x512xf32>
    %491 = arith.addf %486, %490 : vector<32x512xf32>
    %cst_200 = arith.constant 0.797884583 : f32
    %492 = vector.broadcast %cst_200 : f32 to vector<32x512xf32>
    %493 = arith.mulf %492, %491 : vector<32x512xf32>
    %494 = math.tanh %493 : vector<32x512xf32>
    %cst_201 = arith.constant 1.000000e+00 : f32
    %495 = vector.broadcast %cst_201 : f32 to vector<32x512xf32>
    %496 = arith.addf %495, %494 : vector<32x512xf32>
    %cst_202 = arith.constant 5.000000e-01 : f32
    %497 = vector.broadcast %cst_202 : f32 to vector<32x512xf32>
    %498 = arith.mulf %497, %496 : vector<32x512xf32>
    %499 = arith.mulf %486, %498 : vector<32x512xf32>
    %500 = arith.truncf %499 : vector<32x512xf32> to vector<32x512xbf16>
    %c1_203 = arith.constant 1 : index
    %c0_204 = arith.constant 0 : index
    %c0_205 = arith.constant 0 : index
    %501 = vector.load %arg14[%c1_203, %c0_204, %c0_205] : memref<2x512x128xbf16, #tpu.memory_space<vmem>>, vector<1x512x128xbf16>
    %502 = vector.shape_cast %501 : vector<1x512x128xbf16> to vector<512x128xbf16>
    %cst_206 = arith.constant dense<0.000000e+00> : vector<32x128xf32>
    %503 = tpu.matmul %500, %502, %cst_206 {dimension_numbers = #tpu.dot_dimension_numbers<[1], [0], [0], [1], [0, 0, 1, 1], [], []>} : vector<32x512xbf16>, vector<512x128xbf16>, vector<32x128xf32> -> vector<32x128xf32>
    %c1_207 = arith.constant 1 : index
    %c0_208 = arith.constant 0 : index
    %c0_209 = arith.constant 0 : index
    %504 = vector.load %arg15[%c1_207, %c0_208, %c0_209] : memref<2x1x128xf32, #tpu.memory_space<vmem>>, vector<1x1x128xf32>
    %505 = vector.shape_cast %504 : vector<1x1x128xf32> to vector<1x128xf32>
    %506 = vector.broadcast %505 : vector<1x128xf32> to vector<32x128xf32>
    %507 = arith.addf %503, %506 : vector<32x128xf32>
    %508 = arith.addf %454, %507 : vector<32x128xf32>
    %c0_210 = arith.constant 0 : index
    %c0_211 = arith.constant 0 : index
    %509 = vector.load %arg16[%c0_210, %c0_211] : memref<1x128xf32, #tpu.memory_space<vmem>>, vector<1x128xf32>
    %c0_212 = arith.constant 0 : index
    %c0_213 = arith.constant 0 : index
    %510 = vector.load %arg17[%c0_212, %c0_213] : memref<1x128xf32, #tpu.memory_space<vmem>>, vector<1x128xf32>
    %cst_214 = arith.constant dense<0.000000e+00> : vector<32xf32>
    %511 = vector.multi_reduction <add>, %508, %cst_214 [1] : vector<32x128xf32> to vector<32xf32>
    %512 = vector.shape_cast %511 : vector<32xf32> to vector<32x1xf32>
    %cst_215 = arith.constant 1.280000e+02 : f32
    %513 = vector.broadcast %cst_215 : f32 to vector<32x1xf32>
    %514 = arith.divf %512, %513 : vector<32x1xf32>
    %515 = vector.broadcast %514 : vector<32x1xf32> to vector<32x128xf32>
    %516 = arith.subf %508, %515 : vector<32x128xf32>
    %517 = arith.mulf %516, %516 : vector<32x128xf32>
    %cst_216 = arith.constant dense<0.000000e+00> : vector<32xf32>
    %518 = vector.multi_reduction <add>, %517, %cst_216 [1] : vector<32x128xf32> to vector<32xf32>
    %519 = vector.shape_cast %518 : vector<32xf32> to vector<32x1xf32>
    %cst_217 = arith.constant 1.280000e+02 : f32
    %520 = vector.broadcast %cst_217 : f32 to vector<32x1xf32>
    %521 = arith.divf %519, %520 : vector<32x1xf32>
    %cst_218 = arith.constant 9.99999974E-6 : f32
    %522 = vector.broadcast %cst_218 : f32 to vector<32x1xf32>
    %523 = arith.addf %521, %522 : vector<32x1xf32>
    %524 = math.rsqrt %523 : vector<32x1xf32>
    %525 = vector.broadcast %524 : vector<32x1xf32> to vector<32x128xf32>
    %526 = arith.mulf %516, %525 : vector<32x128xf32>
    %527 = vector.broadcast %509 : vector<1x128xf32> to vector<32x128xf32>
    %528 = arith.mulf %526, %527 : vector<32x128xf32>
    %529 = vector.broadcast %510 : vector<1x128xf32> to vector<32x128xf32>
    %530 = arith.addf %528, %529 : vector<32x128xf32>
    %531 = arith.truncf %530 : vector<32x128xf32> to vector<32x128xbf16>
    %c0_219 = arith.constant 0 : index
    %c0_220 = arith.constant 0 : index
    %532 = vector.load %arg18[%c0_219, %c0_220] : memref<128x128xbf16, #tpu.memory_space<vmem>>, vector<128x128xbf16>
    %cst_221 = arith.constant dense<0.000000e+00> : vector<32x128xf32>
    %533 = tpu.matmul %531, %532, %cst_221 {dimension_numbers = #tpu.dot_dimension_numbers<[1], [0], [0], [1], [0, 0, 1, 1], [], []>} : vector<32x128xbf16>, vector<128x128xbf16>, vector<32x128xf32> -> vector<32x128xf32>
    %c0_222 = arith.constant 0 : index
    %c0_223 = arith.constant 0 : index
    %534 = vector.load %arg19[%c0_222, %c0_223] : memref<1x128xf32, #tpu.memory_space<vmem>>, vector<1x128xf32>
    %535 = vector.broadcast %534 : vector<1x128xf32> to vector<32x128xf32>
    %536 = arith.addf %533, %535 : vector<32x128xf32>
    %c0_224 = arith.constant 0 : index
    %c0_225 = arith.constant 0 : index
    %537 = vector.load %arg20[%c0_224, %c0_225] : memref<32x128xf32, #tpu.memory_space<vmem>>, vector<32x128xf32>
    tpu.vector_store %arg20[%c0_224, %c0_225], %536 {strides = array<i32>} : memref<32x128xf32, #tpu.memory_space<vmem>>, vector<32x128xf32>,
    return
  }
  func.func @transform_0(%arg0: i32) -> (i32, i32) {
    %c0_i32 = arith.constant 0 : i32
    %c0_i32_0 = arith.constant 0 : i32
    %c0_i32_1 = arith.constant 0 : i32
    return %c0_i32, %c0_i32_0 : i32, i32
  }
  func.func @transform_1(%arg0: i32) -> (i32, i32) {
    %c0_i32 = arith.constant 0 : i32
    %c0_i32_0 = arith.constant 0 : i32
    %c0_i32_1 = arith.constant 0 : i32
    return %c0_i32, %c0_i32_0 : i32, i32
  }
  func.func @transform_2(%arg0: i32) -> (i32, i32) {
    %c0_i32 = arith.constant 0 : i32
    %c0_i32_0 = arith.constant 0 : i32
    %c0_i32_1 = arith.constant 0 : i32
    return %c0_i32, %c0_i32_0 : i32, i32
  }
  func.func @transform_3(%arg0: i32) -> (i32, i32, i32) {
    %c0_i32 = arith.constant 0 : i32
    %c0_i32_0 = arith.constant 0 : i32
    %c0_i32_1 = arith.constant 0 : i32
    %c0_i32_2 = arith.constant 0 : i32
    return %c0_i32, %c0_i32_0, %c0_i32_1 : i32, i32, i32
  }
  func.func @transform_4(%arg0: i32) -> (i32, i32, i32) {
    %c0_i32 = arith.constant 0 : i32
    %c0_i32_0 = arith.constant 0 : i32
    %c0_i32_1 = arith.constant 0 : i32
    %c0_i32_2 = arith.constant 0 : i32
    return %c0_i32, %c0_i32_0, %c0_i32_1 : i32, i32, i32
  }
  func.func @transform_5(%arg0: i32) -> (i32, i32, i32) {
    %c0_i32 = arith.constant 0 : i32
    %c0_i32_0 = arith.constant 0 : i32
    %c0_i32_1 = arith.constant 0 : i32
    %c0_i32_2 = arith.constant 0 : i32
    return %c0_i32, %c0_i32_0, %c0_i32_1 : i32, i32, i32
  }
  func.func @transform_6(%arg0: i32) -> (i32, i32, i32) {
    %c0_i32 = arith.constant 0 : i32
    %c0_i32_0 = arith.constant 0 : i32
    %c0_i32_1 = arith.constant 0 : i32
    %c0_i32_2 = arith.constant 0 : i32
    return %c0_i32, %c0_i32_0, %c0_i32_1 : i32, i32, i32
  }
  func.func @transform_7(%arg0: i32) -> (i32, i32, i32) {
    %c0_i32 = arith.constant 0 : i32
    %c0_i32_0 = arith.constant 0 : i32
    %c0_i32_1 = arith.constant 0 : i32
    %c0_i32_2 = arith.constant 0 : i32
    return %c0_i32, %c0_i32_0, %c0_i32_1 : i32, i32, i32
  }
  func.func @transform_8(%arg0: i32) -> (i32, i32, i32) {
    %c0_i32 = arith.constant 0 : i32
    %c0_i32_0 = arith.constant 0 : i32
    %c0_i32_1 = arith.constant 0 : i32
    %c0_i32_2 = arith.constant 0 : i32
    return %c0_i32, %c0_i32_0, %c0_i32_1 : i32, i32, i32
  }
  func.func @transform_9(%arg0: i32) -> (i32, i32, i32) {
    %c0_i32 = arith.constant 0 : i32
    %c0_i32_0 = arith.constant 0 : i32
    %c0_i32_1 = arith.constant 0 : i32
    %c0_i32_2 = arith.constant 0 : i32
    return %c0_i32, %c0_i32_0, %c0_i32_1 : i32, i32, i32
  }
  func.func @transform_10(%arg0: i32) -> (i32, i32, i32) {
    %c0_i32 = arith.constant 0 : i32
    %c0_i32_0 = arith.constant 0 : i32
    %c0_i32_1 = arith.constant 0 : i32
    %c0_i32_2 = arith.constant 0 : i32
    return %c0_i32, %c0_i32_0, %c0_i32_1 : i32, i32, i32
  }
  func.func @transform_11(%arg0: i32) -> (i32, i32, i32) {
    %c0_i32 = arith.constant 0 : i32
    %c0_i32_0 = arith.constant 0 : i32
    %c0_i32_1 = arith.constant 0 : i32
    %c0_i32_2 = arith.constant 0 : i32
    return %c0_i32, %c0_i32_0, %c0_i32_1 : i32, i32, i32
  }
  func.func @transform_12(%arg0: i32) -> (i32, i32, i32) {
    %c0_i32 = arith.constant 0 : i32
    %c0_i32_0 = arith.constant 0 : i32
    %c0_i32_1 = arith.constant 0 : i32
    %c0_i32_2 = arith.constant 0 : i32
    return %c0_i32, %c0_i32_0, %c0_i32_1 : i32, i32, i32
  }
  func.func @transform_13(%arg0: i32) -> (i32, i32, i32) {
    %c0_i32 = arith.constant 0 : i32
    %c0_i32_0 = arith.constant 0 : i32
    %c0_i32_1 = arith.constant 0 : i32
    %c0_i32_2 = arith.constant 0 : i32
    return %c0_i32, %c0_i32_0, %c0_i32_1 : i32, i32, i32
  }
  func.func @transform_14(%arg0: i32) -> (i32, i32, i32) {
    %c0_i32 = arith.constant 0 : i32
    %c0_i32_0 = arith.constant 0 : i32
    %c0_i32_1 = arith.constant 0 : i32
    %c0_i32_2 = arith.constant 0 : i32
    return %c0_i32, %c0_i32_0, %c0_i32_1 : i32, i32, i32
  }
  func.func @transform_15(%arg0: i32) -> (i32, i32) {
    %c0_i32 = arith.constant 0 : i32
    %c0_i32_0 = arith.constant 0 : i32
    %c0_i32_1 = arith.constant 0 : i32
    return %c0_i32, %c0_i32_0 : i32, i32
  }
  func.func @transform_16(%arg0: i32) -> (i32, i32) {
    %c0_i32 = arith.constant 0 : i32
    %c0_i32_0 = arith.constant 0 : i32
    %c0_i32_1 = arith.constant 0 : i32
    return %c0_i32, %c0_i32_0 : i32, i32
  }
  func.func @transform_17(%arg0: i32) -> (i32, i32) {
    %c0_i32 = arith.constant 0 : i32
    %c0_i32_0 = arith.constant 0 : i32
    %c0_i32_1 = arith.constant 0 : i32
    return %c0_i32, %c0_i32_0 : i32, i32
  }
  func.func @transform_18(%arg0: i32) -> (i32, i32) {
    %c0_i32 = arith.constant 0 : i32
    %c0_i32_0 = arith.constant 0 : i32
    %c0_i32_1 = arith.constant 0 : i32
    return %c0_i32, %c0_i32_0 : i32, i32
  }
  func.func @transform_19(%arg0: i32) -> (i32, i32) {
    %c0_i32 = arith.constant 0 : i32
    %c0_i32_0 = arith.constant 0 : i32
    %c0_i32_1 = arith.constant 0 : i32
    return %c0_i32, %c0_i32_0 : i32, i32
  }
}

</mosaic_0001>

<bundles_post_ra>
// kernel: forward.1
= control target key start
LH: loop header
LB: loop body
LE: loop exit
PB: predicated region body
PF: predicated region fallthrough
CT: control target
= control target key end

     0   :  { %s8422_s0 = inlined_call_operand.vmem [shape: bf16[32,256], index: 0, kind: input, shape index: {}]   ;;  %s8423_s1 = inlined_call_operand.vmem [shape: bf16[256,128], index: 1, kind: input, shape index: {}]   ;;  %s8424_s2 = inlined_call_operand.hbm [shape: f32[32,128], index: 2, kind: input, shape index: {}]   ;;  %s8425_s3 = inlined_call_operand.vmem [shape: f32[2,1,128], index: 3, kind: input, shape index: {}]   ;;  %s8426_s4 = inlined_call_operand.vmem [shape: f32[2,1,128], index: 4, kind: input, shape index: {}]   ;;  %s8427_s5 = inlined_call_operand.hbm [shape: bf16[2,128,384], index: 5, kind: input, shape index: {}]   ;;  %s8428_s6 = inlined_call_operand.vmem [shape: f32[2,1,384], index: 6, kind: input, shape index: {}]   ;;  %s8429_s7 = inlined_call_operand.hbm [shape: bf16[2,128,128], index: 7, kind: input, shape index: {}]   ;;  %s8430_s8 = inlined_call_operand.vmem [shape: f32[2,1,128], index: 8, kind: input, shape index: {}]   ;;  %s8431_s9 = inlined_call_operand.vmem [shape: f32[2,1,128], index: 9, kind: input, shape index: {}]   ;;  %s8432_s10 = inlined_call_operand.vmem [shape: f32[2,1,128], index: 10, kind: input, shape index: {}]   ;;  %s8433_s11 = inlined_call_operand.vmem [shape: bf16[2,128,512], index: 11, kind: input, shape index: {}]   ;;  %s8434_s12 = inlined_call_operand.vmem [shape: f32[2,1,512], index: 12, kind: input, shape index: {}]   ;;  %s8435_s13 = inlined_call_operand.hbm [shape: bf16[2,512,128], index: 13, kind: input, shape index: {}]   ;;  %s8436_s14 = inlined_call_operand.vmem [shape: f32[2,1,128], index: 14, kind: input, shape index: {}]   ;;  %s8437_s15 = inlined_call_operand.vmem [shape: f32[1,128], index: 15, kind: input, shape index: {}]   ;;  %s8438_s16 = inlined_call_operand.vmem [shape: f32[1,128], index: 16, kind: input, shape index: {}]   ;;  %s8439_s17 = inlined_call_operand.vmem [shape: bf16[128,128], index: 17, kind: input, shape index: {}]   ;;  %s8440_s18 = inlined_call_operand.hbm [shape: f32[1,128], index: 18, kind: input, shape index: {}]   ;;  %s8441_s19 = inlined_call_operand.vmem [shape: f32[32,128], index: 19, kind: output, shape index: {}]  }
   0x1   :  { %8445 = sst [smem:[#allocation14_spill]] %s8422_s0 }
   0x2   :  { %8446 = sst [smem:[#allocation15_spill]] %s8423_s1 }
   0x3   :  { %8447 = sst [smem:[#allocation16_spill]] %s8424_s2 }
   0x4   :  { %8448 = sst [smem:[#allocation17_spill]] %s8425_s3 }
   0x5   :  { %24 = vsyncpa [#allocation4], 0 }
   0x6   :  { %25 = vsyncpa [#allocation6], 0 }
   0x7   :  { %26 = vsyncpa [#allocation9], 0  ;;  %s6857_s0 = smov [#allocation5]  }
   0x8   :  { %s52_s30 = sshll.u32 %s6857_s0, 4  ;;  %s53_s30 = int_to_ptr.vmem [resolvable:$true] %s52_s30 }
   0x9   :  { %s6759_s20 = scalar_lea.vmem %s53_s30, 6144  ;;  %p6764_p1 = scmp.lt.s32.totalorder %s53_s30, %s53_s30 }
   0xa   :  { %p6760_p0 = scmp.ne.s32.totalorder %s53_s30, %s6759_s20  ;;  %p6765_p2 = scmp.lt.s32.totalorder %s6759_s20, %s6759_s20 }
   0xc   :  { %p6766_p3 = por %p6765_p2, %p6764_p1 }
   0xe   :  { %p6767_p4 = pnand %p6766_p3, %p6760_p0 }
  0x10   :  { %6770 = shalt.err (!%p6767_p4)
}
  0x11   :  { %s6858_s21 = smov 192   ;;  %s6859_s1 = smov 12  }
  0x12   :  { %58 = dma.hbm_to_vmem [thread:$0]  %s8427_s5, 6144, %s53_s30, [#allocation6], %s6858_s21, %s6858_s21, %s6859_s1  }
  0x13   :  { %s6860_s23 = smov [#allocation8]   ;;  %s6861_s25 = smov [#allocation3]  }
  0x14   :  { %s88_s24 = sshll.u32 %s6860_s23, 4  ;;  %s36_s3 = sshll.u32 %s6861_s25, 4  ;;  %s89_s24 = int_to_ptr.vmem [resolvable:$true] %s88_s24  ;;  %s37_s3 = int_to_ptr.vmem [resolvable:$true] %s36_s3 }
  0x15   :  { %s6779_s26 = scalar_lea.vmem %s89_s24, 8192  ;;  %p6784_p6 = scmp.lt.s32.totalorder %s89_s24, %s89_s24 }
  0x16   :  { %p6780_p5 = scmp.ne.s32.totalorder %s89_s24, %s6779_s26  ;;  %p6785_p7 = scmp.lt.s32.totalorder %s6779_s26, %s6779_s26 }
  0x18   :  { %p6786_p8 = por %p6785_p7, %p6784_p6 }
  0x1a   :  { %p6787_p9 = pnand %p6786_p8, %p6780_p5 }
  0x1c   :  { %6790 = shalt.err (!%p6787_p9)
}
  0x1d   :  { %s6862_s27 = smov 64   ;;  %s6863_s28 = smov 4  }
  0x1e   :  { %94 = dma.hbm_to_vmem [thread:$0]  %s8435_s13, 8192, %s89_s24, [#allocation9], %s6862_s27, %s6862_s27, %s6863_s28  }
  0x1f   :  { %s6799_s5 = scalar_lea.vmem %s37_s3, 512  ;;  %p6804_p11 = scmp.lt.s32.totalorder %s37_s3, %s37_s3 }
  0x20   :  { %p6800_p10 = scmp.ne.s32.totalorder %s37_s3, %s6799_s5  ;;  %p6805_p12 = scmp.lt.s32.totalorder %s6799_s5, %s6799_s5 }
  0x22   :  { %p6806_p13 = por %p6805_p12, %p6804_p11 }
  0x24   :  { %p6807_p0 = pnand %p6806_p13, %p6800_p10 }
  0x26   :  { %6810 = shalt.err (!%p6807_p0)
}
  0x27   :  { %s6864_s30 = smov 128   ;;  %s6865_s20 = smov 8  }
  0x28   :  { %s8449_s22 = sld [smem:[#allocation16_spill]]  ;;  %s6866_s2 = smov [#allocation7]  }
  0x29   :  { %s66_s23 = sshll.u32 %s6866_s2, 4  ;;  %s6867_s25 = smov [#allocation10]   ;;  %s67_s23 = int_to_ptr.vmem [resolvable:$true] %s66_s23 }
  0x2a   :  { %s109_s26 = sshll.u32 %s6867_s25, 4  ;;  %s6819_s13 = scalar_lea.vmem %s67_s23, 2048  ;;  %s110_s26 = int_to_ptr.vmem [resolvable:$true] %s109_s26 }
  0x2b   :  { %p6820_p1 = scmp.ne.s32.totalorder %s67_s23, %s6819_s13  ;;  %p6824_p2 = scmp.lt.s32.totalorder %s67_s23, %s67_s23 }
  0x2c   :  { %p6825_p3 = scmp.lt.s32.totalorder %s6819_s13, %s6819_s13 }
  0x2e   :  { %42 = dma.hbm_to_vmem [thread:$0]  %s8449_s22, 512, %s37_s3, [#allocation4], %s6864_s30, %s6864_s30, %s6865_s20  }
  0x2f   :  { %p6826_p4 = por %p6825_p3, %p6824_p2 }
  0x31   :  { %p6827_p5 = pnand %p6826_p4, %p6820_p1 }
  0x33   :  { %6830 = shalt.err (!%p6827_p5)
}
  0x34   :  { %72 = dma.hbm_to_vmem [thread:$0]  %s8429_s7, 2048, %s67_s23, [#allocation6], %s6862_s27, %s6862_s27, %s6863_s28  }
  0x35   :  { %s6839_s3 = scalar_lea.vmem %s110_s26, 16  ;;  %s6843_s0 = scalar_lea.vmem %s110_s26, 32 }
  0x36   :  { %p6840_p6 = scmp.ne.s32.totalorder %s110_s26, %s6839_s3  ;;  %p6844_p7 = scmp.lt.s32.totalorder %s110_s26, %s110_s26 }
  0x37   :  { %p6845_p8 = scmp.lt.s32.totalorder %s6843_s0, %s6839_s3 }
  0x39   :  { %p6846_p9 = por %p6845_p8, %p6844_p7 }
  0x3b   :  { %p6847_p10 = pnand %p6846_p9, %p6840_p6 }
  0x3d   :  { %6850 = shalt.err (!%p6847_p10)
}
  0x3e   :  { %112 = dma.hbm_to_vmem [thread:$0]  %s8440_s18, 16, %s110_s26, [#allocation9]  }
  0x3f   :  { %6851 = dma.done.wait [#allocation4], 512  }
  0x40   :  { %6852 = vsyncadd [#allocation4], 4294966784 }
  0x41   :  { %6853 = dma.done.wait [#allocation6], 8192  }
  0x42   :  { %6854 = vsyncadd [#allocation6], 4294959104 }
  0x43   :  { %6855 = dma.done.wait [#allocation9], 8208  }
  0x44   :  { %6856 = vsyncadd [#allocation9], 4294959088  ;;  %s8450_s20 = sld [smem:[#allocation15_spill]]  ;;  %v165_v21 = vld [vmem:[#allocation3] sm:$0xff]  ;;  %v166_v26 = vld [vmem:[#allocation3 + $0x8] sm:$0xff]  ;;  %vm6870_vm0 = vmmov 0  }
  0x45   :  { %s8451_s23 = sld [smem:[#allocation14_spill]]  ;;  %v167_v31 = vld [vmem:[#allocation3 + $0x10] sm:$0xff]  ;;  %v6271_v35 = vld [vmem:[#allocation5 + $0xac] ss:$12 sps:$4 sm:$0xff]   ;;  %v6277_v56 = vld [vmem:[#allocation5 + $0x7c] ss:$12 sps:$4 sm:$0xff]  }
  0x46   :  { %v6273_v36 = vld [vmem:[#allocation5 + $0xa8] ss:$12 sps:$4 sm:$0xff]   ;;  %584 = vmatprep.subr.bf16.mxu1 %v6271_v35  ;;  %v168_v48 = vld [vmem:[#allocation3 + $0x18] sm:$0xff]  ;;  %v6280_v58 = vld [vmem:[#allocation5 + $0x64] ss:$12 sps:$4 sm:$0xff]   ;;  %s8452_s25 = sld [smem:[#allocation17_spill]] }
  0x47   :  { %585 = vmatpush1.bf16.msra.mxu1 %v6273_v36  ;;  %v6274_v54 = vld [vmem:[#allocation5 + $0x94] ss:$12 sps:$4 sm:$0xff]   ;;  %v6276_v55 = vld [vmem:[#allocation5 + $0x90] ss:$12 sps:$4 sm:$0xff]   ;;  %v6279_v57 = vld [vmem:[#allocation5 + $0x78] ss:$12 sps:$4 sm:$0xff]  }
  0x48   :  { %586 = vmatprep.subr.bf16.mxu1 %v6274_v54  ;;  %v6282_v59 = vld [vmem:[#allocation5 + $0x60] ss:$12 sps:$4 sm:$0xff]   ;;  %v6285_v61 = vld [vmem:[#allocation5 + $0x48] ss:$12 sps:$4 sm:$0xff]   ;;  %v6288_v63 = vld [vmem:[#allocation5 + $0x30] ss:$12 sps:$4 sm:$0xff]  }
  0x49   :  { %v6283_v60 = vld [vmem:[#allocation5 + $0x4c] ss:$12 sps:$4 sm:$0xff]   ;;  %v6286_v62 = vld [vmem:[#allocation5 + $0x34] ss:$12 sps:$4 sm:$0xff]   ;;  %vm692_vm1 = vcmask 261120   ;;  %vm740_vm3 = vcmask 130048  }
  0x4a   :  { %v6249_v0 = vld [vmem:[%s8450_s20 + $0x78] sm:$0xff]   ;;  %v6251_v2 = vld [vmem:[%s8450_s20 + $0x70] sm:$0xff]   ;;  %v6253_v4 = vld [vmem:[%s8450_s20 + $0x68] sm:$0xff]   ;;  %s6872_s3 = smov 96   ;;  %s6873_s0 = smov 32   ;;  %vm942_vm4 = vcmask 523520  }
  0x4b   :  { %v6250_v1 = vld [vmem:[%s8450_s20 + $0x38] sm:$0xff]   ;;  %5686 = vmatprep.subr.bf16.mxu0 %v6249_v0  ;;  %v6252_v3 = vld [vmem:[%s8450_s20 + $0x30] sm:$0xff]   ;;  %v6254_v5 = vld [vmem:[%s8450_s20 + $0x28] sm:$0xff]   ;;  %587 = vmatpush1.bf16.msra.mxu1 %v6276_v55  ;;  %v334_v55 = vlaneseq  ;;  %vm1074_vm5 = vcmask 785920   ;;  %vm1206_vm6 = vcmask 1048320  }
  0x4c   :  { %5687 = vmatpush3.bf16.msra.mxu0 %v6250_v1  ;;  %v6255_v6 = vld [vmem:[%s8450_s20 + $0x60] sm:$0xff]   ;;  %v6257_v8 = vld [vmem:[%s8450_s20 + $0x58] sm:$0xff]   ;;  %v6259_v10 = vld [vmem:[%s8450_s20 + $0x50] sm:$0xff]   ;;  %588 = vmatprep.subr.bf16.mxu1 %v6277_v56  ;;  %v6868_v1 = vmov 0  }
  0x4d   :  { %5688 = vmatprep.subr.bf16.mxu0 %v6251_v2  ;;  %v6256_v7 = vld [vmem:[%s8450_s20 + $0x20] sm:$0xff]   ;;  %v6258_v9 = vld [vmem:[%s8450_s20 + $0x18] sm:$0xff]   ;;  %v6260_v12 = vld [vmem:[%s8450_s20 + $0x10] sm:$0xff]   ;;  %616 = vmatprep.mubr.bf16.mxu1 %v6868_v1  ;;  %v7098_v56 = vshrl.u32 %v334_v55, 7 }
  0x4e   :  { %v6267_v11 = vld [vmem:[%s8451_s23 + $0x4] ss:$8 sps:$4 sm:$0xff]   ;;  %v6265_v17 = vld [vmem:[%s8451_s23] ss:$8 sps:$4 sm:$0xff]   ;;  %v6268_v18 = vld [vmem:[%s8451_s23 + $0x14] ss:$8 sps:$4 sm:$0xff]  }
  0x4f   :  { %v6261_v13 = vld [vmem:[%s8450_s20 + $0x48] sm:$0xff]   ;;  %317 = vmatprep.mubr.bf16.mxu0 %v6267_v11  ;;  %v6263_v15 = vld [vmem:[%s8450_s20 + $0x40] sm:$0xff]   ;;  %v6270_v19 = vld [vmem:[%s8451_s23 + $0x10] ss:$8 sps:$4 sm:$0xff]   ;;  %589 = vmatpush1.bf16.msra.mxu1 %v6279_v57 }
  0x50   :  { %5689 = vmatpush3.bf16.msra.mxu0 %v6252_v3  ;;  %v6262_v14 = vld [vmem:[%s8450_s20 + $0x8] sm:$0xff]   ;;  %v6264_v16 = vld [vmem:[%s8450_s20] sm:$0xff]   ;;  %590 = vmatprep.subr.bf16.mxu1 %v6280_v58 }
  0x51   :  { %5690 = vmatprep.subr.bf16.mxu0 %v6253_v4  ;;  %v6289_v0 = vld [vmem:[#allocation5 + $0x1c] ss:$12 sps:$4 sm:$0xff]   ;;  %v6291_v2 = vld [vmem:[#allocation5 + $0x18] ss:$12 sps:$4 sm:$0xff]   ;;  %v6294_v4 = vld [vmem:[#allocation5] ss:$12 sps:$4 sm:$0xff]  }
  0x52   :  { %v6292_v3 = vld [vmem:[#allocation5 + $0x4] ss:$12 sps:$4 sm:$0xff]   ;;  %v6301_v35 = vld [vmem:[#allocation5 + $0x20] ss:$12 sps:$4 sm:$0xff]   ;;  %v6302_v36 = vld [vmem:[#allocation5 + $0x8] ss:$12 sps:$4 sm:$0xff]  }
  0x53   :  { %591 = vmatpush1.bf16.msra.mxu1 %v6282_v59  ;;  %v439_v58 = vld [vmem:[%s8428_s6] sm:$0x7] }
  0x54   :  { %5691 = vmatpush3.bf16.msra.mxu0 %v6254_v5  ;;  %592 = vmatprep.subr.bf16.mxu1 %v6283_v60  ;;  %v6295_v5 = vld [vmem:[#allocation5 + $0xb0] ss:$12 sps:$4 sm:$0xff]  }
  0x55   :  { %5692 = vmatprep.subr.bf16.mxu0 %v6255_v6  ;;  %v6296_v6 = vld [vmem:[#allocation5 + $0x98] ss:$12 sps:$4 sm:$0xff]  }
  0x57   :  { %593 = vmatpush1.bf16.msra.mxu1 %v6285_v61 }
  0x58   :  { %5693 = vmatpush3.bf16.msra.mxu0 %v6256_v7  ;;  %594 = vmatprep.subr.bf16.mxu1 %v6286_v62 }
  0x59   :  { %5694 = vmatprep.subr.bf16.mxu0 %v6257_v8 }
  0x5b   :  { %595 = vmatpush1.bf16.msra.mxu1 %v6288_v63  ;;  %v7108_v63 = vsub.s32 0, %v7098_v56 }
  0x5c   :  { %5695 = vmatpush3.bf16.msra.mxu0 %v6258_v9  ;;  %596 = vmatprep.subr.bf16.mxu1 %v6289_v0 }
  0x5d   :  { %5696 = vmatprep.subr.bf16.mxu0 %v6259_v10 }
  0x5f   :  { %597 = vmatpush1.bf16.msra.mxu1 %v6291_v2 }
  0x60   :  { %5697 = vmatpush3.bf16.msra.mxu0 %v6260_v12  ;;  %598 = vmatprep.subr.bf16.mxu1 %v6292_v3 }
  0x61   :  { %5698 = vmatprep.subr.bf16.mxu0 %v6261_v13 }
  0x63   :  { %599 = vmatpush1.bf16.msra.mxu1 %v6294_v4  ;;  %v444_v4 = vrot.slane %v439_v58, %v7108_v63 }
  0x64   :  { %5699 = vmatpush3.bf16.msra.mxu0 %v6262_v14 }
  0x65   :  { %5700 = vmatprep.subr.bf16.mxu0 %v6263_v15 }
  0x68   :  { %5701 = vmatpush3.bf16.msra.mxu0 %v6264_v16 }
  0x69   :  { %5940 = vmatprep.subr.bf16.mxu0 %v6295_v5 }
  0x6b   :  { %318 = vmatmul.mubr.bf16.vlgmr.msra.gmra.mxu0 %v6265_v17 }
  0x6c   :  { %325 = vmatprep.mubr.bf16.mxu0 %v6268_v18  ;;  %5941 = vmatpush3.bf16.msra.mxu0 %v6295_v5 }
  0x6d   :  { %5942 = vmatprep.subr.bf16.mxu0 %v6296_v6 }
  0x70   :  { %5943 = vmatpush3.bf16.msra.mxu0 %v6296_v6 }
  0x73   :  { %326 = vmatmul.mubr.bf16.gmra.mxu0 %v6270_v19  ;;  %v5399_v19 = vld [vmem:[%s8452_s25] ss:$0 sm:$0xff] }
 0x12b   :  { %v5702_v20 = vpop.f32.mrf.mxu0 }
 0x12d   :  { %v5703_v22 = vpop.f32.mrf.mxu0 }
 0x12e   :  { %v5704_v23 = vadd.f32 %v5703_v22, %v5702_v20 }
 0x12f   :  { %v5705_v24 = vpop.f32.mrf.mxu0 }
 0x130   :  { %v7053_v25 = vadd.f32 %v5704_v23, %v165_v21  ;;  %v5400_v23 = vld [vmem:[%s8426_s4] ss:$0 sm:$0xff] }
 0x131   :  { %v5706_v27 = vpop.f32.mrf.mxu0 }
 0x132   :  { %v5707_v28 = vadd.f32 %v5706_v27, %v5705_v24  ;;  %340 = vadd.xlane.f32.xlu0 %v7053_v25 }
 0x133   :  { %v5708_v29 = vpop.f32.mrf.mxu0 }
 0x134   :  { %v7056_v30 = vadd.f32 %v5707_v28, %v166_v26  ;;  %v6297_v26 = vld [vmem:[#allocation5 + $0x80] ss:$12 sps:$4 sm:$0xff]  }
 0x135   :  { %v5709_v32 = vpop.f32.mrf.mxu0  ;;  %5944 = vmatprep.subr.bf16.mxu0 %v6297_v26 }
 0x136   :  { %v5710_v33 = vadd.f32 %v5709_v32, %v5708_v29  ;;  %342 = vadd.xlane.f32.xlu0 %v7056_v30  ;;  %5945 = vmatpush3.bf16.msra.mxu0 %v6297_v26  ;;  %v6299_v32 = vld [vmem:[#allocation5 + $0x50] ss:$12 sps:$4 sm:$0xff]  }
 0x137   :  { %v5711_v38 = vpop.f32.mrf.mxu0 }
 0x138   :  { %v7059_v34 = vadd.f32 %v5710_v33, %v167_v31  ;;  %v6298_v31 = vld [vmem:[#allocation5 + $0x68] ss:$12 sps:$4 sm:$0xff]   ;;  %v6300_v33 = vld [vmem:[#allocation5 + $0x38] ss:$12 sps:$4 sm:$0xff]  }
 0x139   :  { %v5712_v42 = vpop.f32.mrf.mxu0  ;;  %5946 = vmatprep.subr.bf16.mxu0 %v6298_v31 }
 0x13a   :  { %344 = vadd.xlane.f32.xlu0 %v7059_v34  ;;  %v5713_v45 = vadd.f32 %v5712_v42, %v5711_v38  ;;  %5947 = vmatpush3.bf16.msra.mxu0 %v6298_v31 }
 0x13b   :  { %5948 = vmatprep.subr.bf16.mxu0 %v6299_v32 }
 0x13c   :  { %v7072_v51 = vadd.f32 %v5713_v45, %v168_v48 }
 0x13e   :  { %5949 = vmatpush3.bf16.msra.mxu0 %v6299_v32 }
 0x13f   :  { %5950 = vmatprep.subr.bf16.mxu0 %v6300_v33 }
 0x142   :  { %5951 = vmatpush3.bf16.msra.mxu0 %v6300_v33  ;;  %v335_v33 = vand.u32 127, %v334_v55 }
 0x143   :  { %5952 = vmatprep.subr.bf16.mxu0 %v6301_v35 }
 0x144   :  { %vm336_vm2 = vcmp.lt.s32.totalorder %v335_v33, 9 }
 0x146   :  { %5953 = vmatpush3.bf16.msra.mxu0 %v6301_v35  ;;  %v6871_v35 = vmov -1e+30  }
 0x147   :  { %5954 = vmatprep.subr.bf16.mxu0 %v6302_v36 }
 0x14a   :  { %5955 = vmatpush3.bf16.msra.mxu0 %v6302_v36  ;;  %v7136_v36 = vsel %vm336_vm2, 0.0, %v6871_v35 }
 0x1bb   :  { %v341_v37 = vpop.xlane.xlu0 %340 }
 0x1bc   :  { %v349_v39 = vmul.f32 0.0078125, %v341_v37  ;;  %v6869_v37 = vmov 0.0  }
 0x1bd   :  { %5960 = vmatprep.subr.bf16.mxu1 %v6869_v37  ;;  %5978 = vmatprep.subr.bf16.mxu0 %v6869_v37 }
 0x1be   :  { %v7063_v40 = vsub.f32 %v7053_v25, %v349_v39 }
 0x1bf   :  { %v343_v41 = vpop.xlane.xlu0 %342 }
 0x1c0   :  { %v350_v43 = vmul.f32 0.0078125, %v343_v41  ;;  %v357_v44 = vmul.f32 %v7063_v40, %v7063_v40 }
 0x1c2   :  { %361 = vadd.xlane.f32.xlu1 %v357_v44  ;;  %v7068_v46 = vsub.f32 %v7056_v30, %v350_v43 }
 0x1c3   :  { %v345_v47 = vpop.xlane.xlu0 %344 }
 0x1c4   :  { %v351_v49 = vmul.f32 0.0078125, %v345_v47  ;;  %v358_v50 = vmul.f32 %v7068_v46, %v7068_v46 }
 0x1c6   :  { %363 = vadd.xlane.f32.xlu1 %v358_v50  ;;  %v7075_v52 = vsub.f32 %v7059_v34, %v351_v49 }
 0x1c8   :  { %v359_v53 = vmul.f32 %v7075_v52, %v7075_v52 }
 0x1ca   :  { %346 = vadd.xlane.f32.xlu1 %v7072_v51  ;;  %365 = vadd.xlane.f32.xlu0 %v359_v53 }
 0x24b   :  { %v362_v7 = vpop.xlane.xlu1 %361 }
 0x24c   :  { %v369_v8 = vmul.f32 0.0078125, %v362_v7 }
 0x24e   :  { %v373_v9 = vadd.f32 1e-05, %v369_v8 }
 0x24f   :  { %v364_v10 = vpop.xlane.xlu1 %363 }
 0x250   :  { %6519 = vrsqrt.f32 %v373_v9  ;;  %v370_v11 = vmul.f32 0.0078125, %v364_v10  ;;  %v7123_v9 = vsub.s32 2, %v7098_v56 }
 0x252   :  { %v374_v12 = vadd.f32 1e-05, %v370_v11  ;;  %v452_v10 = vrot.slane %v439_v58, %v7123_v9 }
 0x253   :  { %v347_v13 = vpop.xlane.xlu1 %346  ;;  %v366_v38 = vpop.xlane.xlu0 %365 }
 0x254   :  { %6521 = vrsqrt.f32 %v374_v12  ;;  %v352_v14 = vmul.f32 0.0078125, %v347_v13  ;;  %v371_v39 = vmul.f32 0.0078125, %v366_v38 }
 0x256   :  { %v356_v15 = vsub.f32 %v7072_v51, %v352_v14 }
 0x258   :  { %v360_v16 = vmul.f32 %v356_v15, %v356_v15 }
 0x25a   :  { %367 = vadd.xlane.f32.xlu1 %v360_v16 }
 0x25d   :  { %v6520_v17 = vpop.eup %6519 }
 0x25e   :  { %v381_v18 = vmul.f32 %v6520_v17, %v7063_v40  ;;  %v375_v40 = vadd.f32 1e-05, %v371_v39 }
 0x260   :  { %v391_v22 = vmul.f32 %v5399_v19, %v381_v18  ;;  %6523 = vrsqrt.f32 %v375_v40 }
 0x261   :  { %v6522_v20 = vpop.eup %6521 }
 0x262   :  { %v382_v21 = vmul.f32 %v6522_v20, %v7068_v46  ;;  %v401_v27 = vadd.f32 %v5400_v23, %v391_v22 }
 0x264   :  { %v392_v24 = vmul.f32 %v5399_v19, %v382_v21 }
 0x266   :  { %v402_v28 = vadd.f32 %v5400_v23, %v392_v24 }
 0x268   :  { %v405_v29 = vpack.c.bf16 %v402_v28, %v401_v27 }
 0x26a   :  { %617 = vmatmul.mubr.bf16.vlgmr.msra.gmra.mxu1 %v405_v29  ;;  %5956 = vmatprep.mubr.bf16.mxu0 %v405_v29 }
 0x26b   :  { %626 = vmatprep.mubr.bf16.mxu1 %v6868_v1 }
 0x26d   :  { %v6524_v44 = vpop.eup %6523 }
 0x26e   :  { %v383_v45 = vmul.f32 %v6524_v44, %v7075_v52  ;;  %v7101_v52 = vsub.s32 1, %v7098_v56 }
 0x270   :  { %v393_v48 = vmul.f32 %v5399_v19, %v383_v45  ;;  %v448_v60 = vrot.slane %v439_v58, %v7101_v52 }
 0x272   :  { %v403_v50 = vadd.f32 %v5400_v23, %v393_v48 }
 0x2e3   :  { %v368_v41 = vpop.xlane.xlu1 %367 }
 0x2e4   :  { %v372_v42 = vmul.f32 0.0078125, %v368_v41 }
 0x2e6   :  { %v376_v43 = vadd.f32 1e-05, %v372_v42 }
 0x2e8   :  { %6525 = vrsqrt.f32 %v376_v43 }
 0x2f5   :  { %v6526_v46 = vpop.eup %6525 }
 0x2f6   :  { %v384_v47 = vmul.f32 %v6526_v46, %v356_v15 }
 0x2f8   :  { %v394_v49 = vmul.f32 %v5399_v19, %v384_v47 }
 0x2fa   :  { %v404_v53 = vadd.f32 %v5400_v23, %v394_v49 }
 0x2fc   :  { %v406_v54 = vpack.c.bf16 %v404_v53, %v403_v50 }
 0x2fe   :  { %627 = vmatmul.mubr.bf16.gmra.mxu1 %v406_v54  ;;  %5957 = vmatmul.mubr.bf16.vlgmr.msra.gmra.mxu0 %v406_v54 }
 0x2ff   :  { %5962 = vmatprep.mubr.msk.bf16.mxu1 %vm6870_vm0, %v6869_v37  ;;  %5980 = vmatprep.mubr.msk.bf16.mxu0 %vm6870_vm0, %v6869_v37 }
 0x32a   :  { %v618_v57 = vpop.f32.mrf.mxu1 }
 0x32b   :  { %v619_v7 = vadd.f32 %v618_v57, %v444_v4 }
 0x32c   :  { %v620_v59 = vpop.f32.mrf.mxu1 }
 0x32d   :  { %v621_v0 = vadd.f32 %v620_v59, %v448_v60 }
 0x32e   :  { %v622_v61 = vpop.f32.mrf.mxu1 }
 0x32f   :  { %v623_v6 = vadd.f32 %v622_v61, %v444_v4 }
 0x330   :  { %v624_v62 = vpop.f32.mrf.mxu1 }
 0x331   :  { %v625_v2 = vadd.f32 %v624_v62, %v448_v60  ;;  %v7116_v8 = vpack.c.bf16 %v623_v6, %v619_v7 }
 0x333   :  { %v7110_v3 = vpack.c.bf16 %v625_v2, %v621_v0 }
 0x335   :  { %v697_v5 = vsel %vm692_vm1, %v7110_v3, 0 }
 0x336   :  { %5961 = vmatpush3.bf16.xpose.msra.mxu1 %v697_v5 }
 0x337   :  { %5966 = vmatprep.subr.bf16.mxu1 %v6869_v37 }
 0x33d   :  { %5963 = vmatmul.mubr.msk.bf16.vlgmr.msra.gmra.mxu1 %vm692_vm1, %v7116_v8 }
 0x33e   :  { %5968 = vmatprep.mubr.msk.bf16.mxu1 %vm6870_vm0, %v6869_v37 }
 0x3be   :  { %v628_v11 = vpop.f32.mrf.mxu1  ;;  %v5958_v12 = vpop.f32.mrf.mxu0 }
 0x3bf   :  { %v680_v13 = vadd.f32 %v5958_v12, %v452_v10  ;;  %v629_v18 = vadd.f32 %v628_v11, %v444_v4 }
 0x3c0   :  { %v630_v14 = vpop.f32.mrf.mxu1  ;;  %v671_v15 = vpop.f32.mrf.mxu0 }
 0x3c1   :  { %v631_v21 = vadd.f32 %v630_v14, %v448_v60  ;;  %v672_v22 = vadd.f32 %v671_v15, %v452_v10 }
 0x3c2   :  { %v632_v16 = vpop.f32.mrf.mxu1  ;;  %v5959_v17 = vpop.f32.mrf.mxu0 }
 0x3c3   :  { %v633_v19 = vadd.f32 %v632_v16, %v444_v4  ;;  %v683_v20 = vadd.f32 %v5959_v17, %v452_v10 }
 0x3c4   :  { %v634_v23 = vpop.f32.mrf.mxu1  ;;  %v674_v24 = vpop.f32.mrf.mxu0 }
 0x3c5   :  { %v7126_v26 = vpack.c.bf16 %v633_v19, %v629_v18  ;;  %v7128_v27 = vpack.c.bf16 %v683_v20, %v680_v13  ;;  %v635_v28 = vadd.f32 %v634_v23, %v448_v60  ;;  %v675_v29 = vadd.f32 %v674_v24, %v452_v10 }
 0x3c7   :  { %v7130_v31 = vpack.c.bf16 %v635_v28, %v631_v21  ;;  %v7132_v32 = vpack.c.bf16 %v675_v29, %v672_v22 }
 0x3c9   :  { %5967 = vmatpush3.bf16.msra.mxu1 %v7132_v32  ;;  %v1213_v14 = vsel %vm692_vm1, %v7130_v31, 0 }
 0x3ca   :  { %5972 = vmatprep.subr.bf16.mxu1 %v6869_v37 }
 0x3fd   :  { %v733_v38 = vpop.f32.mrf.mxu1 }
 0x3fe   :  { %v734_v39 = vadd.f32 %v733_v38, %v7136_v36 }
 0x3ff   :  { %v5964_v40 = vpop.f32.mrf.mxu1 }
 0x400   :  { %v741_v41 = vsel %vm740_vm3, %v734_v39, -inf }
 0x401   :  { %742 = vmax.xlane.f32.xlu0 %v741_v41  ;;  %v736_v42 = vpop.f32.mrf.mxu1 }
 0x402   :  { %v737_v43 = vadd.f32 %v736_v42, %v7136_v36 }
 0x403   :  { %v5965_v44 = vpop.f32.mrf.mxu1 }
 0x404   :  { %v744_v45 = vsel %vm740_vm3, %v737_v43, -inf }
 0x405   :  { %745 = vmax.xlane.f32.xlu1 %v744_v45 }
 0x48a   :  { %v743_v46 = vpop.xlane.xlu0 %742 }
 0x48b   :  { %v747_v47 = vsub.f32 %v734_v39, %v743_v46 }
 0x48d   :  { %v749_v48 = vmul.f32 1.442695, %v747_v47 }
 0x48e   :  { %v746_v49 = vpop.xlane.xlu1 %745 }
 0x48f   :  { %6527 = vpow2.f32 %v749_v48  ;;  %v748_v50 = vsub.f32 %v737_v43, %v746_v49 }
 0x491   :  { %v751_v53 = vmul.f32 1.442695, %v748_v50 }
 0x493   :  { %6529 = vpow2.f32 %v751_v53 }
 0x49c   :  { %v6528_v54 = vpop.eup %6527 }
 0x49d   :  { %v753_v55 = vsel %vm740_vm3, %v6528_v54, 0.0 }
 0x49e   :  { %754 = vadd.xlane.f32.xlu0 %v753_v55 }
 0x4a0   :  { %v6530_v57 = vpop.eup %6529 }
 0x4a1   :  { %v756_v58 = vsel %vm740_vm3, %v6530_v57, 0.0 }
 0x4a2   :  { %757 = vadd.xlane.f32.xlu1 %v756_v58 }
 0x4b3   :  { %811 = vrot.lane.b32.xlu1 %v7116_v8, %s6872_s3 }
 0x4b4   :  { %814 = vrot.lane.b32.xlu0 %v7110_v3, %s6872_s3 }
 0x4b7   :  { %947 = vrot.lane.b32.xlu1 %v7110_v3, %s6862_s27 }
 0x4b8   :  { %1079 = vrot.lane.b32.xlu0 %v7110_v3, %s6873_s0 }
 0x4bb   :  { %945 = vrot.lane.b32.xlu1 %v7116_v8, %s6862_s27 }
 0x4bc   :  { %1329 = vrot.lane.b32.xlu0 %v7130_v31, %s6872_s3 }
 0x4bf   :  { %1077 = vrot.lane.b32.xlu1 %v7116_v8, %s6873_s0 }
 0x4c0   :  { %1461 = vrot.lane.b32.xlu0 %v7130_v31, %s6862_s27 }
 0x4c3   :  { %1326 = vrot.lane.b32.xlu1 %v7126_v26, %s6872_s3 }
 0x4c4   :  { %1592 = vrot.lane.b32.xlu0 %v7130_v31, %s6873_s0 }
 0x4c7   :  { %1459 = vrot.lane.b32.xlu1 %v7126_v26, %s6862_s27 }
 0x4cb   :  { %1590 = vrot.lane.b32.xlu1 %v7126_v26, %s6873_s0 }
 0x527   :  { %v755_v59 = vpop.xlane.xlu0 %754 }
 0x528   :  { %6531 = vrcp.f32 %v755_v59 }
 0x52b   :  { %v758_v60 = vpop.xlane.xlu1 %757  ;;  %v815_v3 = vpop.permute.xlu0 %814 }
 0x52c   :  { %6533 = vrcp.f32 %v758_v60  ;;  %v820_v6 = vsel %vm692_vm1, %v815_v3, 0 }
 0x52f   :  { %v812_v5 = vpop.permute.xlu1 %811  ;;  %v1080_v10 = vpop.permute.xlu0 %1079 }
 0x530   :  { %v1085_v12 = vsel %vm692_vm1, %v1080_v10, 0 }
 0x533   :  { %v948_v7 = vpop.permute.xlu1 %947  ;;  %v1330_v15 = vpop.permute.xlu0 %1329 }
 0x534   :  { %v953_v8 = vsel %vm692_vm1, %v948_v7, 0  ;;  %v1335_v16 = vsel %vm692_vm1, %v1330_v15, 0 }
 0x535   :  { %v6532_v61 = vpop.eup %6531 }
 0x536   :  { %v761_v0 = vmul.f32 %v6532_v61, %v6528_v54 }
 0x537   :  { %v946_v11 = vpop.permute.xlu1 %945  ;;  %v1462_v17 = vpop.permute.xlu0 %1461 }
 0x538   :  { %v1467_v19 = vsel %vm692_vm1, %v1462_v17, 0 }
 0x539   :  { %v6534_v62 = vpop.eup %6533 }
 0x53a   :  { %v762_v2 = vmul.f32 %v6534_v62, %v6530_v57 }
 0x53b   :  { %v1078_v13 = vpop.permute.xlu1 %1077  ;;  %v1593_v20 = vpop.permute.xlu0 %1592 }
 0x53c   :  { %v763_v4 = vpack.c.bf16 %v762_v2, %v761_v0  ;;  %v1598_v22 = vsel %vm692_vm1, %v1593_v20, 0 }
 0x53e   :  { %5969 = vmatmul.mubr.msk.bf16.vlgmr.msra.gmra.mxu1 %vm740_vm3, %v763_v4 }
 0x53f   :  { %5973 = vmatpush3.bf16.xpose.msra.mxu1 %v820_v6  ;;  %5974 = vmatprep.mubr.msk.bf16.mxu1 %vm6870_vm0, %v6869_v37  ;;  %v1327_v18 = vpop.permute.xlu1 %1326 }
 0x540   :  { %5984 = vmatprep.subr.bf16.mxu1 %v6869_v37 }
 0x543   :  { %v1460_v21 = vpop.permute.xlu1 %1459 }
 0x546   :  { %5975 = vmatmul.mubr.msk.bf16.vlgmr.msra.gmra.mxu1 %vm692_vm1, %v812_v5 }
 0x547   :  { %5985 = vmatpush3.bf16.xpose.msra.mxu1 %v953_v8  ;;  %5986 = vmatprep.mubr.msk.bf16.mxu1 %vm6870_vm0, %v6869_v37  ;;  %v1591_v23 = vpop.permute.xlu1 %1590 }
 0x548   :  { %5996 = vmatprep.subr.bf16.mxu1 %v6869_v37 }
 0x54e   :  { %5987 = vmatmul.mubr.msk.bf16.vlgmr.msra.gmra.mxu1 %vm692_vm1, %v946_v11 }
 0x54f   :  { %5997 = vmatpush3.bf16.xpose.msra.mxu1 %v1085_v12  ;;  %5998 = vmatprep.mubr.msk.bf16.mxu1 %vm6870_vm0, %v6869_v37 }
 0x550   :  { %6008 = vmatprep.subr.bf16.mxu1 %v6869_v37 }
 0x556   :  { %5999 = vmatmul.mubr.msk.bf16.vlgmr.msra.gmra.mxu1 %vm692_vm1, %v1078_v13 }
 0x557   :  { %6009 = vmatpush3.bf16.xpose.msra.mxu1 %v1213_v14  ;;  %6010 = vmatprep.mubr.msk.bf16.mxu1 %vm6870_vm0, %v6869_v37 }
 0x558   :  { %6020 = vmatprep.subr.bf16.mxu1 %v6869_v37 }
 0x55e   :  { %6011 = vmatmul.mubr.msk.bf16.vlgmr.msra.gmra.mxu1 %vm692_vm1, %v7126_v26 }
 0x55f   :  { %6021 = vmatpush3.bf16.xpose.msra.mxu1 %v1335_v16  ;;  %6022 = vmatprep.mubr.msk.bf16.mxu1 %vm6870_vm0, %v6869_v37 }
 0x560   :  { %6032 = vmatprep.subr.bf16.mxu1 %v6869_v37 }
 0x566   :  { %6023 = vmatmul.mubr.msk.bf16.vlgmr.msra.gmra.mxu1 %vm692_vm1, %v1327_v18 }
 0x567   :  { %6033 = vmatpush3.bf16.xpose.msra.mxu1 %v1467_v19  ;;  %6034 = vmatprep.mubr.msk.bf16.mxu1 %vm6870_vm0, %v6869_v37 }
 0x568   :  { %6044 = vmatprep.subr.bf16.mxu1 %v6869_v37 }
 0x56e   :  { %6035 = vmatmul.mubr.msk.bf16.vlgmr.msra.gmra.mxu1 %vm692_vm1, %v1460_v21 }
 0x56f   :  { %6045 = vmatpush3.bf16.xpose.msra.mxu1 %v1598_v22  ;;  %6046 = vmatprep.mubr.msk.bf16.mxu1 %vm6870_vm0, %v6869_v37 }
 0x576   :  { %6047 = vmatmul.mubr.msk.bf16.vlgmr.msra.gmra.mxu1 %vm692_vm1, %v1591_v23 }
 0x5fe   :  { %v801_v24 = vpop.f32.mrf.mxu1 }
 0x5ff   :  { %808 = vst.msk [vmem:[#allocation2] sm:$0xff] %vm692_vm1, %v801_v24 }
 0x600   :  { %v5970_v26 = vpop.f32.mrf.mxu1 }
 0x602   :  { %v804_v28 = vpop.f32.mrf.mxu1 }
 0x603   :  { %809 = vst.msk [vmem:[#allocation2 + $0x8] sm:$0xff] %vm692_vm1, %v804_v28 }
 0x604   :  { %v5971_v29 = vpop.f32.mrf.mxu1 }
 0x606   :  { %v856_v31 = vpop.f32.mrf.mxu1 }
 0x607   :  { %v7208_v33 = vadd.f32 %v856_v31, %v7136_v36 }
 0x608   :  { %v5976_v35 = vpop.f32.mrf.mxu1 }
 0x609   :  { %v863_v38 = vsel %vm740_vm3, %v7208_v33, -inf }
 0x60a   :  { %v859_v39 = vpop.f32.mrf.mxu1  ;;  %864 = vmax.xlane.f32.xlu0 %v863_v38 }
 0x60b   :  { %v7213_v40 = vadd.f32 %v859_v39, %v7136_v36 }
 0x60c   :  { %v5977_v41 = vpop.f32.mrf.mxu1 }
 0x60d   :  { %v866_v42 = vsel %vm740_vm3, %v7213_v40, -inf }
 0x60e   :  { %v989_v43 = vpop.f32.mrf.mxu1  ;;  %867 = vmax.xlane.f32.xlu1 %v866_v42 }
 0x60f   :  { %v7218_v44 = vadd.f32 %v989_v43, %v7136_v36 }
 0x610   :  { %v5988_v45 = vpop.f32.mrf.mxu1 }
 0x611   :  { %v996_v46 = vsel %vm740_vm3, %v7218_v44, -inf }
 0x612   :  { %v992_v47 = vpop.f32.mrf.mxu1  ;;  %997 = vmax.xlane.f32.xlu0 %v996_v46 }
 0x613   :  { %v7223_v48 = vadd.f32 %v992_v47, %v7136_v36 }
 0x614   :  { %v5989_v49 = vpop.f32.mrf.mxu1 }
 0x615   :  { %v999_v50 = vsel %vm740_vm3, %v7223_v48, -inf }
 0x616   :  { %v1121_v53 = vpop.f32.mrf.mxu1  ;;  %1000 = vmax.xlane.f32.xlu0 %v999_v50 }
 0x617   :  { %v7228_v54 = vadd.f32 %v1121_v53, %v7136_v36 }
 0x618   :  { %v6000_v55 = vpop.f32.mrf.mxu1 }
 0x619   :  { %v1128_v57 = vsel %vm740_vm3, %v7228_v54, -inf }
 0x61a   :  { %v1124_v58 = vpop.f32.mrf.mxu1  ;;  %1129 = vmax.xlane.f32.xlu0 %v1128_v57 }
 0x61b   :  { %v7233_v59 = vadd.f32 %v1124_v58, %v7136_v36 }
 0x61c   :  { %v6001_v60 = vpop.f32.mrf.mxu1 }
 0x61d   :  { %v1131_v61 = vsel %vm740_vm3, %v7233_v59, -inf }
 0x61e   :  { %1132 = vmax.xlane.f32.xlu1 %v1131_v61  ;;  %v1249_v62 = vpop.f32.mrf.mxu1 }
 0x61f   :  { %v7238_v0 = vadd.f32 %v1249_v62, %v7136_v36 }
 0x620   :  { %v6012_v2 = vpop.f32.mrf.mxu1 }
 0x621   :  { %v1256_v3 = vsel %vm740_vm3, %v7238_v0, -inf }
 0x622   :  { %1257 = vmax.xlane.f32.xlu0 %v1256_v3  ;;  %v1252_v4 = vpop.f32.mrf.mxu1 }
 0x623   :  { %v7243_v5 = vadd.f32 %v1252_v4, %v7136_v36 }
 0x624   :  { %v6013_v6 = vpop.f32.mrf.mxu1 }
 0x625   :  { %v1259_v7 = vsel %vm740_vm3, %v7243_v5, -inf }
 0x626   :  { %1260 = vmax.xlane.f32.xlu1 %v1259_v7  ;;  %v1371_v8 = vpop.f32.mrf.mxu1 }
 0x627   :  { %v7248_v10 = vadd.f32 %v1371_v8, %v7136_v36 }
 0x628   :  { %v6024_v11 = vpop.f32.mrf.mxu1 }
 0x629   :  { %v1378_v12 = vsel %vm740_vm3, %v7248_v10, -inf }
 0x62a   :  { %1379 = vmax.xlane.f32.xlu0 %v1378_v12  ;;  %v1374_v13 = vpop.f32.mrf.mxu1 }
 0x62b   :  { %v7253_v14 = vadd.f32 %v1374_v13, %v7136_v36 }
 0x62c   :  { %v6025_v15 = vpop.f32.mrf.mxu1 }
 0x62d   :  { %v1381_v16 = vsel %vm740_vm3, %v7253_v14, -inf }
 0x62e   :  { %1382 = vmax.xlane.f32.xlu1 %v1381_v16  ;;  %v1503_v17 = vpop.f32.mrf.mxu1 }
 0x62f   :  { %v7258_v18 = vadd.f32 %v1503_v17, %v7136_v36 }
 0x630   :  { %v6036_v19 = vpop.f32.mrf.mxu1 }
 0x631   :  { %v1510_v20 = vsel %vm740_vm3, %v7258_v18, -inf }
 0x632   :  { %1511 = vmax.xlane.f32.xlu0 %v1510_v20  ;;  %v1506_v21 = vpop.f32.mrf.mxu1 }
 0x633   :  { %v7263_v22 = vadd.f32 %v1506_v21, %v7136_v36 }
 0x634   :  { %v6037_v23 = vpop.f32.mrf.mxu1 }
 0x635   :  { %v1513_v24 = vsel %vm740_vm3, %v7263_v22, -inf }
 0x636   :  { %1514 = vmax.xlane.f32.xlu1 %v1513_v24  ;;  %v1634_v26 = vpop.f32.mrf.mxu1 }
 0x637   :  { %v7268_v28 = vadd.f32 %v1634_v26, %v7136_v36 }
 0x638   :  { %v6048_v29 = vpop.f32.mrf.mxu1 }
 0x639   :  { %v1641_v31 = vsel %vm740_vm3, %v7268_v28, -inf }
 0x63a   :  { %1642 = vmax.xlane.f32.xlu0 %v1641_v31  ;;  %v1637_v35 = vpop.f32.mrf.mxu1 }
 0x63b   :  { %v7273_v38 = vadd.f32 %v1637_v35, %v7136_v36 }
 0x63c   :  { %v6049_v39 = vpop.f32.mrf.mxu1 }
 0x63d   :  { %v1644_v41 = vsel %vm740_vm3, %v7273_v38, -inf }
 0x63e   :  { %1645 = vmax.xlane.f32.xlu1 %v1644_v41 }
 0x64f   :  { %1019 = vrot.lane.b32.xlu1 %v7132_v32, %s6862_s27 }
 0x650   :  { %887 = vrot.lane.b32.xlu0 %v7132_v32, %s6872_s3 }
 0x693   :  { %v865_v42 = vpop.xlane.xlu0 %864 }
 0x694   :  { %v869_v43 = vsub.f32 %v7208_v33, %v865_v42 }
 0x696   :  { %v871_v45 = vmul.f32 1.442695, %v869_v43 }
 0x697   :  { %v868_v46 = vpop.xlane.xlu1 %867 }
 0x698   :  { %6535 = vpow2.f32 %v871_v45  ;;  %v870_v47 = vsub.f32 %v7213_v40, %v868_v46 }
 0x69a   :  { %v873_v49 = vmul.f32 1.442695, %v870_v47 }
 0x69b   :  { %v998_v50 = vpop.xlane.xlu0 %997 }
 0x69c   :  { %6537 = vpow2.f32 %v873_v49  ;;  %v1002_v53 = vsub.f32 %v7218_v44, %v998_v50 }
 0x69e   :  { %v1004_v55 = vmul.f32 1.442695, %v1002_v53 }
 0x69f   :  { %v1001_v57 = vpop.xlane.xlu0 %1000 }
 0x6a0   :  { %6539 = vpow2.f32 %v1004_v55  ;;  %v1003_v58 = vsub.f32 %v7223_v48, %v1001_v57 }
 0x6a2   :  { %v1006_v60 = vmul.f32 1.442695, %v1003_v58 }
 0x6a3   :  { %v1130_v61 = vpop.xlane.xlu0 %1129 }
 0x6a4   :  { %6541 = vpow2.f32 %v1006_v60  ;;  %v1134_v33 = vsub.f32 %v7228_v54, %v1130_v61 }
 0x6a5   :  { %v7286_v62 = vpop.eup %6535 }
 0x6a6   :  { %v1136_v2 = vmul.f32 1.442695, %v1134_v33  ;;  %v875_v40 = vsel %vm740_vm3, %v7286_v62, 0.0 }
 0x6a7   :  { %v1133_v3 = vpop.xlane.xlu1 %1132  ;;  %876 = vadd.xlane.f32.xlu0 %v875_v40 }
 0x6a8   :  { %6543 = vpow2.f32 %v1136_v2  ;;  %v1135_v44 = vsub.f32 %v7233_v59, %v1133_v3 }
 0x6a9   :  { %v7291_v4 = vpop.eup %6537 }
 0x6aa   :  { %v1138_v6 = vmul.f32 1.442695, %v1135_v44  ;;  %v878_v48 = vsel %vm740_vm3, %v7291_v4, 0.0 }
 0x6ab   :  { %v1258_v7 = vpop.xlane.xlu0 %1257  ;;  %879 = vadd.xlane.f32.xlu1 %v878_v48 }
 0x6ac   :  { %6545 = vpow2.f32 %v1138_v6  ;;  %v1262_v54 = vsub.f32 %v7238_v0, %v1258_v7 }
 0x6ad   :  { %v7296_v8 = vpop.eup %6539 }
 0x6ae   :  { %v1264_v11 = vmul.f32 1.442695, %v1262_v54  ;;  %v1008_v12 = vsel %vm740_vm3, %v7296_v8, 0.0 }
 0x6af   :  { %v1261_v13 = vpop.xlane.xlu1 %1260  ;;  %1009 = vadd.xlane.f32.xlu0 %v1008_v12 }
 0x6b0   :  { %6547 = vpow2.f32 %v1264_v11  ;;  %v1263_v59 = vsub.f32 %v7243_v5, %v1261_v13 }
 0x6b1   :  { %v7301_v15 = vpop.eup %6541 }
 0x6b2   :  { %v1266_v16 = vmul.f32 1.442695, %v1263_v59  ;;  %v1011_v17 = vsel %vm740_vm3, %v7301_v15, 0.0 }
 0x6b3   :  { %v1380_v19 = vpop.xlane.xlu0 %1379  ;;  %1012 = vadd.xlane.f32.xlu1 %v1011_v17 }
 0x6b4   :  { %6549 = vpow2.f32 %v1266_v16  ;;  %v1384_v0 = vsub.f32 %v7248_v10, %v1380_v19 }
 0x6b5   :  { %v7306_v20 = vpop.eup %6543 }
 0x6b6   :  { %v1386_v21 = vmul.f32 1.442695, %v1384_v0  ;;  %v1140_v23 = vsel %vm740_vm3, %v7306_v20, 0.0 }
 0x6b7   :  { %v1383_v24 = vpop.xlane.xlu1 %1382  ;;  %1141 = vadd.xlane.f32.xlu0 %v1140_v23 }
 0x6b8   :  { %6551 = vpow2.f32 %v1386_v21  ;;  %v1385_v5 = vsub.f32 %v7253_v14, %v1383_v24 }
 0x6b9   :  { %v7311_v26 = vpop.eup %6545 }
 0x6ba   :  { %v1388_v29 = vmul.f32 1.442695, %v1385_v5  ;;  %v1143_v31 = vsel %vm740_vm3, %v7311_v26, 0.0 }
 0x6bb   :  { %1144 = vadd.xlane.f32.xlu1 %v1143_v31  ;;  %v1512_v39 = vpop.xlane.xlu0 %1511 }
 0x6bc   :  { %6553 = vpow2.f32 %v1388_v29  ;;  %v1516_v44 = vsub.f32 %v7258_v18, %v1512_v39 }
 0x6bd   :  { %v7315_v10 = vpop.eup %6547 }
 0x6be   :  { %v1268_v35 = vsel %vm740_vm3, %v7315_v10, 0.0  ;;  %v1518_v6 = vmul.f32 1.442695, %v1516_v44 }
 0x6bf   :  { %v1515_v41 = vpop.xlane.xlu1 %1514  ;;  %1269 = vadd.xlane.f32.xlu0 %v1268_v35 }
 0x6c0   :  { %v1517_v42 = vsub.f32 %v7263_v22, %v1515_v41 }
 0x6c1   :  { %v7320_v43 = vpop.eup %6549 }
 0x6c2   :  { %v1520_v14 = vmul.f32 1.442695, %v1517_v42  ;;  %v1271_v45 = vsel %vm740_vm3, %v7320_v43, 0.0 }
 0x6c3   :  { %v1643_v46 = vpop.xlane.xlu0 %1642  ;;  %1272 = vadd.xlane.f32.xlu1 %v1271_v45 }
 0x6c4   :  { %6555 = vpow2.f32 %v1520_v14  ;;  %v1647_v47 = vsub.f32 %v7268_v28, %v1643_v46 }
 0x6c5   :  { %v7325_v49 = vpop.eup %6551 }
 0x6c6   :  { %v1649_v50 = vmul.f32 1.442695, %v1647_v47  ;;  %v1390_v53 = vsel %vm740_vm3, %v7325_v49, 0.0 }
 0x6c7   :  { %v888_v55 = vpop.permute.xlu0 %887  ;;  %1391 = vadd.xlane.f32.xlu1 %v1390_v53  ;;  %v1646_v22 = vpop.xlane.xlu1 %1645 }
 0x6c8   :  { %6557 = vpow2.f32 %v1649_v50  ;;  %v1648_v57 = vsub.f32 %v7273_v38, %v1646_v22  ;;  %5979 = vmatpush3.bf16.msra.mxu0 %v888_v55 }
 0x6c9   :  { %v7330_v58 = vpop.eup %6553  ;;  %5990 = vmatprep.subr.bf16.mxu0 %v6869_v37 }
 0x6ca   :  { %v1651_v60 = vmul.f32 1.442695, %v1648_v57  ;;  %v1393_v28 = vsel %vm740_vm3, %v7330_v58, 0.0 }
 0x6cb   :  { %1394 = vadd.xlane.f32.xlu1 %v1393_v28  ;;  %v1020_v7 = vpop.permute.xlu1 %1019 }
 0x6cc   :  { %6559 = vpow2.f32 %v1651_v60 }
 0x6cd   :  { %6561 = vpow2.f32 %v1518_v6 }
 0x6d1   :  { %v7335_v61 = vpop.eup %6555 }
 0x6d2   :  { %v1525_v33 = vsel %vm740_vm3, %v7335_v61, 0.0 }
 0x6d3   :  { %1526 = vadd.xlane.f32.xlu1 %v1525_v33 }
 0x6d5   :  { %v7339_v2 = vpop.eup %6557  ;;  %1151 = vrot.lane.b32.xlu0 %v7132_v32, %s6873_s0 }
 0x6d6   :  { %v1653_v38 = vsel %vm740_vm3, %v7339_v2, 0.0 }
 0x6d7   :  { %1654 = vadd.xlane.f32.xlu1 %v1653_v38 }
 0x6d9   :  { %v7345_v40 = vpop.eup %6559 }
 0x6da   :  { %v1656_v3 = vsel %vm740_vm3, %v7345_v40, 0.0  ;;  %v7352_v48 = vpop.eup %6561 }
 0x6db   :  { %1657 = vadd.xlane.f32.xlu1 %v1656_v3  ;;  %v1522_v32 = vsel %vm740_vm3, %v7352_v48, 0.0 }
 0x6ec   :  { %1402 = vrot.lane.b32.xlu1 %v7128_v27, %s6872_s3 }
 0x6f4   :  { %1523 = vadd.xlane.f32.xlu0 %v1522_v32 }
 0x70a   :  { %1533 = vrot.lane.b32.xlu0 %v7128_v27, %s6862_s27 }
 0x70e   :  { %1664 = vrot.lane.b32.xlu0 %v7128_v27, %s6873_s0 }
 0x730   :  { %v877_v18 = vpop.xlane.xlu0 %876 }
 0x731   :  { %6563 = vrcp.f32 %v877_v18 }
 0x734   :  { %v880_v54 = vpop.xlane.xlu1 %879 }
 0x735   :  { %6565 = vrcp.f32 %v880_v54 }
 0x738   :  { %v1010_v11 = vpop.xlane.xlu0 %1009 }
 0x739   :  { %6567 = vrcp.f32 %v1010_v11 }
 0x73c   :  { %v1013_v12 = vpop.xlane.xlu1 %1012 }
 0x73d   :  { %6569 = vrcp.f32 %v1013_v12 }
 0x73e   :  { %v6564_v13 = vpop.eup %6563 }
 0x73f   :  { %v883_v17 = vmul.f32 %v6564_v13, %v7286_v62 }
 0x740   :  { %v1142_v59 = vpop.xlane.xlu0 %1141 }
 0x741   :  { %6571 = vrcp.f32 %v1142_v59 }
 0x742   :  { %v6566_v16 = vpop.eup %6565 }
 0x743   :  { %v884_v19 = vmul.f32 %v6566_v16, %v7291_v4 }
 0x744   :  { %v1145_v0 = vpop.xlane.xlu1 %1144 }
 0x745   :  { %6573 = vrcp.f32 %v1145_v0  ;;  %v885_v21 = vpack.c.bf16 %v884_v19, %v883_v17 }
 0x746   :  { %v6568_v23 = vpop.eup %6567 }
 0x747   :  { %5981 = vmatmul.mubr.msk.bf16.vlgmr.msra.gmra.mxu0 %vm740_vm3, %v885_v21  ;;  %v1016_v29 = vmul.f32 %v6568_v23, %v7296_v8 }
 0x748   :  { %5991 = vmatpush3.bf16.msra.mxu0 %v1020_v7  ;;  %v1270_v24 = vpop.xlane.xlu0 %1269  ;;  %5992 = vmatprep.mubr.msk.bf16.mxu0 %vm6870_vm0, %v6869_v37 }
 0x749   :  { %6002 = vmatprep.subr.bf16.mxu0 %v6869_v37  ;;  %6575 = vrcp.f32 %v1270_v24 }
 0x74a   :  { %v6570_v5 = vpop.eup %6569 }
 0x74b   :  { %v1017_v62 = vmul.f32 %v6570_v5, %v7301_v15 }
 0x74c   :  { %v1273_v4 = vpop.xlane.xlu1 %1272  ;;  %v1152_v35 = vpop.permute.xlu0 %1151 }
 0x74d   :  { %6577 = vrcp.f32 %v1273_v4  ;;  %v1018_v31 = vpack.c.bf16 %v1017_v62, %v1016_v29  ;;  %v6303_v62 = vld [vmem:[#allocation7 + $0x38] sm:$0xff]   ;;  %v6304_v4 = vld [vmem:[#allocation7 + $0x30] sm:$0xff]  }
 0x74e   :  { %v6572_v39 = vpop.eup %6571  ;;  %6056 = vmatprep.subr.bf16.mxu1 %v6303_v62 }
 0x74f   :  { %5993 = vmatmul.mubr.msk.bf16.vlgmr.msra.gmra.mxu0 %vm740_vm3, %v1018_v31  ;;  %v1148_v14 = vmul.f32 %v6572_v39, %v7306_v20  ;;  %6057 = vmatpush3.bf16.msra.mxu1 %v6303_v62 }
 0x750   :  { %6003 = vmatpush3.bf16.msra.mxu0 %v1152_v35  ;;  %v1392_v41 = vpop.xlane.xlu1 %1391  ;;  %6004 = vmatprep.mubr.msk.bf16.mxu0 %vm6870_vm0, %v6869_v37  ;;  %v6305_v35 = vld [vmem:[#allocation7 + $0x28] sm:$0xff]  }
 0x751   :  { %6014 = vmatprep.subr.bf16.mxu0 %v6869_v37  ;;  %6058 = vmatprep.subr.bf16.mxu1 %v6304_v4 }
 0x752   :  { %v6574_v42 = vpop.eup %6573 }
 0x753   :  { %v1149_v8 = vmul.f32 %v6574_v42, %v7311_v26  ;;  %6059 = vmatpush3.bf16.msra.mxu1 %v6304_v4 }
 0x754   :  { %v1395_v15 = vpop.xlane.xlu1 %1394  ;;  %6060 = vmatprep.subr.bf16.mxu1 %v6305_v35 }
 0x755   :  { %v1150_v45 = vpack.c.bf16 %v1149_v8, %v1148_v14  ;;  %6579 = vrcp.f32 %v1395_v15  ;;  %v6306_v8 = vld [vmem:[#allocation7 + $0x20] sm:$0xff]   ;;  %v6307_v15 = vld [vmem:[#allocation7 + $0x18] sm:$0xff]  }
 0x756   :  { %v6576_v46 = vpop.eup %6575  ;;  %6581 = vrcp.f32 %v1392_v41 }
 0x757   :  { %6005 = vmatmul.mubr.msk.bf16.vlgmr.msra.gmra.mxu0 %vm740_vm3, %v1150_v45  ;;  %v1276_v50 = vmul.f32 %v6576_v46, %v7315_v10  ;;  %6061 = vmatpush3.bf16.msra.mxu1 %v6305_v35  ;;  %v6308_v45 = vld [vmem:[#allocation7 + $0x10] sm:$0xff]  }
 0x758   :  { %6015 = vmatpush3.bf16.msra.mxu0 %v7128_v27  ;;  %6016 = vmatprep.mubr.msk.bf16.mxu0 %vm6870_vm0, %v6869_v37 }
 0x759   :  { %6026 = vmatprep.subr.bf16.mxu0 %v6869_v37  ;;  %6062 = vmatprep.subr.bf16.mxu1 %v6306_v8 }
 0x75a   :  { %v6578_v47 = vpop.eup %6577 }
 0x75b   :  { %v1277_v20 = vmul.f32 %v6578_v47, %v7320_v43  ;;  %6063 = vmatpush3.bf16.msra.mxu1 %v6306_v8  ;;  %v6309_v47 = vld [vmem:[#allocation7 + $0x8] sm:$0xff]  }
 0x75c   :  { %v1527_v26 = vpop.xlane.xlu1 %1526  ;;  %6064 = vmatprep.subr.bf16.mxu1 %v6307_v15 }
 0x75d   :  { %v1278_v53 = vpack.c.bf16 %v1277_v20, %v1276_v50  ;;  %6583 = vrcp.f32 %v1527_v26  ;;  %v6310_v50 = vld [vmem:[#allocation7] sm:$0xff]  }
 0x75f   :  { %6017 = vmatmul.mubr.msk.bf16.vlgmr.msra.gmra.mxu0 %vm740_vm3, %v1278_v53  ;;  %6065 = vmatpush3.bf16.msra.mxu1 %v6307_v15 }
 0x760   :  { %v1655_v55 = vpop.xlane.xlu1 %1654  ;;  %6028 = vmatprep.mubr.msk.bf16.mxu0 %vm6870_vm0, %v6869_v37  ;;  %6066 = vmatprep.subr.bf16.mxu1 %v6308_v45 }
 0x762   :  { %v6580_v22 = vpop.eup %6579 }
 0x763   :  { %v6582_v57 = vpop.eup %6581  ;;  %v1399_v60 = vmul.f32 %v6580_v22, %v7330_v58  ;;  %6067 = vmatpush3.bf16.msra.mxu1 %v6308_v45 }
 0x764   :  { %v1658_v27 = vpop.xlane.xlu1 %1657  ;;  %v1398_v33 = vmul.f32 %v6582_v57, %v7325_v49  ;;  %6068 = vmatprep.subr.bf16.mxu1 %v6309_v47 }
 0x766   :  { %v1400_v10 = vpack.c.bf16 %v1399_v60, %v1398_v33 }
 0x767   :  { %6069 = vmatpush3.bf16.msra.mxu1 %v6309_v47  ;;  %v6319_v47 = vld [vmem:[%s8433_s11 + $0xc4] ss:$16 sps:$4 sm:$0xff]  }
 0x768   :  { %v1403_v28 = vpop.permute.xlu1 %1402  ;;  %6070 = vmatprep.subr.bf16.mxu1 %v6310_v50 }
 0x769   :  { %6027 = vmatpush3.bf16.msra.mxu0 %v1403_v28 }
 0x76a   :  { %6038 = vmatprep.subr.bf16.mxu0 %v6869_v37  ;;  %v6584_v58 = vpop.eup %6583 }
 0x76b   :  { %v1531_v44 = vmul.f32 %v6584_v58, %v7335_v61  ;;  %6071 = vmatpush3.bf16.msra.mxu1 %v6310_v50  ;;  %v6322_v50 = vld [vmem:[%s8433_s11 + $0xcc] ss:$16 sps:$4 sm:$0xff]  }
 0x76c   :  { %6029 = vmatmul.mubr.msk.bf16.vlgmr.msra.gmra.mxu0 %vm740_vm3, %v1400_v10 }
 0x76d   :  { %6040 = vmatprep.mubr.msk.bf16.mxu0 %vm6870_vm0, %v6869_v37 }
 0x77d   :  { %v1524_v43 = vpop.xlane.xlu0 %1523 }
 0x77e   :  { %6585 = vrcp.f32 %v1524_v43 }
 0x77f   :  { %6587 = vrcp.f32 %v1658_v27 }
 0x780   :  { %6589 = vrcp.f32 %v1655_v55 }
 0x781   :  { %v1534_v38 = vpop.permute.xlu0 %1533 }
 0x782   :  { %6039 = vmatpush3.bf16.msra.mxu0 %v1534_v38 }
 0x783   :  { %6050 = vmatprep.subr.bf16.mxu0 %v6869_v37 }
 0x785   :  { %v1665_v7 = vpop.permute.xlu0 %1664 }
 0x78b   :  { %v6586_v49 = vpop.eup %6585 }
 0x78c   :  { %v1530_v3 = vmul.f32 %v6586_v49, %v7352_v48  ;;  %v6588_v32 = vpop.eup %6587 }
 0x78d   :  { %v6590_v18 = vpop.eup %6589  ;;  %v1662_v54 = vmul.f32 %v6588_v32, %v7345_v40 }
 0x78e   :  { %v1532_v6 = vpack.c.bf16 %v1531_v44, %v1530_v3  ;;  %v1661_v11 = vmul.f32 %v6590_v18, %v7339_v2 }
 0x790   :  { %6041 = vmatmul.mubr.msk.bf16.vlgmr.msra.gmra.mxu0 %vm740_vm3, %v1532_v6  ;;  %v1663_v12 = vpack.c.bf16 %v1662_v54, %v1661_v11 }
 0x791   :  { %6051 = vmatpush3.bf16.msra.mxu0 %v1665_v7  ;;  %6052 = vmatprep.mubr.msk.bf16.mxu0 %vm6870_vm0, %v6869_v37 }
 0x798   :  { %6053 = vmatmul.mubr.msk.bf16.vlgmr.msra.gmra.mxu0 %vm740_vm3, %v1663_v12 }
 0x799   :  { %2165 = vmatprep.mubr.bf16.mxu0 %v6868_v1 }
 0x807   :  { %v927_v61 = vpop.f32.mrf.mxu0 }
 0x808   :  { %936 = vrot.lane.b32.xlu0 %v927_v61, %s6873_s0 }
 0x809   :  { %v5982_v48 = vpop.f32.mrf.mxu0 }
 0x80a   :  { %v5441_v48 = vld [vmem:[%s8430_s8] ss:$0 sm:$0xff] }
 0x80b   :  { %v930_v13 = vpop.f32.mrf.mxu0 }
 0x80c   :  { %938 = vrot.lane.b32.xlu1 %v930_v13, %s6873_s0 }
 0x80d   :  { %v5983_v59 = vpop.f32.mrf.mxu0 }
 0x80f   :  { %v1059_v16 = vpop.f32.mrf.mxu0 }
 0x810   :  { %1068 = vrot.lane.b32.xlu0 %v1059_v16, %s6862_s27 }
 0x811   :  { %v5994_v17 = vpop.f32.mrf.mxu0 }
 0x813   :  { %v1062_v40 = vpop.f32.mrf.mxu0 }
 0x814   :  { %1070 = vrot.lane.b32.xlu1 %v1062_v40, %s6862_s27 }
 0x815   :  { %v5995_v2 = vpop.f32.mrf.mxu0 }
 0x817   :  { %v1191_v19 = vpop.f32.mrf.mxu0 }
 0x818   :  { %1200 = vrot.lane.b32.xlu0 %v1191_v19, %s6872_s3 }
 0x819   :  { %v6006_v0 = vpop.f32.mrf.mxu0 }
 0x81b   :  { %v1194_v21 = vpop.f32.mrf.mxu0 }
 0x81c   :  { %1202 = vrot.lane.b32.xlu1 %v1194_v21, %s6872_s3 }
 0x81d   :  { %v6007_v23 = vpop.f32.mrf.mxu0 }
 0x81f   :  { %v1316_v24 = vpop.f32.mrf.mxu0 }
 0x820   :  { %1323 = vst.msk [vmem:[#allocation2 + $0x10] sm:$0xff] %vm692_vm1, %v1316_v24 }
 0x821   :  { %v6018_v5 = vpop.f32.mrf.mxu0 }
 0x822   :  { %v6313_v5 = vld [vmem:[%s8433_s11 + $0xe4] ss:$16 sps:$4 sm:$0xff]  }
 0x823   :  { %v1319_v29 = vpop.f32.mrf.mxu0  ;;  %2133 = vmatprep.subr.bf16.mxu0 %v6313_v5 }
 0x824   :  { %1324 = vst.msk [vmem:[#allocation2 + $0x18] sm:$0xff] %vm692_vm1, %v1319_v29  ;;  %v6316_v29 = vld [vmem:[%s8433_s11 + $0xec] ss:$16 sps:$4 sm:$0xff]  }
 0x825   :  { %v6019_v31 = vpop.f32.mrf.mxu0  ;;  %2186 = vmatprep.subr.bf16.mxu1 %v6316_v29  ;;  %v7566_v29 = vld [vmem:[%s8431_s9] ss:$0 sm:$0xff] }
 0x82c   :  { %v1442_v39 = vpop.f32.mrf.mxu0 }
 0x82d   :  { %1451 = vrot.lane.b32.xlu0 %v1442_v39, %s6873_s0 }
 0x82e   :  { %v6030_v41 = vpop.f32.mrf.mxu0 }
 0x830   :  { %v1445_v42 = vpop.f32.mrf.mxu0 }
 0x831   :  { %1453 = vrot.lane.b32.xlu1 %v1445_v42, %s6873_s0 }
 0x832   :  { %v6031_v14 = vpop.f32.mrf.mxu0 }
 0x850   :  { %v1573_v46 = vpop.f32.mrf.mxu0 }
 0x851   :  { %1582 = vrot.lane.b32.xlu0 %v1573_v46, %s6862_s27 }
 0x852   :  { %v6042_v20 = vpop.f32.mrf.mxu0 }
 0x853   :  { %v6317_v20 = vld [vmem:[%s8433_s11 + $0xc0] ss:$16 sps:$4 sm:$0xff]  }
 0x854   :  { %v1576_v26 = vpop.f32.mrf.mxu0 }
 0x855   :  { %1584 = vrot.lane.b32.xlu1 %v1576_v26, %s6862_s27  ;;  %v6325_v26 = vld [vmem:[%s8433_s11 + $0xa4] ss:$16 sps:$4 sm:$0xff]  }
 0x856   :  { %v6043_v53 = vpop.f32.mrf.mxu0 }
 0x857   :  { %v6328_v53 = vld [vmem:[%s8433_s11 + $0xac] ss:$16 sps:$4 sm:$0xff]  }
 0x858   :  { %v1704_v55 = vpop.f32.mrf.mxu0 }
 0x859   :  { %1713 = vrot.lane.b32.xlu0 %v1704_v55, %s6872_s3  ;;  %v6323_v55 = vld [vmem:[%s8433_s11 + $0xa0] ss:$16 sps:$4 sm:$0xff]  }
 0x85a   :  { %v6054_v22 = vpop.f32.mrf.mxu0 }
 0x85b   :  { %v6326_v22 = vld [vmem:[%s8433_s11 + $0xa8] ss:$16 sps:$4 sm:$0xff]  }
 0x85c   :  { %v1707_v27 = vpop.f32.mrf.mxu0 }
 0x85d   :  { %1715 = vrot.lane.b32.xlu1 %v1707_v27, %s6872_s3  ;;  %v6331_v27 = vld [vmem:[%s8433_s11 + $0x84] ss:$16 sps:$4 sm:$0xff]  }
 0x85e   :  { %v6055_v57 = vpop.f32.mrf.mxu0 }
 0x85f   :  { %v6334_v57 = vld [vmem:[%s8433_s11 + $0x8c] ss:$16 sps:$4 sm:$0xff]  }
 0x87a   :  { %v937_v60 = vpop.permute.xlu0 %936 }
 0x87b   :  { %943 = vst.msk [vmem:[#allocation2] sm:$0xff] %vm942_vm4, %v937_v60  ;;  %v6329_v60 = vld [vmem:[%s8433_s11 + $0x80] ss:$16 sps:$4 sm:$0xff]  }
 0x87e   :  { %v939_v28 = vpop.permute.xlu1 %938 }
 0x87f   :  { %944 = vst.msk [vmem:[#allocation2 + $0x8] sm:$0xff] %vm942_vm4, %v939_v28  ;;  %v6332_v28 = vld [vmem:[%s8433_s11 + $0x88] ss:$16 sps:$4 sm:$0xff]  }
 0x882   :  { %v1069_v33 = vpop.permute.xlu0 %1068 }
 0x883   :  { %1075 = vst.msk [vmem:[#allocation2] sm:$0xff] %vm1074_vm5, %v1069_v33  ;;  %v6335_v33 = vld [vmem:[%s8433_s11 + $0x60] ss:$16 sps:$4 sm:$0xff]  }
 0x886   :  { %v1071_v10 = vpop.permute.xlu1 %1070 }
 0x887   :  { %1076 = vst.msk [vmem:[#allocation2 + $0x8] sm:$0xff] %vm1074_vm5, %v1071_v10  ;;  %v6337_v10 = vld [vmem:[%s8433_s11 + $0x64] ss:$16 sps:$4 sm:$0xff]  }
 0x88a   :  { %v1201_v43 = vpop.permute.xlu0 %1200 }
 0x88b   :  { %1207 = vst.msk [vmem:[#allocation2] sm:$0xff] %vm1206_vm6, %v1201_v43  ;;  %v6338_v43 = vld [vmem:[%s8433_s11 + $0x68] ss:$16 sps:$4 sm:$0xff]  }
 0x88e   :  { %v1203_v38 = vpop.permute.xlu1 %1202 }
 0x88f   :  { %1208 = vst.msk [vmem:[#allocation2 + $0x8] sm:$0xff] %vm1206_vm6, %v1203_v38  ;;  %v6340_v38 = vld [vmem:[%s8433_s11 + $0x6c] ss:$16 sps:$4 sm:$0xff]  }
 0x892   :  { %v1721_v58 = vld [vmem:[#allocation2] sm:$0xff] }
 0x896   :  { %v1722_v49 = vld [vmem:[#allocation2 + $0x8] sm:$0xff] }
 0x897   :  { %v1725_v3 = vpack.c.bf16 %v1722_v49, %v1721_v58  ;;  %v6343_v58 = vld [vmem:[%s8433_s11 + $0x44] ss:$16 sps:$4 sm:$0xff]   ;;  %v6346_v49 = vld [vmem:[%s8433_s11 + $0x4c] ss:$16 sps:$4 sm:$0xff]  }
 0x899   :  { %6072 = vmatprep.mubr.bf16.mxu1 %v1725_v3  ;;  %v6341_v3 = vld [vmem:[%s8433_s11 + $0x40] ss:$16 sps:$4 sm:$0xff]  }
 0x89f   :  { %v1452_v44 = vpop.permute.xlu0 %1451 }
 0x8a0   :  { %1457 = vst.msk [vmem:[#allocation2 + $0x10] sm:$0xff] %vm942_vm4, %v1452_v44  ;;  %v6344_v44 = vld [vmem:[%s8433_s11 + $0x48] ss:$16 sps:$4 sm:$0xff]  }
 0x8a3   :  { %v1454_v6 = vpop.permute.xlu1 %1453 }
 0x8a4   :  { %1458 = vst.msk [vmem:[#allocation2 + $0x18] sm:$0xff] %vm942_vm4, %v1454_v6  ;;  %v6349_v6 = vld [vmem:[%s8433_s11 + $0x24] ss:$16 sps:$4 sm:$0xff]  }
 0x8c3   :  { %v1583_v32 = vpop.permute.xlu0 %1582 }
 0x8c4   :  { %1588 = vst.msk [vmem:[#allocation2 + $0x10] sm:$0xff] %vm1074_vm5, %v1583_v32  ;;  %v6352_v32 = vld [vmem:[%s8433_s11 + $0x2c] ss:$16 sps:$4 sm:$0xff]  }
 0x8c7   :  { %v1585_v7 = vpop.permute.xlu1 %1584 }
 0x8c8   :  { %1589 = vst.msk [vmem:[#allocation2 + $0x18] sm:$0xff] %vm1074_vm5, %v1585_v7  ;;  %v6347_v7 = vld [vmem:[%s8433_s11 + $0x20] ss:$16 sps:$4 sm:$0xff]  }
 0x8cb   :  { %v1714_v18 = vpop.permute.xlu0 %1713 }
 0x8cc   :  { %1719 = vst.msk [vmem:[#allocation2 + $0x10] sm:$0xff] %vm1206_vm6, %v1714_v18  ;;  %v6350_v18 = vld [vmem:[%s8433_s11 + $0x28] ss:$16 sps:$4 sm:$0xff]  }
 0x8cf   :  { %v1716_v54 = vpop.permute.xlu1 %1715 }
 0x8d0   :  { %1720 = vst.msk [vmem:[#allocation2 + $0x18] sm:$0xff] %vm1206_vm6, %v1716_v54  ;;  %v6355_v54 = vld [vmem:[%s8433_s11 + $0x4] ss:$16 sps:$4 sm:$0xff]  }
 0x8d3   :  { %v1723_v11 = vld [vmem:[#allocation2 + $0x10] sm:$0xff] }
 0x8d7   :  { %v1724_v12 = vld [vmem:[#allocation2 + $0x18] sm:$0xff] }
 0x8d8   :  { %v1726_v61 = vpack.c.bf16 %v1724_v12, %v1723_v11  ;;  %v6358_v11 = vld [vmem:[%s8433_s11 + $0xc] ss:$16 sps:$4 sm:$0xff]   ;;  %v6353_v12 = vld [vmem:[%s8433_s11] ss:$16 sps:$4 sm:$0xff]  }
 0x8da   :  { %6073 = vmatmul.mubr.bf16.vlgmr.msra.gmra.mxu1 %v1726_v61  ;;  %v6356_v61 = vld [vmem:[%s8433_s11 + $0x8] ss:$16 sps:$4 sm:$0xff]  }
 0x8db   :  { %2218 = vmatprep.mubr.bf16.mxu1 %v6868_v1 }
 0x99a   :  { %v6074_v13 = vpop.f32.mrf.mxu1 }
 0x99b   :  { %v1841_v59 = vadd.f32 %v6074_v13, %v5441_v48 }
 0x99c   :  { %v1832_v16 = vpop.f32.mrf.mxu1 }
 0x99d   :  { %v1833_v17 = vadd.f32 %v5441_v48, %v1832_v16  ;;  %v7468_v45 = vadd.f32 %v1841_v59, %v7059_v34  ;;  %v6320_v34 = vld [vmem:[%s8433_s11 + $0xc8] ss:$16 sps:$4 sm:$0xff]  }
 0x99e   :  { %v6075_v40 = vpop.f32.mrf.mxu1 }
 0x99f   :  { %v7431_v2 = vadd.f32 %v1833_v17, %v7053_v25  ;;  %v1844_v21 = vadd.f32 %v6075_v40, %v5441_v48  ;;  %v6311_v25 = vld [vmem:[%s8433_s11 + $0xe0] ss:$16 sps:$4 sm:$0xff]  }
 0x9a0   :  { %v1835_v19 = vpop.f32.mrf.mxu1  ;;  %2134 = vmatpush1.bf16.msra.mxu0 %v6311_v25 }
 0x9a1   :  { %v1836_v0 = vadd.f32 %v5441_v48, %v1835_v19  ;;  %1853 = vadd.xlane.f32.xlu0 %v7431_v2  ;;  %v7439_v24 = vadd.f32 %v1844_v21, %v7072_v51  ;;  %2135 = vmatprep.subr.bf16.mxu0 %v6319_v47  ;;  %v6362_v47 = vld [vmem:[#allocation8 + $0xb8] sm:$0xff]  }
 0x9a3   :  { %v7435_v23 = vadd.f32 %v1836_v0, %v7056_v30  ;;  %v6314_v30 = vld [vmem:[%s8433_s11 + $0xe8] ss:$16 sps:$4 sm:$0xff]  }
 0x9a4   :  { %2187 = vmatpush1.bf16.msra.mxu1 %v6314_v30  ;;  %2136 = vmatpush1.bf16.msra.mxu0 %v6317_v20  ;;  %v6364_v20 = vld [vmem:[#allocation8 + $0xf0] sm:$0xff]  }
 0x9a5   :  { %1855 = vadd.xlane.f32.xlu1 %v7435_v23  ;;  %2188 = vmatprep.subr.bf16.mxu1 %v6322_v50  ;;  %v6363_v50 = vld [vmem:[#allocation8 + $0x70] sm:$0xff]  }
 0x9a6   :  { %2137 = vmatprep.subr.bf16.mxu0 %v6325_v26  ;;  %v6366_v26 = vld [vmem:[#allocation8 + $0xb0] sm:$0xff]  }
 0x9a8   :  { %2189 = vmatpush1.bf16.msra.mxu1 %v6320_v34  ;;  %2138 = vmatpush1.bf16.msra.mxu0 %v6323_v55  ;;  %v6365_v34 = vld [vmem:[#allocation8 + $0x30] sm:$0xff]   ;;  %v6368_v55 = vld [vmem:[#allocation8 + $0xe8] sm:$0xff]  }
 0x9a9   :  { %1859 = vadd.xlane.f32.xlu1 %v7439_v24  ;;  %2190 = vmatprep.subr.bf16.mxu1 %v6328_v53  ;;  %v6367_v53 = vld [vmem:[#allocation8 + $0x68] sm:$0xff]  }
 0x9aa   :  { %2139 = vmatprep.subr.bf16.mxu0 %v6331_v27  ;;  %v6370_v27 = vld [vmem:[#allocation8 + $0xa8] sm:$0xff]  }
 0x9ac   :  { %2191 = vmatpush1.bf16.msra.mxu1 %v6326_v22  ;;  %2140 = vmatpush1.bf16.msra.mxu0 %v6329_v60  ;;  %v6369_v22 = vld [vmem:[#allocation8 + $0x28] sm:$0xff]   ;;  %v6372_v60 = vld [vmem:[#allocation8 + $0xe0] sm:$0xff]  }
 0x9ad   :  { %2192 = vmatprep.subr.bf16.mxu1 %v6334_v57  ;;  %2141 = vmatprep.subr.bf16.mxu0 %v6337_v10  ;;  %v6371_v57 = vld [vmem:[#allocation8 + $0x60] sm:$0xff]   ;;  %v6375_v10 = vld [vmem:[#allocation8 + $0x58] sm:$0xff]  }
 0x9b0   :  { %2193 = vmatpush1.bf16.msra.mxu1 %v6332_v28  ;;  %2142 = vmatpush1.bf16.msra.mxu0 %v6335_v33  ;;  %v6373_v28 = vld [vmem:[#allocation8 + $0x20] sm:$0xff]  }
 0x9b1   :  { %2194 = vmatprep.subr.bf16.mxu1 %v6340_v38  ;;  %2143 = vmatprep.subr.bf16.mxu0 %v6343_v58  ;;  %v6374_v33 = vld [vmem:[#allocation8 + $0xa0] sm:$0xff]   ;;  %v6377_v38 = vld [vmem:[#allocation8 + $0x18] sm:$0xff]  }
 0x9b2   :  { %v6378_v58 = vld [vmem:[#allocation8 + $0x98] sm:$0xff]  }
 0x9b4   :  { %2195 = vmatpush1.bf16.msra.mxu1 %v6338_v43  ;;  %2144 = vmatpush1.bf16.msra.mxu0 %v6341_v3  ;;  %v6376_v43 = vld [vmem:[#allocation8 + $0xd8] sm:$0xff]   ;;  %v6380_v3 = vld [vmem:[#allocation8 + $0xd0] sm:$0xff]  }
 0x9b5   :  { %2196 = vmatprep.subr.bf16.mxu1 %v6346_v49  ;;  %2145 = vmatprep.subr.bf16.mxu0 %v6349_v6  ;;  %v6379_v49 = vld [vmem:[#allocation8 + $0x50] sm:$0xff]  }
 0x9b6   :  { %v6382_v6 = vld [vmem:[#allocation8 + $0x90] sm:$0xff]  }
 0x9b8   :  { %2197 = vmatpush1.bf16.msra.mxu1 %v6344_v44  ;;  %2146 = vmatpush1.bf16.msra.mxu0 %v6347_v7  ;;  %v6381_v44 = vld [vmem:[#allocation8 + $0x10] sm:$0xff]   ;;  %v6384_v7 = vld [vmem:[#allocation8 + $0xc8] sm:$0xff]  }
 0x9b9   :  { %2198 = vmatprep.subr.bf16.mxu1 %v6352_v32  ;;  %2147 = vmatprep.subr.bf16.mxu0 %v6355_v54  ;;  %v6383_v32 = vld [vmem:[#allocation8 + $0x48] sm:$0xff]  }
 0x9ba   :  { %v6386_v54 = vld [vmem:[#allocation8 + $0x88] sm:$0xff]  }
 0x9bc   :  { %2199 = vmatpush1.bf16.msra.mxu1 %v6350_v18  ;;  %2148 = vmatpush1.bf16.msra.mxu0 %v6353_v12  ;;  %v6385_v18 = vld [vmem:[#allocation8 + $0x8] sm:$0xff]   ;;  %v6388_v12 = vld [vmem:[#allocation8 + $0xc0] sm:$0xff]  }
 0x9bd   :  { %2200 = vmatprep.subr.bf16.mxu1 %v6358_v11  ;;  %v6387_v11 = vld [vmem:[#allocation8 + $0x40] sm:$0xff]  }
 0x9c0   :  { %2201 = vmatpush1.bf16.msra.mxu1 %v6356_v61  ;;  %v6389_v61 = vld [vmem:[#allocation8] sm:$0xff]  }
 0xa2a   :  { %v1854_v51 = vpop.xlane.xlu0 %1853 }
 0xa2b   :  { %v1861_v62 = vmul.f32 0.0078125, %v1854_v51 }
 0xa2d   :  { %v7455_v4 = vsub.f32 %v7431_v2, %v1861_v62 }
 0xa2e   :  { %v1856_v31 = vpop.xlane.xlu1 %1855 }
 0xa2f   :  { %v1862_v35 = vmul.f32 0.0078125, %v1856_v31  ;;  %v1869_v39 = vmul.f32 %v7455_v4, %v7455_v4 }
 0xa31   :  { %v7460_v41 = vsub.f32 %v7435_v23, %v1862_v35  ;;  %1873 = vadd.xlane.f32.xlu0 %v1869_v39  ;;  %v7573_v35 = vld [vmem:[%s8432_s10] ss:$0 sm:$0xff] }
 0xa32   :  { %v1860_v42 = vpop.xlane.xlu1 %1859 }
 0xa33   :  { %v1864_v14 = vmul.f32 0.0078125, %v1860_v42  ;;  %v1870_v8 = vmul.f32 %v7460_v41, %v7460_v41 }
 0xa35   :  { %v7465_v15 = vsub.f32 %v7439_v24, %v1864_v14  ;;  %1875 = vadd.xlane.f32.xlu0 %v1870_v8  ;;  %v6360_v8 = vld [vmem:[#allocation8 + $0xf8] sm:$0xff]  }
 0xa36   :  { %5794 = vmatprep.subr.bf16.mxu1 %v6360_v8 }
 0xa37   :  { %v1872_v46 = vmul.f32 %v7465_v15, %v7465_v15 }
 0xa39   :  { %1879 = vadd.xlane.f32.xlu1 %v1872_v46  ;;  %1857 = vadd.xlane.f32.xlu0 %v7468_v45  ;;  %v6361_v46 = vld [vmem:[#allocation8 + $0x38] sm:$0xff]  }
 0xaba   :  { %v1874_v48 = vpop.xlane.xlu0 %1873 }
 0xabb   :  { %v1881_v13 = vmul.f32 0.0078125, %v1874_v48  ;;  %v6390_v48 = vld [vmem:[#allocation8 + $0x80] sm:$0xff]  }
 0xabd   :  { %v1885_v59 = vadd.f32 1e-05, %v1881_v13 }
 0xabe   :  { %v1876_v16 = vpop.xlane.xlu0 %1875 }
 0xabf   :  { %6591 = vrsqrt.f32 %v1885_v59  ;;  %v1882_v17 = vmul.f32 0.0078125, %v1876_v16 }
 0xac1   :  { %v1886_v40 = vadd.f32 1e-05, %v1882_v17 }
 0xac2   :  { %v1858_v19 = vpop.xlane.xlu0 %1857  ;;  %v1880_v13 = vpop.xlane.xlu1 %1879 }
 0xac3   :  { %6593 = vrsqrt.f32 %v1886_v40  ;;  %v1863_v0 = vmul.f32 0.0078125, %v1858_v19  ;;  %v1884_v59 = vmul.f32 0.0078125, %v1880_v13 }
 0xac5   :  { %v7558_v21 = vsub.f32 %v7468_v45, %v1863_v0  ;;  %v1888_v16 = vadd.f32 1e-05, %v1884_v59 }
 0xac7   :  { %v1871_v25 = vmul.f32 %v7558_v21, %v7558_v21  ;;  %6595 = vrsqrt.f32 %v1888_v16 }
 0xac9   :  { %1877 = vadd.xlane.f32.xlu0 %v1871_v25 }
 0xacc   :  { %v6592_v5 = vpop.eup %6591 }
 0xacd   :  { %v1893_v30 = vmul.f32 %v6592_v5, %v7455_v4 }
 0xacf   :  { %v1903_v31 = vmul.f32 %v7566_v29, %v1893_v30 }
 0xad0   :  { %v6594_v51 = vpop.eup %6593 }
 0xad1   :  { %v1894_v62 = vmul.f32 %v6594_v51, %v7460_v41  ;;  %v1913_v42 = vadd.f32 %v7573_v35, %v1903_v31  ;;  %v6359_v41 = vld [vmem:[#allocation8 + $0x78] sm:$0xff]  }
 0xad2   :  { %5766 = vmatprep.subr.bf16.mxu0 %v6359_v41 }
 0xad3   :  { %v1904_v39 = vmul.f32 %v7566_v29, %v1894_v62 }
 0xad4   :  { %v6596_v0 = vpop.eup %6595 }
 0xad5   :  { %v1914_v4 = vadd.f32 %v7573_v35, %v1904_v39  ;;  %v1896_v25 = vmul.f32 %v6596_v0, %v7465_v15  ;;  %v1967_v15 = vsub.s32 3, %v7098_v56 }
 0xad7   :  { %v1917_v14 = vpack.c.bf16 %v1914_v4, %v1913_v42  ;;  %v1906_v51 = vmul.f32 %v7566_v29, %v1896_v25  ;;  %v1951_v4 = vld [vmem:[%s8434_s12] sm:$0xf] }
 0xad9   :  { %2166 = vmatmul.mubr.bf16.vlgmr.msra.gmra.mxu0 %v1917_v14  ;;  %2219 = vmatmul.mubr.bf16.vlgmr.msra.gmra.mxu1 %v1917_v14  ;;  %v1916_v39 = vadd.f32 %v7573_v35, %v1906_v51  ;;  %v7591_v14 = vrot.slane %v1951_v4, %v7108_v63 }
 0xada   :  { %2175 = vmatprep.mubr.bf16.mxu0 %v6868_v1  ;;  %2228 = vmatprep.mubr.bf16.mxu1 %v6868_v1 }
 0xadb   :  { %5767 = vmatpush3.bf16.msra.mxu0 %v6361_v46  ;;  %5795 = vmatpush3.bf16.msra.mxu1 %v6362_v47 }
 0xadc   :  { %5768 = vmatprep.subr.bf16.mxu0 %v6363_v50  ;;  %5796 = vmatprep.subr.bf16.mxu1 %v6364_v20 }
 0xadf   :  { %5769 = vmatpush3.bf16.msra.mxu0 %v6365_v34  ;;  %5797 = vmatpush3.bf16.msra.mxu1 %v6366_v26 }
 0xae0   :  { %5770 = vmatprep.subr.bf16.mxu0 %v6367_v53  ;;  %5798 = vmatprep.subr.bf16.mxu1 %v6368_v55 }
 0xae3   :  { %5771 = vmatpush3.bf16.msra.mxu0 %v6369_v22  ;;  %5799 = vmatpush3.bf16.msra.mxu1 %v6370_v27 }
 0xae4   :  { %5772 = vmatprep.subr.bf16.mxu0 %v6371_v57  ;;  %5800 = vmatprep.subr.bf16.mxu1 %v6372_v60 }
 0xae7   :  { %5773 = vmatpush3.bf16.msra.mxu0 %v6373_v28  ;;  %5801 = vmatpush3.bf16.msra.mxu1 %v6374_v33 }
 0xae8   :  { %5774 = vmatprep.subr.bf16.mxu0 %v6375_v10  ;;  %5802 = vmatprep.subr.bf16.mxu1 %v6376_v43 }
 0xaeb   :  { %5775 = vmatpush3.bf16.msra.mxu0 %v6377_v38  ;;  %5803 = vmatpush3.bf16.msra.mxu1 %v6378_v58 }
 0xaec   :  { %5776 = vmatprep.subr.bf16.mxu0 %v6379_v49  ;;  %5804 = vmatprep.subr.bf16.mxu1 %v6380_v3 }
 0xaef   :  { %5777 = vmatpush3.bf16.msra.mxu0 %v6381_v44  ;;  %5805 = vmatpush3.bf16.msra.mxu1 %v6382_v6 }
 0xaf0   :  { %5778 = vmatprep.subr.bf16.mxu0 %v6383_v32  ;;  %5806 = vmatprep.subr.bf16.mxu1 %v6384_v7 }
 0xaf3   :  { %5779 = vmatpush3.bf16.msra.mxu0 %v6385_v18  ;;  %5807 = vmatpush3.bf16.msra.mxu1 %v6386_v54 }
 0xaf4   :  { %5780 = vmatprep.subr.bf16.mxu0 %v6387_v11  ;;  %5808 = vmatprep.subr.bf16.mxu1 %v6388_v12 }
 0xaf7   :  { %5781 = vmatpush3.bf16.msra.mxu0 %v6389_v61  ;;  %5809 = vmatpush3.bf16.msra.mxu1 %v6390_v48 }
 0xb52   :  { %v1878_v17 = vpop.xlane.xlu0 %1877 }
 0xb53   :  { %v1883_v40 = vmul.f32 0.0078125, %v1878_v17 }
 0xb55   :  { %v1887_v19 = vadd.f32 1e-05, %v1883_v40 }
 0xb57   :  { %6597 = vrsqrt.f32 %v1887_v19 }
 0xb64   :  { %v6598_v5 = vpop.eup %6597 }
 0xb65   :  { %v1895_v30 = vmul.f32 %v6598_v5, %v7558_v21  ;;  %v7594_v21 = vrot.slane %v1951_v4, %v7123_v9 }
 0xb67   :  { %v1905_v62 = vmul.f32 %v7566_v29, %v1895_v30  ;;  %v7597_v29 = vrot.slane %v1951_v4, %v7101_v52 }
 0xb69   :  { %v1915_v31 = vadd.f32 %v7573_v35, %v1905_v62  ;;  %v7601_v35 = vrot.slane %v1951_v4, %v1967_v15 }
 0xb6b   :  { %v1918_v42 = vpack.c.bf16 %v1916_v39, %v1915_v31 }
 0xb6d   :  { %2176 = vmatmul.mubr.bf16.gmra.mxu0 %v1918_v42  ;;  %2229 = vmatmul.mubr.bf16.gmra.mxu1 %v1918_v42 }
 0xb99   :  { %v2167_v41 = vpop.f32.mrf.mxu0  ;;  %v2220_v8 = vpop.f32.mrf.mxu1 }
 0xb9a   :  { %v7604_v46 = vadd.f32 %v2167_v41, %v7591_v14  ;;  %v7607_v47 = vadd.f32 %v2220_v8, %v7594_v21 }
 0xb9b   :  { %v2169_v50 = vpop.f32.mrf.mxu0  ;;  %v2222_v20 = vpop.f32.mrf.mxu1 }
 0xb9c   :  { %v2239_v34 = vmul.f32 %v7604_v46, %v7604_v46  ;;  %v2241_v26 = vmul.f32 %v7607_v47, %v7607_v47  ;;  %v7614_v53 = vadd.f32 %v2169_v50, %v7597_v29  ;;  %v7617_v55 = vadd.f32 %v2222_v20, %v7601_v35 }
 0xb9d   :  { %v2171_v22 = vpop.f32.mrf.mxu0  ;;  %v2224_v27 = vpop.f32.mrf.mxu1 }
 0xb9e   :  { %v2255_v57 = vmul.f32 %v2239_v34, %v7604_v46  ;;  %v2257_v60 = vmul.f32 %v2241_v26, %v7607_v47  ;;  %v2240_v28 = vmul.f32 %v7614_v53, %v7614_v53  ;;  %v2242_v33 = vmul.f32 %v7617_v55, %v7617_v55 }
 0xb9f   :  { %v7626_v10 = vadd.f32 %v2171_v22, %v7591_v14  ;;  %v7629_v43 = vadd.f32 %v2224_v27, %v7594_v21  ;;  %v2173_v38 = vpop.f32.mrf.mxu0  ;;  %v2226_v58 = vpop.f32.mrf.mxu1 }
 0xba0   :  { %v2271_v49 = vmul.f32 0.044715, %v2255_v57  ;;  %v2273_v3 = vmul.f32 0.044715, %v2257_v60  ;;  %v2256_v44 = vmul.f32 %v2240_v28, %v7614_v53  ;;  %v2258_v6 = vmul.f32 %v2242_v33, %v7617_v55 }
 0xba1   :  { %v2243_v32 = vmul.f32 %v7626_v10, %v7626_v10  ;;  %v2245_v7 = vmul.f32 %v7629_v43, %v7629_v43  ;;  %v7638_v18 = vadd.f32 %v2173_v38, %v7597_v29  ;;  %v7641_v54 = vadd.f32 %v2226_v58, %v7601_v35 }
 0xba2   :  { %v2287_v11 = vadd.f32 %v2271_v49, %v7604_v46  ;;  %v2289_v12 = vadd.f32 %v2273_v3, %v7607_v47  ;;  %v2272_v61 = vmul.f32 0.044715, %v2256_v44  ;;  %v2274_v48 = vmul.f32 0.044715, %v2258_v6 }
 0xba3   :  { %v2259_v13 = vmul.f32 %v2243_v32, %v7626_v10  ;;  %v2261_v59 = vmul.f32 %v2245_v7, %v7629_v43  ;;  %v2244_v16 = vmul.f32 %v7638_v18, %v7638_v18  ;;  %v2246_v17 = vmul.f32 %v7641_v54, %v7641_v54 }
 0xba4   :  { %v2303_v40 = vmul.f32 0.7978846, %v2287_v11  ;;  %v2305_v19 = vmul.f32 0.7978846, %v2289_v12  ;;  %v2288_v0 = vadd.f32 %v2272_v61, %v7614_v53  ;;  %v2290_v25 = vadd.f32 %v2274_v48, %v7617_v55 }
 0xba5   :  { %v2275_v5 = vmul.f32 0.044715, %v2259_v13  ;;  %v2277_v30 = vmul.f32 0.044715, %v2261_v59  ;;  %v2260_v51 = vmul.f32 %v2244_v16, %v7638_v18  ;;  %v2262_v62 = vmul.f32 %v2246_v17, %v7641_v54 }
 0xba6   :  { %6599 = vtanh.f32 %v2303_v40  ;;  %v2304_v31 = vmul.f32 0.7978846, %v2288_v0  ;;  %v2306_v39 = vmul.f32 0.7978846, %v2290_v25 }
 0xba7   :  { %6601 = vtanh.f32 %v2305_v19  ;;  %v2291_v42 = vadd.f32 %v2275_v5, %v7626_v10  ;;  %v2293_v4 = vadd.f32 %v2277_v30, %v7629_v43  ;;  %v2276_v41 = vmul.f32 0.044715, %v2260_v51 }
 0xba8   :  { %6603 = vtanh.f32 %v2304_v31  ;;  %v2278_v8 = vmul.f32 0.044715, %v2262_v62 }
 0xba9   :  { %6605 = vtanh.f32 %v2306_v39  ;;  %v2307_v50 = vmul.f32 0.7978846, %v2291_v42  ;;  %v2309_v20 = vmul.f32 0.7978846, %v2293_v4  ;;  %v2292_v34 = vadd.f32 %v2276_v41, %v7638_v18 }
 0xbaa   :  { %v2294_v26 = vadd.f32 %v2278_v8, %v7641_v54 }
 0xbab   :  { %6607 = vtanh.f32 %v2307_v50  ;;  %v2308_v22 = vmul.f32 0.7978846, %v2292_v34 }
 0xbac   :  { %6609 = vtanh.f32 %v2309_v20  ;;  %v2310_v27 = vmul.f32 0.7978846, %v2294_v26 }
 0xbad   :  { %6611 = vtanh.f32 %v2308_v22 }
 0xbae   :  { %6613 = vtanh.f32 %v2310_v27 }
 0xbb3   :  { %v6600_v57 = vpop.eup %6599 }
 0xbb4   :  { %v6602_v60 = vpop.eup %6601  ;;  %v2335_v49 = vadd.f32 1.0, %v6600_v57 }
 0xbb5   :  { %v6604_v28 = vpop.eup %6603  ;;  %v2337_v6 = vadd.f32 1.0, %v6602_v60 }
 0xbb6   :  { %v6606_v33 = vpop.eup %6605  ;;  %v2336_v38 = vadd.f32 1.0, %v6604_v28  ;;  %v2351_v59 = vmul.f32 0.5, %v2335_v49 }
 0xbb7   :  { %v2338_v3 = vadd.f32 1.0, %v6606_v33  ;;  %v2353_v19 = vmul.f32 0.5, %v2337_v6 }
 0xbb8   :  { %v6608_v58 = vpop.eup %6607  ;;  %v2352_v13 = vmul.f32 0.5, %v2336_v38  ;;  %v2367_v31 = vmul.f32 %v2351_v59, %v7604_v46 }
 0xbb9   :  { %v6610_v44 = vpop.eup %6609  ;;  %v2339_v32 = vadd.f32 1.0, %v6608_v58  ;;  %v2354_v40 = vmul.f32 0.5, %v2338_v3  ;;  %v2369_v4 = vmul.f32 %v2353_v19, %v7607_v47 }
 0xbba   :  { %v6612_v7 = vpop.eup %6611  ;;  %v2341_v11 = vadd.f32 1.0, %v6610_v44  ;;  %v2368_v51 = vmul.f32 %v2352_v13, %v7614_v53 }
 0xbbb   :  { %v6614_v12 = vpop.eup %6613  ;;  %v2355_v61 = vmul.f32 0.5, %v2339_v32  ;;  %v2340_v48 = vadd.f32 1.0, %v6612_v7  ;;  %v2370_v39 = vmul.f32 %v2354_v40, %v7617_v55 }
 0xbbc   :  { %v2357_v16 = vmul.f32 0.5, %v2341_v11  ;;  %v2342_v17 = vadd.f32 1.0, %v6614_v12 }
 0xbbd   :  { %v2356_v0 = vmul.f32 0.5, %v2340_v48  ;;  %v2371_v25 = vmul.f32 %v2355_v61, %v7626_v10 }
 0xbbe   :  { %v2358_v5 = vmul.f32 0.5, %v2342_v17  ;;  %v2373_v30 = vmul.f32 %v2357_v16, %v7629_v43 }
 0xbbf   :  { %v2372_v62 = vmul.f32 %v2356_v0, %v7638_v18  ;;  %v2383_v8 = vpack.c.bf16 %v2371_v25, %v2367_v31 }
 0xbc0   :  { %v2374_v42 = vmul.f32 %v2358_v5, %v7641_v54  ;;  %v2385_v20 = vpack.c.bf16 %v2373_v30, %v2369_v4 }
 0xbc1   :  { %v2384_v41 = vpack.c.bf16 %v2372_v62, %v2368_v51 }
 0xbc2   :  { %v2386_v50 = vpack.c.bf16 %v2374_v42, %v2370_v39 }
 0xbc3   :  { %2686 = vmatprep.mubr.bf16.mxu0 %v2384_v41 }
 0xbc4   :  { %2735 = vmatprep.mubr.bf16.mxu1 %v2386_v50  ;;  %2687 = vmatmul.mubr.bf16.vlgmr.msra.gmra.mxu0 %v2383_v8 }
 0xbc5   :  { %2736 = vmatmul.mubr.bf16.vlgmr.msra.gmra.mxu1 %v2385_v20 }
 0xc2d   :  { %v2177_v10 = vpop.f32.mrf.mxu0  ;;  %v2230_v53 = vpop.f32.mrf.mxu1 }
 0xc2e   :  { %v7668_v43 = vadd.f32 %v2177_v10, %v7591_v14  ;;  %v7671_v46 = vadd.f32 %v2230_v53, %v7594_v21 }
 0xc2f   :  { %v2179_v55 = vpop.f32.mrf.mxu0  ;;  %v2232_v18 = vpop.f32.mrf.mxu1 }
 0xc30   :  { %v2247_v47 = vmul.f32 %v7668_v43, %v7668_v43  ;;  %v2249_v54 = vmul.f32 %v7671_v46, %v7671_v46  ;;  %v7678_v34 = vadd.f32 %v2179_v55, %v7597_v29  ;;  %v7681_v26 = vadd.f32 %v2232_v18, %v7601_v35 }
 0xc31   :  { %v2181_v22 = vpop.f32.mrf.mxu0  ;;  %v2234_v27 = vpop.f32.mrf.mxu1 }
 0xc32   :  { %v2263_v57 = vmul.f32 %v2247_v47, %v7668_v43  ;;  %v2265_v60 = vmul.f32 %v2249_v54, %v7671_v46  ;;  %v2248_v28 = vmul.f32 %v7678_v34, %v7678_v34  ;;  %v2250_v33 = vmul.f32 %v7681_v26, %v7681_v26 }
 0xc33   :  { %v7690_v38 = vadd.f32 %v2181_v22, %v7591_v14  ;;  %v7693_v58 = vadd.f32 %v2234_v27, %v7594_v21  ;;  %v2183_v49 = vpop.f32.mrf.mxu0  ;;  %v2236_v3 = vpop.f32.mrf.mxu1 }
 0xc34   :  { %v2279_v44 = vmul.f32 0.044715, %v2263_v57  ;;  %v2281_v6 = vmul.f32 0.044715, %v2265_v60  ;;  %v2264_v32 = vmul.f32 %v2248_v28, %v7678_v34  ;;  %v2266_v7 = vmul.f32 %v2250_v33, %v7681_v26 }
 0xc35   :  { %v2251_v11 = vmul.f32 %v7690_v38, %v7690_v38  ;;  %v2253_v12 = vmul.f32 %v7693_v58, %v7693_v58  ;;  %v7702_v14 = vadd.f32 %v2183_v49, %v7597_v29  ;;  %v7705_v21 = vadd.f32 %v2236_v3, %v7601_v35 }
 0xc36   :  { %v2295_v61 = vadd.f32 %v2279_v44, %v7668_v43  ;;  %v2297_v48 = vadd.f32 %v2281_v6, %v7671_v46  ;;  %v2280_v13 = vmul.f32 0.044715, %v2264_v32  ;;  %v2282_v59 = vmul.f32 0.044715, %v2266_v7 }
 0xc37   :  { %v2267_v16 = vmul.f32 %v2251_v11, %v7690_v38  ;;  %v2269_v17 = vmul.f32 %v2253_v12, %v7693_v58  ;;  %v2252_v40 = vmul.f32 %v7702_v14, %v7702_v14  ;;  %v2254_v29 = vmul.f32 %v7705_v21, %v7705_v21 }
 0xc38   :  { %v2311_v19 = vmul.f32 0.7978846, %v2295_v61  ;;  %v2313_v0 = vmul.f32 0.7978846, %v2297_v48  ;;  %v2296_v35 = vadd.f32 %v2280_v13, %v7678_v34  ;;  %v2298_v25 = vadd.f32 %v2282_v59, %v7681_v26 }
 0xc39   :  { %v2283_v5 = vmul.f32 0.044715, %v2267_v16  ;;  %v2285_v30 = vmul.f32 0.044715, %v2269_v17  ;;  %v2268_v51 = vmul.f32 %v2252_v40, %v7702_v14  ;;  %v2270_v62 = vmul.f32 %v2254_v29, %v7705_v21 }
 0xc3a   :  { %6615 = vtanh.f32 %v2311_v19  ;;  %v2312_v31 = vmul.f32 0.7978846, %v2296_v35  ;;  %v2314_v39 = vmul.f32 0.7978846, %v2298_v25 }
 0xc3b   :  { %6617 = vtanh.f32 %v2313_v0  ;;  %v2299_v42 = vadd.f32 %v2283_v5, %v7690_v38  ;;  %v2301_v4 = vadd.f32 %v2285_v30, %v7693_v58  ;;  %v2284_v41 = vmul.f32 0.044715, %v2268_v51 }
 0xc3c   :  { %6619 = vtanh.f32 %v2312_v31  ;;  %v2286_v8 = vmul.f32 0.044715, %v2270_v62 }
 0xc3d   :  { %6621 = vtanh.f32 %v2314_v39  ;;  %v2315_v50 = vmul.f32 0.7978846, %v2299_v42  ;;  %v2317_v20 = vmul.f32 0.7978846, %v2301_v4  ;;  %v2300_v10 = vadd.f32 %v2284_v41, %v7702_v14 }
 0xc3e   :  { %v2302_v53 = vadd.f32 %v2286_v8, %v7705_v21 }
 0xc3f   :  { %6623 = vtanh.f32 %v2315_v50  ;;  %v2316_v55 = vmul.f32 0.7978846, %v2300_v10 }
 0xc40   :  { %6625 = vtanh.f32 %v2317_v20  ;;  %v2318_v18 = vmul.f32 0.7978846, %v2302_v53 }
 0xc41   :  { %6627 = vtanh.f32 %v2316_v55 }
 0xc42   :  { %6629 = vtanh.f32 %v2318_v18 }
 0xc47   :  { %v6616_v47 = vpop.eup %6615 }
 0xc48   :  { %v6618_v54 = vpop.eup %6617  ;;  %v2343_v33 = vadd.f32 1.0, %v6616_v47 }
 0xc49   :  { %v6620_v22 = vpop.eup %6619  ;;  %v2345_v44 = vadd.f32 1.0, %v6618_v54 }
 0xc4a   :  { %v6622_v27 = vpop.eup %6621  ;;  %v2344_v57 = vadd.f32 1.0, %v6620_v22  ;;  %v2359_v59 = vmul.f32 0.5, %v2343_v33 }
 0xc4b   :  { %v2346_v28 = vadd.f32 1.0, %v6622_v27  ;;  %v2361_v40 = vmul.f32 0.5, %v2345_v44  ;;  %v6391_v27 = vld [vmem:[#allocation5 + $0x168] ss:$12 sps:$4 sm:$0xff]  }
 0xc4c   :  { %v6624_v60 = vpop.eup %6623  ;;  %v2360_v12 = vmul.f32 0.5, %v2344_v57  ;;  %v2375_v51 = vmul.f32 %v2359_v59, %v7668_v43  ;;  %v6393_v57 = vld [vmem:[#allocation5 + $0x16c] ss:$12 sps:$4 sm:$0xff]  }
 0xc4d   :  { %v6626_v49 = vpop.eup %6625  ;;  %v2347_v3 = vadd.f32 1.0, %v6624_v60  ;;  %v2362_v13 = vmul.f32 0.5, %v2346_v28  ;;  %v2377_v31 = vmul.f32 %v2361_v40, %v7671_v46  ;;  %3005 = vmatprep.subr.bf16.mxu0 %v6393_v57 }
 0xc4e   :  { %v6628_v6 = vpop.eup %6627  ;;  %v2349_v32 = vadd.f32 1.0, %v6626_v49  ;;  %v2376_v0 = vmul.f32 %v2360_v12, %v7678_v34  ;;  %3006 = vmatpush1.bf16.msra.mxu0 %v6391_v27 }
 0xc4f   :  { %v6630_v7 = vpop.eup %6629  ;;  %v2348_v11 = vadd.f32 1.0, %v6628_v6  ;;  %v2363_v61 = vmul.f32 0.5, %v2347_v3  ;;  %v2378_v5 = vmul.f32 %v2362_v13, %v7681_v26  ;;  %v5484_v26 = vld [vmem:[%s8436_s14] ss:$0 sm:$0xff] }
 0xc50   :  { %v2350_v48 = vadd.f32 1.0, %v6630_v7  ;;  %v2365_v16 = vmul.f32 0.5, %v2349_v32 }
 0xc51   :  { %v2364_v17 = vmul.f32 0.5, %v2348_v11  ;;  %v2379_v19 = vmul.f32 %v2363_v61, %v7690_v38 }
 0xc52   :  { %v2366_v29 = vmul.f32 0.5, %v2350_v48  ;;  %v2381_v25 = vmul.f32 %v2365_v16, %v7693_v58 }
 0xc53   :  { %v2380_v35 = vmul.f32 %v2364_v17, %v7702_v14  ;;  %v2387_v42 = vpack.c.bf16 %v2379_v19, %v2375_v51  ;;  %v6394_v51 = vld [vmem:[#allocation5 + $0x150] ss:$12 sps:$4 sm:$0xff]  }
 0xc54   :  { %v2382_v30 = vmul.f32 %v2366_v29, %v7705_v21  ;;  %v2389_v4 = vpack.c.bf16 %v2381_v25, %v2377_v31  ;;  %v6397_v31 = vld [vmem:[#allocation5 + $0x138] ss:$12 sps:$4 sm:$0xff]  }
 0xc55   :  { %v2388_v62 = vpack.c.bf16 %v2380_v35, %v2376_v0 }
 0xc56   :  { %v2390_v39 = vpack.c.bf16 %v2382_v30, %v2378_v5  ;;  %v6396_v30 = vld [vmem:[#allocation5 + $0x154] ss:$12 sps:$4 sm:$0xff]  }
 0xc57   :  { %2694 = vmatprep.mubr.bf16.mxu0 %v2388_v62  ;;  %3007 = vmatprep.subr.bf16.mxu0 %v6396_v30  ;;  %v6399_v62 = vld [vmem:[#allocation5 + $0x13c] ss:$12 sps:$4 sm:$0xff]  }
 0xc58   :  { %2743 = vmatprep.mubr.bf16.mxu1 %v2390_v39  ;;  %2695 = vmatmul.mubr.bf16.gmra.mxu0 %v2387_v42  ;;  %v6402_v39 = vld [vmem:[#allocation5 + $0x124] ss:$12 sps:$4 sm:$0xff]   ;;  %v6405_v42 = vld [vmem:[#allocation5 + $0x10c] ss:$12 sps:$4 sm:$0xff]  }
 0xc59   :  { %2744 = vmatmul.mubr.bf16.gmra.mxu1 %v2389_v4  ;;  %3037 = vmatprep.mubr.bf16.mxu0 %v6868_v1  ;;  %v6403_v4 = vld [vmem:[#allocation5 + $0x108] ss:$12 sps:$4 sm:$0xff]  }
 0xc5a   :  { %3008 = vmatpush1.bf16.msra.mxu0 %v6394_v51 }
 0xc5b   :  { %3009 = vmatprep.subr.bf16.mxu0 %v6399_v62 }
 0xc5e   :  { %3010 = vmatpush1.bf16.msra.mxu0 %v6397_v31 }
 0xc5f   :  { %3011 = vmatprep.subr.bf16.mxu0 %v6402_v39 }
 0xc84   :  { %v5782_v34 = vpop.f32.mrf.mxu0 }
 0xc85   :  { %v5810_v38 = vpop.f32.mrf.mxu1 }
 0xc86   :  { %v5783_v58 = vpop.f32.mrf.mxu0 }
 0xc87   :  { %v5784_v43 = vadd.f32 %v5783_v58, %v5782_v34  ;;  %v5811_v14 = vpop.f32.mrf.mxu1  ;;  %v6406_v34 = vld [vmem:[#allocation5 + $0xf0] ss:$12 sps:$4 sm:$0xff]  }
 0xc88   :  { %v5785_v21 = vpop.f32.mrf.mxu0  ;;  %v5812_v41 = vadd.f32 %v5811_v14, %v5810_v38  ;;  %v6411_v38 = vld [vmem:[#allocation5 + $0xdc] ss:$12 sps:$4 sm:$0xff]   ;;  %v6414_v58 = vld [vmem:[#allocation5 + $0xc4] ss:$12 sps:$4 sm:$0xff]  }
 0xc89   :  { %v2689_v46 = vadd.f32 %v5784_v43, %v5484_v26  ;;  %v5813_v8 = vpop.f32.mrf.mxu1  ;;  %v6412_v43 = vld [vmem:[#allocation5 + $0xc0] ss:$12 sps:$4 sm:$0xff]   ;;  %v6415_v14 = vld [vmem:[#allocation5 + $0x170] ss:$12 sps:$4 sm:$0xff]  }
 0xc8a   :  { %v5786_v50 = vpop.f32.mrf.mxu0  ;;  %6076 = vmatprep.subr.bf16.mxu1 %v6415_v14 }
 0xc8b   :  { %v2738_v20 = vadd.f32 %v5812_v41, %v2689_v46  ;;  %v5787_v10 = vadd.f32 %v5786_v50, %v5785_v21  ;;  %v5814_v53 = vpop.f32.mrf.mxu1  ;;  %6077 = vmatpush3.bf16.msra.mxu1 %v6415_v14 }
 0xc8c   :  { %v5815_v18 = vadd.f32 %v5814_v53, %v5813_v8 }
 0xc8d   :  { %v2692_v55 = vadd.f32 %v5787_v10, %v5484_v26  ;;  %v7736_v47 = vadd.f32 %v2738_v20, %v7431_v2 }
 0xc8f   :  { %v2741_v54 = vadd.f32 %v5815_v18, %v2692_v55  ;;  %2760 = vadd.xlane.f32.xlu0 %v7736_v47 }
 0xc91   :  { %v7740_v22 = vadd.f32 %v2741_v54, %v7435_v23 }
 0xc93   :  { %2762 = vadd.xlane.f32.xlu1 %v7740_v22 }
 0xd18   :  { %v2761_v60 = vpop.xlane.xlu0 %2760  ;;  %v5788_v28 = vpop.f32.mrf.mxu0 }
 0xd19   :  { %v5816_v33 = vpop.f32.mrf.mxu1  ;;  %v2768_v49 = vmul.f32 0.0078125, %v2761_v60 }
 0xd1a   :  { %v5789_v3 = vpop.f32.mrf.mxu0 }
 0xd1b   :  { %v7744_v2 = vsub.f32 %v7736_v47, %v2768_v49  ;;  %v5790_v44 = vadd.f32 %v5789_v3, %v5788_v28  ;;  %v5817_v6 = vpop.f32.mrf.mxu1  ;;  %v5519_v49 = vld [vmem:[%s8452_s25 + $0x1] ss:$0 sm:$0xff] }
 0xd1c   :  { %v2763_v32 = vpop.xlane.xlu1 %2762  ;;  %v5791_v7 = vpop.f32.mrf.mxu0  ;;  %v5818_v11 = vadd.f32 %v5817_v6, %v5816_v33 }
 0xd1d   :  { %v2697_v23 = vadd.f32 %v5790_v44, %v5484_v26  ;;  %v5819_v12 = vpop.f32.mrf.mxu1  ;;  %v2769_v61 = vmul.f32 0.0078125, %v2763_v32  ;;  %v2776_v48 = vmul.f32 %v7744_v2, %v7744_v2  ;;  %v6416_v44 = vld [vmem:[#allocation5 + $0x158] ss:$12 sps:$4 sm:$0xff]  }
 0xd1e   :  { %v5792_v13 = vpop.f32.mrf.mxu0  ;;  %6078 = vmatprep.subr.bf16.mxu1 %v6416_v44 }
 0xd1f   :  { %v2746_v59 = vadd.f32 %v5818_v11, %v2697_v23  ;;  %v7749_v16 = vsub.f32 %v7740_v22, %v2769_v61  ;;  %v5793_v17 = vadd.f32 %v5792_v13, %v5791_v7  ;;  %v5820_v40 = vpop.f32.mrf.mxu1  ;;  %2780 = vadd.xlane.f32.xlu0 %v2776_v48  ;;  %v5520_v7 = vld [vmem:[%s8426_s4 + $0x1] ss:$0 sm:$0xff]  ;;  %6079 = vmatpush3.bf16.msra.mxu1 %v6416_v44  ;;  %v6418_v48 = vld [vmem:[#allocation5 + $0x128] ss:$12 sps:$4 sm:$0xff]   ;;  %v6419_v13 = vld [vmem:[#allocation5 + $0x110] ss:$12 sps:$4 sm:$0xff]  }
 0xd20   :  { %v5821_v19 = vadd.f32 %v5820_v40, %v5819_v12  ;;  %v6417_v11 = vld [vmem:[#allocation5 + $0x140] ss:$12 sps:$4 sm:$0xff]  }
 0xd21   :  { %v2700_v29 = vadd.f32 %v5793_v17, %v5484_v26  ;;  %v2777_v0 = vmul.f32 %v7749_v16, %v7749_v16  ;;  %v7754_v35 = vadd.f32 %v2746_v59, %v7468_v45  ;;  %v6400_v45 = vld [vmem:[#allocation5 + $0x120] ss:$12 sps:$4 sm:$0xff]   ;;  %v6409_v26 = vld [vmem:[#allocation5 + $0xd8] ss:$12 sps:$4 sm:$0xff]   ;;  %6080 = vmatprep.subr.bf16.mxu1 %v6417_v11  ;;  %v6422_v17 = vld [vmem:[#allocation5 + $0xc8] ss:$12 sps:$4 sm:$0xff]  }
 0xd22   :  { %3012 = vmatpush1.bf16.msra.mxu0 %v6400_v45  ;;  %v6420_v59 = vld [vmem:[#allocation5 + $0xf8] ss:$12 sps:$4 sm:$0xff]  }
 0xd23   :  { %v2749_v25 = vadd.f32 %v5821_v19, %v2700_v29  ;;  %2782 = vadd.xlane.f32.xlu1 %v2777_v0  ;;  %2764 = vadd.xlane.f32.xlu0 %v7754_v35 }
 0xd24   :  { %3013 = vmatprep.subr.bf16.mxu0 %v6405_v42  ;;  %6081 = vmatpush3.bf16.msra.mxu1 %v6417_v11 }
 0xd25   :  { %v7758_v5 = vadd.f32 %v2749_v25, %v7439_v24  ;;  %v6408_v24 = vld [vmem:[#allocation5 + $0xf4] ss:$12 sps:$4 sm:$0xff]   ;;  %6082 = vmatprep.subr.bf16.mxu1 %v6418_v48 }
 0xd26   :  { %3014 = vmatpush1.bf16.msra.mxu0 %v6403_v4 }
 0xd27   :  { %2766 = vadd.xlane.f32.xlu1 %v7758_v5  ;;  %3015 = vmatprep.subr.bf16.mxu0 %v6408_v24 }
 0xd28   :  { %6083 = vmatpush3.bf16.msra.mxu1 %v6418_v48 }
 0xd29   :  { %6084 = vmatprep.subr.bf16.mxu1 %v6419_v13 }
 0xd2a   :  { %3016 = vmatpush1.bf16.msra.mxu0 %v6406_v34 }
 0xd2b   :  { %3017 = vmatprep.subr.bf16.mxu0 %v6411_v38 }
 0xd2c   :  { %6085 = vmatpush3.bf16.msra.mxu1 %v6419_v13 }
 0xd2d   :  { %6086 = vmatprep.subr.bf16.mxu1 %v6420_v59 }
 0xd2e   :  { %3018 = vmatpush1.bf16.msra.mxu0 %v6409_v26  ;;  %v5521_v26 = vld [vmem:[%s8428_s6 + $0x3] sm:$0x7] }
 0xd2f   :  { %3019 = vmatprep.subr.bf16.mxu0 %v6414_v58 }
 0xd30   :  { %6087 = vmatpush3.bf16.msra.mxu1 %v6420_v59 }
 0xd32   :  { %3020 = vmatpush1.bf16.msra.mxu0 %v6412_v43  ;;  %v2869_v43 = vrot.slane %v5521_v26, %v7101_v52 }
 0xd33   :  { %6096 = vmatprep.subr.bf16.mxu0 %v6869_v37 }
 0xda8   :  { %v2781_v21 = vpop.xlane.xlu0 %2780 }
 0xda9   :  { %v2788_v46 = vmul.f32 0.0078125, %v2781_v21 }
 0xdab   :  { %v2792_v41 = vadd.f32 1e-05, %v2788_v46 }
 0xdac   :  { %v2783_v8 = vpop.xlane.xlu1 %2782  ;;  %v2765_v50 = vpop.xlane.xlu0 %2764 }
 0xdad   :  { %6631 = vrsqrt.f32 %v2792_v41  ;;  %v2789_v20 = vmul.f32 0.0078125, %v2783_v8  ;;  %v2770_v10 = vmul.f32 0.0078125, %v2765_v50  ;;  %v2865_v50 = vrot.slane %v5521_v26, %v7108_v63 }
 0xdaf   :  { %v2793_v53 = vadd.f32 1e-05, %v2789_v20  ;;  %v2774_v55 = vsub.f32 %v7754_v35, %v2770_v10 }
 0xdb0   :  { %v2767_v18 = vpop.xlane.xlu1 %2766 }
 0xdb1   :  { %6633 = vrsqrt.f32 %v2793_v53  ;;  %v2771_v54 = vmul.f32 0.0078125, %v2767_v18  ;;  %v2778_v27 = vmul.f32 %v2774_v55, %v2774_v55  ;;  %v2873_v18 = vrot.slane %v5521_v26, %v7123_v9 }
 0xdb3   :  { %v2775_v57 = vsub.f32 %v7758_v5, %v2771_v54  ;;  %2784 = vadd.xlane.f32.xlu0 %v2778_v27 }
 0xdb5   :  { %v2779_v60 = vmul.f32 %v2775_v57, %v2775_v57 }
 0xdb7   :  { %2786 = vadd.xlane.f32.xlu1 %v2779_v60 }
 0xdba   :  { %v6632_v28 = vpop.eup %6631 }
 0xdbb   :  { %v2800_v33 = vmul.f32 %v6632_v28, %v7744_v2 }
 0xdbd   :  { %v2810_v32 = vmul.f32 %v5519_v49, %v2800_v33 }
 0xdbe   :  { %v6634_v3 = vpop.eup %6633 }
 0xdbf   :  { %v2801_v6 = vmul.f32 %v6634_v3, %v7749_v16  ;;  %v2820_v12 = vadd.f32 %v5520_v7, %v2810_v32  ;;  %v6421_v16 = vld [vmem:[#allocation5 + $0xe0] ss:$12 sps:$4 sm:$0xff]  }
 0xdc0   :  { %6088 = vmatprep.subr.bf16.mxu1 %v6421_v16 }
 0xdc1   :  { %v2811_v23 = vmul.f32 %v5519_v49, %v2801_v6  ;;  %6089 = vmatpush3.bf16.msra.mxu1 %v6421_v16 }
 0xdc2   :  { %6090 = vmatprep.subr.bf16.mxu1 %v6422_v17 }
 0xdc3   :  { %v2821_v61 = vadd.f32 %v5520_v7, %v2811_v23 }
 0xdc5   :  { %v2824_v2 = vpack.c.bf16 %v2821_v61, %v2820_v12  ;;  %6091 = vmatpush3.bf16.msra.mxu1 %v6422_v17 }
 0xdc6   :  { %6114 = vmatprep.subr.bf16.mxu1 %v6869_v37 }
 0xdc7   :  { %3038 = vmatmul.mubr.bf16.vlgmr.msra.gmra.mxu0 %v2824_v2  ;;  %6092 = vmatprep.mubr.bf16.mxu1 %v2824_v2 }
 0xdc8   :  { %3047 = vmatprep.mubr.bf16.mxu0 %v6868_v1 }
 0xe3c   :  { %v2785_v40 = vpop.xlane.xlu0 %2784 }
 0xe3d   :  { %v2790_v29 = vmul.f32 0.0078125, %v2785_v40 }
 0xe3f   :  { %v2794_v19 = vadd.f32 1e-05, %v2790_v29 }
 0xe40   :  { %v2787_v0 = vpop.xlane.xlu1 %2786 }
 0xe41   :  { %6635 = vrsqrt.f32 %v2794_v19  ;;  %v2791_v25 = vmul.f32 0.0078125, %v2787_v0 }
 0xe43   :  { %v2795_v30 = vadd.f32 1e-05, %v2791_v25 }
 0xe45   :  { %6637 = vrsqrt.f32 %v2795_v30 }
 0xe4e   :  { %v6636_v51 = vpop.eup %6635 }
 0xe4f   :  { %v2802_v62 = vmul.f32 %v6636_v51, %v2774_v55 }
 0xe51   :  { %v2812_v45 = vmul.f32 %v5519_v49, %v2802_v62 }
 0xe52   :  { %v6638_v31 = vpop.eup %6637 }
 0xe53   :  { %v2803_v39 = vmul.f32 %v6638_v31, %v2775_v57  ;;  %v2822_v4 = vadd.f32 %v5520_v7, %v2812_v45 }
 0xe55   :  { %v2813_v42 = vmul.f32 %v5519_v49, %v2803_v39 }
 0xe57   :  { %v2823_v24 = vadd.f32 %v5520_v7, %v2813_v42 }
 0xe59   :  { %v2825_v34 = vpack.c.bf16 %v2823_v24, %v2822_v4 }
 0xe5b   :  { %3048 = vmatmul.mubr.bf16.gmra.mxu0 %v2825_v34  ;;  %6093 = vmatmul.mubr.bf16.vlgmr.msra.gmra.mxu1 %v2825_v34 }
 0xe5c   :  { %6098 = vmatprep.mubr.msk.bf16.mxu0 %vm6870_vm0, %v6869_v37  ;;  %6116 = vmatprep.mubr.msk.bf16.mxu1 %vm6870_vm0, %v6869_v37 }
 0xe87   :  { %v3039_v38 = vpop.f32.mrf.mxu0 }
 0xe88   :  { %v3040_v53 = vadd.f32 %v3039_v38, %v2865_v50 }
 0xe89   :  { %v3041_v58 = vpop.f32.mrf.mxu0 }
 0xe8a   :  { %v3042_v46 = vadd.f32 %v3041_v58, %v2869_v43 }
 0xe8b   :  { %v3043_v14 = vpop.f32.mrf.mxu0 }
 0xe8c   :  { %v3044_v10 = vadd.f32 %v3043_v14, %v2865_v50 }
 0xe8d   :  { %v3045_v21 = vpop.f32.mrf.mxu0 }
 0xe8e   :  { %v3046_v41 = vadd.f32 %v3045_v21, %v2869_v43  ;;  %v3107_v55 = vpack.c.bf16 %v3044_v10, %v3040_v53 }
 0xe90   :  { %v3108_v8 = vpack.c.bf16 %v3046_v41, %v3042_v46 }
 0xe92   :  { %v3117_v20 = vsel %vm692_vm1, %v3108_v8, 0 }
 0xe93   :  { %6097 = vmatpush3.bf16.xpose.msra.mxu0 %v3117_v20 }
 0xe94   :  { %6102 = vmatprep.subr.bf16.mxu0 %v6869_v37 }
 0xe9a   :  { %6099 = vmatmul.mubr.msk.bf16.vlgmr.msra.gmra.mxu0 %vm692_vm1, %v3107_v55 }
 0xe9b   :  { %6104 = vmatprep.mubr.msk.bf16.mxu0 %vm6870_vm0, %v6869_v37 }
 0xf1b   :  { %v3049_v54 = vpop.f32.mrf.mxu0  ;;  %v6094_v27 = vpop.f32.mrf.mxu1 }
 0xf1c   :  { %v3101_v57 = vadd.f32 %v6094_v27, %v2873_v18  ;;  %v3050_v3 = vadd.f32 %v3049_v54, %v2865_v50 }
 0xf1d   :  { %v3051_v60 = vpop.f32.mrf.mxu0  ;;  %v3092_v28 = vpop.f32.mrf.mxu1 }
 0xf1e   :  { %v3052_v32 = vadd.f32 %v3051_v60, %v2869_v43  ;;  %v3093_v7 = vadd.f32 %v3092_v28, %v2873_v18 }
 0xf1f   :  { %v3053_v33 = vpop.f32.mrf.mxu0  ;;  %v6095_v49 = vpop.f32.mrf.mxu1 }
 0xf20   :  { %v3054_v44 = vadd.f32 %v3053_v33, %v2865_v50  ;;  %v3104_v6 = vadd.f32 %v6095_v49, %v2873_v18 }
 0xf21   :  { %v3055_v23 = vpop.f32.mrf.mxu0  ;;  %v3095_v11 = vpop.f32.mrf.mxu1 }
 0xf22   :  { %v7789_v12 = vpack.c.bf16 %v3054_v44, %v3050_v3  ;;  %v7791_v61 = vpack.c.bf16 %v3104_v6, %v3101_v57  ;;  %v3056_v2 = vadd.f32 %v3055_v23, %v2869_v43  ;;  %v3096_v48 = vadd.f32 %v3095_v11, %v2873_v18 }
 0xf24   :  { %v7793_v13 = vpack.c.bf16 %v3056_v2, %v3052_v32  ;;  %v7795_v59 = vpack.c.bf16 %v3096_v48, %v3093_v7 }
 0xf26   :  { %6103 = vmatpush3.bf16.msra.mxu0 %v7795_v59  ;;  %v3629_v57 = vsel %vm692_vm1, %v7793_v13, 0 }
 0xf27   :  { %6108 = vmatprep.subr.bf16.mxu0 %v6869_v37 }
 0xf5a   :  { %v3153_v16 = vpop.f32.mrf.mxu0 }
 0xf5b   :  { %v3154_v17 = vadd.f32 %v3153_v16, %v7136_v36 }
 0xf5c   :  { %v6100_v40 = vpop.f32.mrf.mxu0 }
 0xf5d   :  { %v3160_v29 = vsel %vm740_vm3, %v3154_v17, -inf }
 0xf5e   :  { %3161 = vmax.xlane.f32.xlu0 %v3160_v29  ;;  %v3156_v19 = vpop.f32.mrf.mxu0 }
 0xf5f   :  { %v3157_v0 = vadd.f32 %v3156_v19, %v7136_v36 }
 0xf60   :  { %v6101_v25 = vpop.f32.mrf.mxu0 }
 0xf61   :  { %v3163_v30 = vsel %vm740_vm3, %v3157_v0, -inf }
 0xf62   :  { %3164 = vmax.xlane.f32.xlu1 %v3163_v30 }
 0xfe7   :  { %v3162_v51 = vpop.xlane.xlu0 %3161 }
 0xfe8   :  { %v3166_v62 = vsub.f32 %v3154_v17, %v3162_v51 }
 0xfea   :  { %v3168_v31 = vmul.f32 1.442695, %v3166_v62 }
 0xfeb   :  { %v3165_v39 = vpop.xlane.xlu1 %3164 }
 0xfec   :  { %6639 = vpow2.f32 %v3168_v31  ;;  %v3167_v45 = vsub.f32 %v3157_v0, %v3165_v39 }
 0xfee   :  { %v3170_v42 = vmul.f32 1.442695, %v3167_v45 }
 0xff0   :  { %6641 = vpow2.f32 %v3170_v42 }
 0xff9   :  { %v6640_v4 = vpop.eup %6639 }
 0xffa   :  { %v3172_v24 = vsel %vm740_vm3, %v6640_v4, 0.0 }
 0xffb   :  { %3173 = vadd.xlane.f32.xlu0 %v3172_v24 }
 0xffd   :  { %v6642_v34 = vpop.eup %6641 }
 0xffe   :  { %v3175_v38 = vsel %vm740_vm3, %v6642_v34, 0.0 }
 0xfff   :  { %3176 = vadd.xlane.f32.xlu1 %v3175_v38 }
0x1010   :  { %3230 = vrot.lane.b32.xlu1 %v3107_v55, %s6872_s3 }
0x1011   :  { %3233 = vrot.lane.b32.xlu0 %v3108_v8, %s6872_s3 }
0x1014   :  { %3365 = vrot.lane.b32.xlu1 %v3108_v8, %s6862_s27 }
0x1015   :  { %3496 = vrot.lane.b32.xlu0 %v3108_v8, %s6873_s0 }
0x1018   :  { %3363 = vrot.lane.b32.xlu1 %v3107_v55, %s6862_s27 }
0x1019   :  { %3745 = vrot.lane.b32.xlu0 %v7793_v13, %s6872_s3 }
0x101c   :  { %3494 = vrot.lane.b32.xlu1 %v3107_v55, %s6873_s0 }
0x101d   :  { %3877 = vrot.lane.b32.xlu0 %v7793_v13, %s6862_s27 }
0x1020   :  { %3742 = vrot.lane.b32.xlu1 %v7789_v12, %s6872_s3 }
0x1021   :  { %4008 = vrot.lane.b32.xlu0 %v7793_v13, %s6873_s0 }
0x1024   :  { %3875 = vrot.lane.b32.xlu1 %v7789_v12, %s6862_s27 }
0x1028   :  { %4006 = vrot.lane.b32.xlu1 %v7789_v12, %s6873_s0 }
0x1084   :  { %v3174_v26 = vpop.xlane.xlu0 %3173 }
0x1085   :  { %6643 = vrcp.f32 %v3174_v26 }
0x1088   :  { %v3177_v58 = vpop.xlane.xlu1 %3176  ;;  %v3234_v41 = vpop.permute.xlu0 %3233 }
0x1089   :  { %6645 = vrcp.f32 %v3177_v58  ;;  %v3239_v20 = vsel %vm692_vm1, %v3234_v41, 0 }
0x108c   :  { %v3231_v50 = vpop.permute.xlu1 %3230  ;;  %v3497_v55 = vpop.permute.xlu0 %3496 }
0x108d   :  { %v3502_v54 = vsel %vm692_vm1, %v3497_v55, 0 }
0x1090   :  { %v3366_v10 = vpop.permute.xlu1 %3365  ;;  %v3746_v60 = vpop.permute.xlu0 %3745 }
0x1091   :  { %v3371_v53 = vsel %vm692_vm1, %v3366_v10, 0  ;;  %v3751_v28 = vsel %vm692_vm1, %v3746_v60, 0 }
0x1092   :  { %v6644_v43 = vpop.eup %6643 }
0x1093   :  { %v3180_v21 = vmul.f32 %v6644_v43, %v6640_v4 }
0x1094   :  { %v3364_v18 = vpop.permute.xlu1 %3363  ;;  %v3878_v33 = vpop.permute.xlu0 %3877 }
0x1095   :  { %v3883_v3 = vsel %vm692_vm1, %v3878_v33, 0 }
0x1096   :  { %v6646_v14 = vpop.eup %6645 }
0x1097   :  { %v3181_v46 = vmul.f32 %v6646_v14, %v6642_v34 }
0x1098   :  { %v3495_v27 = vpop.permute.xlu1 %3494  ;;  %v4009_v44 = vpop.permute.xlu0 %4008 }
0x1099   :  { %v3182_v8 = vpack.c.bf16 %v3181_v46, %v3180_v21  ;;  %v4014_v32 = vsel %vm692_vm1, %v4009_v44, 0 }
0x109b   :  { %6105 = vmatmul.mubr.msk.bf16.vlgmr.msra.gmra.mxu0 %vm740_vm3, %v3182_v8 }
0x109c   :  { %6109 = vmatpush3.bf16.xpose.msra.mxu0 %v3239_v20  ;;  %6110 = vmatprep.mubr.msk.bf16.mxu0 %vm6870_vm0, %v6869_v37  ;;  %v3743_v49 = vpop.permute.xlu1 %3742 }
0x109d   :  { %6120 = vmatprep.subr.bf16.mxu0 %v6869_v37 }
0x10a0   :  { %v3876_v6 = vpop.permute.xlu1 %3875 }
0x10a3   :  { %6111 = vmatmul.mubr.msk.bf16.vlgmr.msra.gmra.mxu0 %vm692_vm1, %v3231_v50 }
0x10a4   :  { %6121 = vmatpush3.bf16.xpose.msra.mxu0 %v3371_v53  ;;  %6122 = vmatprep.mubr.msk.bf16.mxu0 %vm6870_vm0, %v6869_v37  ;;  %v4007_v7 = vpop.permute.xlu1 %4006 }
0x10a5   :  { %6132 = vmatprep.subr.bf16.mxu0 %v6869_v37 }
0x10ab   :  { %6123 = vmatmul.mubr.msk.bf16.vlgmr.msra.gmra.mxu0 %vm692_vm1, %v3364_v18 }
0x10ac   :  { %6133 = vmatpush3.bf16.xpose.msra.mxu0 %v3502_v54  ;;  %6134 = vmatprep.mubr.msk.bf16.mxu0 %vm6870_vm0, %v6869_v37 }
0x10ad   :  { %6144 = vmatprep.subr.bf16.mxu0 %v6869_v37 }
0x10b3   :  { %6135 = vmatmul.mubr.msk.bf16.vlgmr.msra.gmra.mxu0 %vm692_vm1, %v3495_v27 }
0x10b4   :  { %6145 = vmatpush3.bf16.xpose.msra.mxu0 %v3629_v57  ;;  %6146 = vmatprep.mubr.msk.bf16.mxu0 %vm6870_vm0, %v6869_v37 }
0x10b5   :  { %6156 = vmatprep.subr.bf16.mxu0 %v6869_v37 }
0x10bb   :  { %6147 = vmatmul.mubr.msk.bf16.vlgmr.msra.gmra.mxu0 %vm692_vm1, %v7789_v12 }
0x10bc   :  { %6157 = vmatpush3.bf16.xpose.msra.mxu0 %v3751_v28  ;;  %6158 = vmatprep.mubr.msk.bf16.mxu0 %vm6870_vm0, %v6869_v37 }
0x10bd   :  { %6168 = vmatprep.subr.bf16.mxu0 %v6869_v37 }
0x10c3   :  { %6159 = vmatmul.mubr.msk.bf16.vlgmr.msra.gmra.mxu0 %vm692_vm1, %v3743_v49 }
0x10c4   :  { %6169 = vmatpush3.bf16.xpose.msra.mxu0 %v3883_v3  ;;  %6170 = vmatprep.mubr.msk.bf16.mxu0 %vm6870_vm0, %v6869_v37 }
0x10c5   :  { %6180 = vmatprep.subr.bf16.mxu0 %v6869_v37 }
0x10cb   :  { %6171 = vmatmul.mubr.msk.bf16.vlgmr.msra.gmra.mxu0 %vm692_vm1, %v3876_v6 }
0x10cc   :  { %6181 = vmatpush3.bf16.xpose.msra.mxu0 %v4014_v32  ;;  %6182 = vmatprep.mubr.msk.bf16.mxu0 %vm6870_vm0, %v6869_v37 }
0x10d3   :  { %6183 = vmatmul.mubr.msk.bf16.vlgmr.msra.gmra.mxu0 %vm692_vm1, %v4007_v7 }
0x115b   :  { %v3220_v23 = vpop.f32.mrf.mxu0 }
0x115c   :  { %3227 = vst.msk [vmem:[#allocation2] sm:$0xff] %vm692_vm1, %v3220_v23 }
0x115d   :  { %v6106_v11 = vpop.f32.mrf.mxu0 }
0x115f   :  { %v3223_v12 = vpop.f32.mrf.mxu0 }
0x1160   :  { %3228 = vst.msk [vmem:[#allocation2 + $0x8] sm:$0xff] %vm692_vm1, %v3223_v12 }
0x1161   :  { %v6107_v2 = vpop.f32.mrf.mxu0 }
0x1163   :  { %v3275_v48 = vpop.f32.mrf.mxu0 }
0x1164   :  { %v7863_v13 = vadd.f32 %v3275_v48, %v7136_v36 }
0x1165   :  { %v6112_v16 = vpop.f32.mrf.mxu0 }
0x1166   :  { %v3282_v17 = vsel %vm740_vm3, %v7863_v13, -inf }
0x1167   :  { %v3278_v40 = vpop.f32.mrf.mxu0  ;;  %3283 = vmax.xlane.f32.xlu0 %v3282_v17 }
0x1168   :  { %v7868_v29 = vadd.f32 %v3278_v40, %v7136_v36 }
0x1169   :  { %v6113_v19 = vpop.f32.mrf.mxu0 }
0x116a   :  { %v3285_v0 = vsel %vm740_vm3, %v7868_v29, -inf }
0x116b   :  { %v3407_v25 = vpop.f32.mrf.mxu0  ;;  %3286 = vmax.xlane.f32.xlu1 %v3285_v0 }
0x116c   :  { %v7873_v30 = vadd.f32 %v3407_v25, %v7136_v36 }
0x116d   :  { %v6124_v51 = vpop.f32.mrf.mxu0 }
0x116e   :  { %v3414_v62 = vsel %vm740_vm3, %v7873_v30, -inf }
0x116f   :  { %v3410_v31 = vpop.f32.mrf.mxu0  ;;  %3415 = vmax.xlane.f32.xlu0 %v3414_v62 }
0x1170   :  { %v7878_v39 = vadd.f32 %v3410_v31, %v7136_v36 }
0x1171   :  { %v6125_v45 = vpop.f32.mrf.mxu0 }
0x1172   :  { %v3417_v42 = vsel %vm740_vm3, %v7878_v39, -inf }
0x1173   :  { %v3538_v4 = vpop.f32.mrf.mxu0  ;;  %3418 = vmax.xlane.f32.xlu0 %v3417_v42 }
0x1174   :  { %v7883_v24 = vadd.f32 %v3538_v4, %v7136_v36 }
0x1175   :  { %v6136_v34 = vpop.f32.mrf.mxu0 }
0x1176   :  { %v3545_v38 = vsel %vm740_vm3, %v7883_v24, -inf }
0x1177   :  { %v3541_v26 = vpop.f32.mrf.mxu0  ;;  %3546 = vmax.xlane.f32.xlu0 %v3545_v38 }
0x1178   :  { %v7888_v58 = vadd.f32 %v3541_v26, %v7136_v36 }
0x1179   :  { %v6137_v43 = vpop.f32.mrf.mxu0 }
0x117a   :  { %v3548_v14 = vsel %vm740_vm3, %v7888_v58, -inf }
0x117b   :  { %3549 = vmax.xlane.f32.xlu1 %v3548_v14  ;;  %v3665_v21 = vpop.f32.mrf.mxu0 }
0x117c   :  { %v7893_v46 = vadd.f32 %v3665_v21, %v7136_v36 }
0x117d   :  { %v6148_v41 = vpop.f32.mrf.mxu0 }
0x117e   :  { %v3672_v8 = vsel %vm740_vm3, %v7893_v46, -inf }
0x117f   :  { %3673 = vmax.xlane.f32.xlu0 %v3672_v8  ;;  %v3668_v50 = vpop.f32.mrf.mxu0 }
0x1180   :  { %v7898_v20 = vadd.f32 %v3668_v50, %v7136_v36 }
0x1181   :  { %v6149_v10 = vpop.f32.mrf.mxu0 }
0x1182   :  { %v3675_v53 = vsel %vm740_vm3, %v7898_v20, -inf }
0x1183   :  { %3676 = vmax.xlane.f32.xlu1 %v3675_v53  ;;  %v3787_v55 = vpop.f32.mrf.mxu0 }
0x1184   :  { %v7903_v18 = vadd.f32 %v3787_v55, %v7136_v36 }
0x1185   :  { %v6160_v54 = vpop.f32.mrf.mxu0 }
0x1186   :  { %v3794_v27 = vsel %vm740_vm3, %v7903_v18, -inf }
0x1187   :  { %3795 = vmax.xlane.f32.xlu0 %v3794_v27  ;;  %v3790_v57 = vpop.f32.mrf.mxu0 }
0x1188   :  { %v7908_v60 = vadd.f32 %v3790_v57, %v7136_v36 }
0x1189   :  { %v6161_v28 = vpop.f32.mrf.mxu0 }
0x118a   :  { %v3797_v33 = vsel %vm740_vm3, %v7908_v60, -inf }
0x118b   :  { %3798 = vmax.xlane.f32.xlu1 %v3797_v33  ;;  %v3919_v49 = vpop.f32.mrf.mxu0 }
0x118c   :  { %v7913_v3 = vadd.f32 %v3919_v49, %v7136_v36 }
0x118d   :  { %v6172_v44 = vpop.f32.mrf.mxu0 }
0x118e   :  { %v3926_v6 = vsel %vm740_vm3, %v7913_v3, -inf }
0x118f   :  { %3927 = vmax.xlane.f32.xlu0 %v3926_v6  ;;  %v3922_v32 = vpop.f32.mrf.mxu0 }
0x1190   :  { %v7918_v7 = vadd.f32 %v3922_v32, %v7136_v36 }
0x1191   :  { %v6173_v23 = vpop.f32.mrf.mxu0 }
0x1192   :  { %v3929_v11 = vsel %vm740_vm3, %v7918_v7, -inf }
0x1193   :  { %3930 = vmax.xlane.f32.xlu1 %v3929_v11  ;;  %v4050_v12 = vpop.f32.mrf.mxu0 }
0x1194   :  { %v7923_v2 = vadd.f32 %v4050_v12, %v7136_v36 }
0x1195   :  { %v6184_v48 = vpop.f32.mrf.mxu0 }
0x1196   :  { %v4057_v16 = vsel %vm740_vm3, %v7923_v2, -inf }
0x1197   :  { %4058 = vmax.xlane.f32.xlu0 %v4057_v16  ;;  %v4053_v17 = vpop.f32.mrf.mxu0 }
0x1198   :  { %v7928_v40 = vadd.f32 %v4053_v17, %v7136_v36 }
0x1199   :  { %v6185_v19 = vpop.f32.mrf.mxu0 }
0x119a   :  { %v4060_v0 = vsel %vm740_vm3, %v7928_v40, -inf }
0x119b   :  { %4061 = vmax.xlane.f32.xlu1 %v4060_v0 }
0x11ac   :  { %3437 = vrot.lane.b32.xlu1 %v7795_v59, %s6862_s27 }
0x11ad   :  { %3306 = vrot.lane.b32.xlu0 %v7795_v59, %s6872_s3 }
0x11f0   :  { %v3284_v25 = vpop.xlane.xlu0 %3283 }
0x11f1   :  { %v3288_v51 = vsub.f32 %v7863_v13, %v3284_v25 }
0x11f3   :  { %v3290_v62 = vmul.f32 1.442695, %v3288_v51 }
0x11f4   :  { %v3287_v31 = vpop.xlane.xlu1 %3286 }
0x11f5   :  { %6647 = vpow2.f32 %v3290_v62  ;;  %v3289_v36 = vsub.f32 %v7868_v29, %v3287_v31 }
0x11f7   :  { %v3292_v45 = vmul.f32 1.442695, %v3289_v36 }
0x11f8   :  { %v3416_v42 = vpop.xlane.xlu0 %3415 }
0x11f9   :  { %6649 = vpow2.f32 %v3292_v45  ;;  %v3420_v4 = vsub.f32 %v7873_v30, %v3416_v42 }
0x11fb   :  { %v3422_v34 = vmul.f32 1.442695, %v3420_v4 }
0x11fc   :  { %v3419_v38 = vpop.xlane.xlu0 %3418 }
0x11fd   :  { %6651 = vpow2.f32 %v3422_v34  ;;  %v3421_v26 = vsub.f32 %v7878_v39, %v3419_v38 }
0x11ff   :  { %v3424_v43 = vmul.f32 1.442695, %v3421_v26 }
0x1200   :  { %v3547_v14 = vpop.xlane.xlu0 %3546 }
0x1201   :  { %6653 = vpow2.f32 %v3424_v43  ;;  %v3551_v13 = vsub.f32 %v7883_v24, %v3547_v14 }
0x1202   :  { %v7941_v21 = vpop.eup %6647 }
0x1203   :  { %v3553_v41 = vmul.f32 1.442695, %v3551_v13  ;;  %v3294_v29 = vsel %vm740_vm3, %v7941_v21, 0.0 }
0x1204   :  { %v3550_v8 = vpop.xlane.xlu1 %3549  ;;  %3295 = vadd.xlane.f32.xlu0 %v3294_v29 }
0x1205   :  { %6655 = vpow2.f32 %v3553_v41  ;;  %v3552_v30 = vsub.f32 %v7888_v58, %v3550_v8 }
0x1206   :  { %v7946_v50 = vpop.eup %6649 }
0x1207   :  { %v3555_v10 = vmul.f32 1.442695, %v3552_v30  ;;  %v3297_v39 = vsel %vm740_vm3, %v7946_v50, 0.0 }
0x1208   :  { %v3674_v53 = vpop.xlane.xlu0 %3673  ;;  %3298 = vadd.xlane.f32.xlu1 %v3297_v39 }
0x1209   :  { %6657 = vpow2.f32 %v3555_v10  ;;  %v3678_v24 = vsub.f32 %v7893_v46, %v3674_v53 }
0x120a   :  { %v7951_v55 = vpop.eup %6651 }
0x120b   :  { %v3680_v54 = vmul.f32 1.442695, %v3678_v24  ;;  %v3426_v27 = vsel %vm740_vm3, %v7951_v55, 0.0 }
0x120c   :  { %v3677_v57 = vpop.xlane.xlu1 %3676  ;;  %3427 = vadd.xlane.f32.xlu0 %v3426_v27 }
0x120d   :  { %6659 = vpow2.f32 %v3680_v54  ;;  %v3679_v58 = vsub.f32 %v7898_v20, %v3677_v57 }
0x120e   :  { %v7956_v28 = vpop.eup %6653 }
0x120f   :  { %v3682_v33 = vmul.f32 1.442695, %v3679_v58  ;;  %v3429_v49 = vsel %vm740_vm3, %v7956_v28, 0.0 }
0x1210   :  { %v3796_v44 = vpop.xlane.xlu0 %3795  ;;  %3430 = vadd.xlane.f32.xlu1 %v3429_v49 }
0x1211   :  { %6661 = vpow2.f32 %v3682_v33  ;;  %v3800_v46 = vsub.f32 %v7903_v18, %v3796_v44 }
0x1212   :  { %v7961_v6 = vpop.eup %6655 }
0x1213   :  { %v3802_v32 = vmul.f32 1.442695, %v3800_v46  ;;  %v3557_v23 = vsel %vm740_vm3, %v7961_v6, 0.0 }
0x1214   :  { %v3799_v11 = vpop.xlane.xlu1 %3798  ;;  %3558 = vadd.xlane.f32.xlu0 %v3557_v23 }
0x1215   :  { %6663 = vpow2.f32 %v3802_v32  ;;  %v3801_v20 = vsub.f32 %v7908_v60, %v3799_v11 }
0x1216   :  { %v7966_v12 = vpop.eup %6657 }
0x1217   :  { %v3804_v48 = vmul.f32 1.442695, %v3801_v20  ;;  %v3560_v16 = vsel %vm740_vm3, %v7966_v12, 0.0 }
0x1218   :  { %3561 = vadd.xlane.f32.xlu1 %v3560_v16  ;;  %v3928_v19 = vpop.xlane.xlu0 %3927 }
0x1219   :  { %6665 = vpow2.f32 %v3804_v48  ;;  %v3932_v30 = vsub.f32 %v7913_v3, %v3928_v19 }
0x121a   :  { %v7970_v18 = vpop.eup %6659 }
0x121b   :  { %v3684_v17 = vsel %vm740_vm3, %v7970_v18, 0.0  ;;  %v3934_v10 = vmul.f32 1.442695, %v3932_v30 }
0x121c   :  { %v3931_v0 = vpop.xlane.xlu1 %3930  ;;  %3685 = vadd.xlane.f32.xlu0 %v3684_v17 }
0x121d   :  { %v3933_v25 = vsub.f32 %v7918_v7, %v3931_v0 }
0x121e   :  { %v7975_v51 = vpop.eup %6661 }
0x121f   :  { %v3936_v60 = vmul.f32 1.442695, %v3933_v25  ;;  %v3687_v62 = vsel %vm740_vm3, %v7975_v51, 0.0 }
0x1220   :  { %v4059_v31 = vpop.xlane.xlu0 %4058  ;;  %3688 = vadd.xlane.f32.xlu1 %v3687_v62 }
0x1221   :  { %6667 = vpow2.f32 %v3936_v60  ;;  %v4063_v36 = vsub.f32 %v7923_v2, %v4059_v31 }
0x1222   :  { %v7980_v45 = vpop.eup %6663 }
0x1223   :  { %v4065_v42 = vmul.f32 1.442695, %v4063_v36  ;;  %v3806_v4 = vsel %vm740_vm3, %v7980_v45, 0.0 }
0x1224   :  { %v3307_v34 = vpop.permute.xlu0 %3306  ;;  %3807 = vadd.xlane.f32.xlu1 %v3806_v4  ;;  %v4062_v7 = vpop.xlane.xlu1 %4061 }
0x1225   :  { %6669 = vpow2.f32 %v4065_v42  ;;  %v4064_v38 = vsub.f32 %v7928_v40, %v4062_v7  ;;  %6115 = vmatpush3.bf16.msra.mxu1 %v3307_v34 }
0x1226   :  { %v7985_v26 = vpop.eup %6665  ;;  %6126 = vmatprep.subr.bf16.mxu1 %v6869_v37 }
0x1227   :  { %v4067_v43 = vmul.f32 1.442695, %v4064_v38  ;;  %v3809_v2 = vsel %vm740_vm3, %v7985_v26, 0.0 }
0x1228   :  { %3810 = vadd.xlane.f32.xlu1 %v3809_v2  ;;  %v3438_v53 = vpop.permute.xlu1 %3437 }
0x1229   :  { %6671 = vpow2.f32 %v4067_v43 }
0x122a   :  { %6673 = vpow2.f32 %v3934_v10 }
0x122e   :  { %v7990_v14 = vpop.eup %6667 }
0x122f   :  { %v3941_v13 = vsel %vm740_vm3, %v7990_v14, 0.0 }
0x1230   :  { %3942 = vadd.xlane.f32.xlu1 %v3941_v13 }
0x1232   :  { %v7994_v41 = vpop.eup %6669  ;;  %3568 = vrot.lane.b32.xlu0 %v7795_v59, %s6873_s0 }
0x1233   :  { %v4069_v40 = vsel %vm740_vm3, %v7994_v41, 0.0 }
0x1234   :  { %4070 = vadd.xlane.f32.xlu1 %v4069_v40 }
0x1236   :  { %v8000_v29 = vpop.eup %6671 }
0x1237   :  { %v4072_v8 = vsel %vm740_vm3, %v8000_v29, 0.0  ;;  %v8007_v39 = vpop.eup %6673 }
0x1238   :  { %4073 = vadd.xlane.f32.xlu1 %v4072_v8  ;;  %v3938_v59 = vsel %vm740_vm3, %v8007_v39, 0.0 }
0x1249   :  { %3818 = vrot.lane.b32.xlu1 %v7791_v61, %s6872_s3 }
0x1251   :  { %3939 = vadd.xlane.f32.xlu0 %v3938_v59 }
0x1267   :  { %3949 = vrot.lane.b32.xlu0 %v7791_v61, %s6862_s27 }
0x126b   :  { %4080 = vrot.lane.b32.xlu0 %v7791_v61, %s6873_s0 }
0x128d   :  { %v3296_v3 = vpop.xlane.xlu0 %3295 }
0x128e   :  { %6675 = vrcp.f32 %v3296_v3 }
0x1291   :  { %v3299_v24 = vpop.xlane.xlu1 %3298 }
0x1292   :  { %6677 = vrcp.f32 %v3299_v24 }
0x1295   :  { %v3428_v54 = vpop.xlane.xlu0 %3427 }
0x1296   :  { %6679 = vrcp.f32 %v3428_v54 }
0x1299   :  { %v3431_v27 = vpop.xlane.xlu1 %3430 }
0x129a   :  { %6681 = vrcp.f32 %v3431_v27 }
0x129b   :  { %v6676_v57 = vpop.eup %6675 }
0x129c   :  { %v3302_v49 = vmul.f32 %v6676_v57, %v7941_v21 }
0x129d   :  { %v3559_v58 = vpop.xlane.xlu0 %3558 }
0x129e   :  { %6683 = vrcp.f32 %v3559_v58 }
0x129f   :  { %v6678_v33 = vpop.eup %6677 }
0x12a0   :  { %v3303_v44 = vmul.f32 %v6678_v33, %v7946_v50 }
0x12a1   :  { %v3562_v46 = vpop.xlane.xlu1 %3561 }
0x12a2   :  { %6685 = vrcp.f32 %v3562_v46  ;;  %v3304_v32 = vpack.c.bf16 %v3303_v44, %v3302_v49 }
0x12a3   :  { %v6680_v23 = vpop.eup %6679 }
0x12a4   :  { %6117 = vmatmul.mubr.msk.bf16.vlgmr.msra.gmra.mxu1 %vm740_vm3, %v3304_v32  ;;  %v3434_v48 = vmul.f32 %v6680_v23, %v7951_v55 }
0x12a5   :  { %6127 = vmatpush3.bf16.msra.mxu1 %v3438_v53  ;;  %v3686_v11 = vpop.xlane.xlu0 %3685  ;;  %6128 = vmatprep.mubr.msk.bf16.mxu1 %vm6870_vm0, %v6869_v37 }
0x12a6   :  { %6138 = vmatprep.subr.bf16.mxu1 %v6869_v37  ;;  %6687 = vrcp.f32 %v3686_v11 }
0x12a7   :  { %v6682_v20 = vpop.eup %6681 }
0x12a8   :  { %v3435_v21 = vmul.f32 %v6682_v20, %v7956_v28 }
0x12a9   :  { %v3689_v50 = vpop.xlane.xlu1 %3688  ;;  %v3569_v17 = vpop.permute.xlu0 %3568 }
0x12aa   :  { %6689 = vrcp.f32 %v3689_v50  ;;  %v3436_v16 = vpack.c.bf16 %v3435_v21, %v3434_v48  ;;  %v6423_v48 = vld [vmem:[#allocation7 + $0x78] sm:$0xff]   ;;  %v6424_v21 = vld [vmem:[#allocation7 + $0x70] sm:$0xff]  }
0x12ab   :  { %v6684_v19 = vpop.eup %6683  ;;  %6192 = vmatprep.subr.bf16.mxu0 %v6423_v48 }
0x12ac   :  { %6129 = vmatmul.mubr.msk.bf16.vlgmr.msra.gmra.mxu1 %vm740_vm3, %v3436_v16  ;;  %v3565_v60 = vmul.f32 %v6684_v19, %v7961_v6  ;;  %6193 = vmatpush3.bf16.msra.mxu0 %v6423_v48  ;;  %v6425_v16 = vld [vmem:[#allocation7 + $0x68] sm:$0xff]  }
0x12ad   :  { %6139 = vmatpush3.bf16.msra.mxu1 %v3569_v17  ;;  %v3808_v0 = vpop.xlane.xlu1 %3807  ;;  %6140 = vmatprep.mubr.msk.bf16.mxu1 %vm6870_vm0, %v6869_v37 }
0x12ae   :  { %6150 = vmatprep.subr.bf16.mxu1 %v6869_v37  ;;  %6194 = vmatprep.subr.bf16.mxu0 %v6424_v21 }
0x12af   :  { %v6686_v25 = vpop.eup %6685 }
0x12b0   :  { %v3566_v55 = vmul.f32 %v6686_v25, %v7966_v12  ;;  %6195 = vmatpush3.bf16.msra.mxu0 %v6424_v21 }
0x12b1   :  { %v3811_v28 = vpop.xlane.xlu1 %3810  ;;  %6196 = vmatprep.subr.bf16.mxu0 %v6425_v16 }
0x12b2   :  { %v3567_v62 = vpack.c.bf16 %v3566_v55, %v3565_v60  ;;  %6691 = vrcp.f32 %v3811_v28  ;;  %v6426_v60 = vld [vmem:[#allocation7 + $0x60] sm:$0xff]   ;;  %v6427_v55 = vld [vmem:[#allocation7 + $0x58] sm:$0xff]   ;;  %v6428_v28 = vld [vmem:[#allocation7 + $0x50] sm:$0xff]  }
0x12b3   :  { %v6688_v31 = vpop.eup %6687  ;;  %6693 = vrcp.f32 %v3808_v0 }
0x12b4   :  { %6141 = vmatmul.mubr.msk.bf16.vlgmr.msra.gmra.mxu1 %vm740_vm3, %v3567_v62  ;;  %v3692_v42 = vmul.f32 %v6688_v31, %v7970_v18  ;;  %6197 = vmatpush3.bf16.msra.mxu0 %v6425_v16  ;;  %v6429_v31 = vld [vmem:[#allocation7 + $0x48] sm:$0xff]  }
0x12b5   :  { %6151 = vmatpush3.bf16.msra.mxu1 %v7791_v61  ;;  %6152 = vmatprep.mubr.msk.bf16.mxu1 %vm6870_vm0, %v6869_v37 }
0x12b6   :  { %6162 = vmatprep.subr.bf16.mxu1 %v6869_v37  ;;  %6198 = vmatprep.subr.bf16.mxu0 %v6426_v60 }
0x12b7   :  { %v6690_v36 = vpop.eup %6689 }
0x12b8   :  { %v3693_v6 = vmul.f32 %v6690_v36, %v7975_v51  ;;  %6199 = vmatpush3.bf16.msra.mxu0 %v6426_v60  ;;  %v6430_v36 = vld [vmem:[#allocation7 + $0x40] sm:$0xff]  }
0x12b9   :  { %v3943_v12 = vpop.xlane.xlu1 %3942  ;;  %6200 = vmatprep.subr.bf16.mxu0 %v6427_v55 }
0x12ba   :  { %v3694_v4 = vpack.c.bf16 %v3693_v6, %v3692_v42  ;;  %6695 = vrcp.f32 %v3943_v12 }
0x12bc   :  { %6153 = vmatmul.mubr.msk.bf16.vlgmr.msra.gmra.mxu1 %vm740_vm3, %v3694_v4  ;;  %6201 = vmatpush3.bf16.msra.mxu0 %v6427_v55 }
0x12bd   :  { %v4071_v34 = vpop.xlane.xlu1 %4070  ;;  %6164 = vmatprep.mubr.msk.bf16.mxu1 %vm6870_vm0, %v6869_v37  ;;  %6202 = vmatprep.subr.bf16.mxu0 %v6428_v28 }
0x12bf   :  { %v6692_v7 = vpop.eup %6691 }
0x12c0   :  { %v6694_v38 = vpop.eup %6693  ;;  %v3815_v43 = vmul.f32 %v6692_v7, %v7985_v26  ;;  %6203 = vmatpush3.bf16.msra.mxu0 %v6428_v28 }
0x12c1   :  { %v4074_v61 = vpop.xlane.xlu1 %4073  ;;  %v3814_v13 = vmul.f32 %v6694_v38, %v7980_v45  ;;  %6204 = vmatprep.subr.bf16.mxu0 %v6429_v31 }
0x12c3   :  { %v3816_v18 = vpack.c.bf16 %v3815_v43, %v3814_v13 }
0x12c4   :  { %6205 = vmatpush3.bf16.msra.mxu0 %v6429_v31 }
0x12c5   :  { %v3819_v2 = vpop.permute.xlu1 %3818  ;;  %6206 = vmatprep.subr.bf16.mxu0 %v6430_v36 }
0x12c6   :  { %6163 = vmatpush3.bf16.msra.mxu1 %v3819_v2 }
0x12c7   :  { %6174 = vmatprep.subr.bf16.mxu1 %v6869_v37  ;;  %v6696_v26 = vpop.eup %6695 }
0x12c8   :  { %v3947_v30 = vmul.f32 %v6696_v26, %v7990_v14  ;;  %6207 = vmatpush3.bf16.msra.mxu0 %v6430_v36 }
0x12c9   :  { %6165 = vmatmul.mubr.msk.bf16.vlgmr.msra.gmra.mxu1 %vm740_vm3, %v3816_v18 }
0x12ca   :  { %6176 = vmatprep.mubr.msk.bf16.mxu1 %vm6870_vm0, %v6869_v37 }
0x12da   :  { %v3940_v51 = vpop.xlane.xlu0 %3939 }
0x12db   :  { %6697 = vrcp.f32 %v3940_v51 }
0x12dc   :  { %6699 = vrcp.f32 %v4074_v61 }
0x12dd   :  { %6701 = vrcp.f32 %v4071_v34 }
0x12de   :  { %v3950_v40 = vpop.permute.xlu0 %3949 }
0x12df   :  { %6175 = vmatpush3.bf16.msra.mxu1 %v3950_v40 }
0x12e0   :  { %6186 = vmatprep.subr.bf16.mxu1 %v6869_v37 }
0x12e2   :  { %v4081_v53 = vpop.permute.xlu0 %4080 }
0x12e8   :  { %v6698_v45 = vpop.eup %6697 }
0x12e9   :  { %v3946_v8 = vmul.f32 %v6698_v45, %v8007_v39  ;;  %v6700_v59 = vpop.eup %6699 }
0x12ea   :  { %v6702_v3 = vpop.eup %6701  ;;  %v4078_v24 = vmul.f32 %v6700_v59, %v8000_v29 }
0x12eb   :  { %v3948_v10 = vpack.c.bf16 %v3947_v30, %v3946_v8  ;;  %v4077_v54 = vmul.f32 %v6702_v3, %v7994_v41 }
0x12ed   :  { %6177 = vmatmul.mubr.msk.bf16.vlgmr.msra.gmra.mxu1 %vm740_vm3, %v3948_v10  ;;  %v4079_v27 = vpack.c.bf16 %v4078_v24, %v4077_v54 }
0x12ee   :  { %6187 = vmatpush3.bf16.msra.mxu1 %v4081_v53  ;;  %6188 = vmatprep.mubr.msk.bf16.mxu1 %vm6870_vm0, %v6869_v37 }
0x12f5   :  { %6189 = vmatmul.mubr.msk.bf16.vlgmr.msra.gmra.mxu1 %vm740_vm3, %v4079_v27 }
0x12f6   :  { %4587 = vmatprep.mubr.bf16.mxu1 %v6868_v1 }
0x1364   :  { %v3346_v14 = vpop.f32.mrf.mxu1 }
0x1365   :  { %3355 = vrot.lane.b32.xlu0 %v3346_v14, %s6873_s0 }
0x1366   :  { %v6118_v39 = vpop.f32.mrf.mxu1 }
0x1367   :  { %v5563_v39 = vld [vmem:[%s8430_s8 + $0x1] ss:$0 sm:$0xff] }
0x1368   :  { %v3349_v57 = vpop.f32.mrf.mxu1 }
0x1369   :  { %3357 = vrot.lane.b32.xlu1 %v3349_v57, %s6873_s0 }
0x136a   :  { %v6119_v58 = vpop.f32.mrf.mxu1 }
0x136c   :  { %v3477_v33 = vpop.f32.mrf.mxu1 }
0x136d   :  { %3486 = vrot.lane.b32.xlu0 %v3477_v33, %s6862_s27 }
0x136e   :  { %v6130_v37 = vpop.f32.mrf.mxu1 }
0x1370   :  { %v3480_v29 = vpop.f32.mrf.mxu1 }
0x1371   :  { %3488 = vrot.lane.b32.xlu1 %v3480_v29, %s6862_s27 }
0x1372   :  { %v6131_v41 = vpop.f32.mrf.mxu1 }
0x1374   :  { %v3608_v49 = vpop.f32.mrf.mxu1 }
0x1375   :  { %3617 = vrot.lane.b32.xlu0 %v3608_v49, %s6872_s3 }
0x1376   :  { %v6142_v44 = vpop.f32.mrf.mxu1 }
0x1378   :  { %v3611_v46 = vpop.f32.mrf.mxu1 }
0x1379   :  { %3619 = vrot.lane.b32.xlu1 %v3611_v46, %s6872_s3 }
0x137a   :  { %v6143_v32 = vpop.f32.mrf.mxu1 }
0x137c   :  { %v3732_v23 = vpop.f32.mrf.mxu1 }
0x137d   :  { %3739 = vst.msk [vmem:[#allocation2 + $0x10] sm:$0xff] %vm692_vm1, %v3732_v23 }
0x137e   :  { %v6154_v11 = vpop.f32.mrf.mxu1 }
0x137f   :  { %v6436_v11 = vld [vmem:[%s8433_s11 + $0x1ec] ss:$16 sps:$4 sm:$0xff]  }
0x1380   :  { %v3735_v20 = vpop.f32.mrf.mxu1  ;;  %4608 = vmatprep.subr.bf16.mxu0 %v6436_v11 }
0x1381   :  { %3740 = vst.msk [vmem:[#allocation2 + $0x18] sm:$0xff] %vm692_vm1, %v3735_v20 }
0x1382   :  { %v6155_v50 = vpop.f32.mrf.mxu1 }
0x1389   :  { %v3858_v17 = vpop.f32.mrf.mxu1 }
0x138a   :  { %3867 = vrot.lane.b32.xlu0 %v3858_v17, %s6873_s0 }
0x138b   :  { %v6166_v19 = vpop.f32.mrf.mxu1 }
0x138d   :  { %v3861_v0 = vpop.f32.mrf.mxu1 }
0x138e   :  { %3869 = vrot.lane.b32.xlu1 %v3861_v0, %s6873_s0 }
0x138f   :  { %v6167_v25 = vpop.f32.mrf.mxu1 }
0x13ad   :  { %v3989_v62 = vpop.f32.mrf.mxu1 }
0x13ae   :  { %3998 = vrot.lane.b32.xlu0 %v3989_v62, %s6862_s27 }
0x13af   :  { %v6178_v42 = vpop.f32.mrf.mxu1 }
0x13b0   :  { %v6439_v42 = vld [vmem:[%s8433_s11 + $0x1c4] ss:$16 sps:$4 sm:$0xff]  }
0x13b1   :  { %v3992_v6 = vpop.f32.mrf.mxu1 }
0x13b2   :  { %4000 = vrot.lane.b32.xlu1 %v3992_v6, %s6862_s27  ;;  %v6442_v6 = vld [vmem:[%s8433_s11 + $0x1cc] ss:$16 sps:$4 sm:$0xff]  }
0x13b3   :  { %v6179_v12 = vpop.f32.mrf.mxu1 }
0x13b4   :  { %v6437_v12 = vld [vmem:[%s8433_s11 + $0x1c0] ss:$16 sps:$4 sm:$0xff]  }
0x13b5   :  { %v4120_v4 = vpop.f32.mrf.mxu1 }
0x13b6   :  { %4129 = vrot.lane.b32.xlu0 %v4120_v4, %s6872_s3  ;;  %v6440_v4 = vld [vmem:[%s8433_s11 + $0x1c8] ss:$16 sps:$4 sm:$0xff]  }
0x13b7   :  { %v6190_v34 = vpop.f32.mrf.mxu1 }
0x13b8   :  { %v6445_v34 = vld [vmem:[%s8433_s11 + $0x1a4] ss:$16 sps:$4 sm:$0xff]  }
0x13b9   :  { %v4123_v7 = vpop.f32.mrf.mxu1 }
0x13ba   :  { %4131 = vrot.lane.b32.xlu1 %v4123_v7, %s6872_s3  ;;  %v6448_v7 = vld [vmem:[%s8433_s11 + $0x1ac] ss:$16 sps:$4 sm:$0xff]  }
0x13bb   :  { %v6191_v61 = vpop.f32.mrf.mxu1 }
0x13bc   :  { %v6443_v61 = vld [vmem:[%s8433_s11 + $0x1a0] ss:$16 sps:$4 sm:$0xff]  }
0x13d7   :  { %v3356_v38 = vpop.permute.xlu0 %3355 }
0x13d8   :  { %3361 = vst.msk [vmem:[#allocation2] sm:$0xff] %vm942_vm4, %v3356_v38  ;;  %v6446_v38 = vld [vmem:[%s8433_s11 + $0x1a8] ss:$16 sps:$4 sm:$0xff]  }
0x13db   :  { %v3358_v43 = vpop.permute.xlu1 %3357 }
0x13dc   :  { %3362 = vst.msk [vmem:[#allocation2 + $0x8] sm:$0xff] %vm942_vm4, %v3358_v43  ;;  %v6451_v43 = vld [vmem:[%s8433_s11 + $0x184] ss:$16 sps:$4 sm:$0xff]  }
0x13df   :  { %v3487_v2 = vpop.permute.xlu0 %3486 }
0x13e0   :  { %3492 = vst.msk [vmem:[#allocation2] sm:$0xff] %vm1074_vm5, %v3487_v2  ;;  %v6454_v2 = vld [vmem:[%s8433_s11 + $0x18c] ss:$16 sps:$4 sm:$0xff]  }
0x13e3   :  { %v3489_v13 = vpop.permute.xlu1 %3488 }
0x13e4   :  { %3493 = vst.msk [vmem:[#allocation2 + $0x8] sm:$0xff] %vm1074_vm5, %v3489_v13  ;;  %v6449_v13 = vld [vmem:[%s8433_s11 + $0x180] ss:$16 sps:$4 sm:$0xff]  }
0x13e7   :  { %v3618_v18 = vpop.permute.xlu0 %3617 }
0x13e8   :  { %3623 = vst.msk [vmem:[#allocation2] sm:$0xff] %vm1206_vm6, %v3618_v18  ;;  %v6452_v18 = vld [vmem:[%s8433_s11 + $0x188] ss:$16 sps:$4 sm:$0xff]  }
0x13eb   :  { %v3620_v51 = vpop.permute.xlu1 %3619 }
0x13ec   :  { %3624 = vst.msk [vmem:[#allocation2 + $0x8] sm:$0xff] %vm1206_vm6, %v3620_v51  ;;  %v6455_v51 = vld [vmem:[%s8433_s11 + $0x160] ss:$16 sps:$4 sm:$0xff]  }
0x13ef   :  { %v4137_v40 = vld [vmem:[#allocation2] sm:$0xff] }
0x13f3   :  { %v4138_v26 = vld [vmem:[#allocation2 + $0x8] sm:$0xff] }
0x13f4   :  { %v4141_v45 = vpack.c.bf16 %v4138_v26, %v4137_v40  ;;  %v6457_v40 = vld [vmem:[%s8433_s11 + $0x164] ss:$16 sps:$4 sm:$0xff]   ;;  %v6458_v26 = vld [vmem:[%s8433_s11 + $0x168] ss:$16 sps:$4 sm:$0xff]  }
0x13f6   :  { %6208 = vmatprep.mubr.bf16.mxu0 %v4141_v45  ;;  %v6460_v45 = vld [vmem:[%s8433_s11 + $0x16c] ss:$16 sps:$4 sm:$0xff]  }
0x13fc   :  { %v3868_v8 = vpop.permute.xlu0 %3867 }
0x13fd   :  { %3873 = vst.msk [vmem:[#allocation2 + $0x10] sm:$0xff] %vm942_vm4, %v3868_v8  ;;  %v6463_v8 = vld [vmem:[%s8433_s11 + $0x144] ss:$16 sps:$4 sm:$0xff]  }
0x1400   :  { %v3870_v30 = vpop.permute.xlu1 %3869 }
0x1401   :  { %3874 = vst.msk [vmem:[#allocation2 + $0x18] sm:$0xff] %vm942_vm4, %v3870_v30  ;;  %v6466_v30 = vld [vmem:[%s8433_s11 + $0x14c] ss:$16 sps:$4 sm:$0xff]  }
0x1420   :  { %v3999_v10 = vpop.permute.xlu0 %3998 }
0x1421   :  { %4004 = vst.msk [vmem:[#allocation2 + $0x10] sm:$0xff] %vm1074_vm5, %v3999_v10  ;;  %v6461_v10 = vld [vmem:[%s8433_s11 + $0x140] ss:$16 sps:$4 sm:$0xff]  }
0x1424   :  { %v4001_v59 = vpop.permute.xlu1 %4000 }
0x1425   :  { %4005 = vst.msk [vmem:[#allocation2 + $0x18] sm:$0xff] %vm1074_vm5, %v4001_v59  ;;  %v6464_v59 = vld [vmem:[%s8433_s11 + $0x148] ss:$16 sps:$4 sm:$0xff]  }
0x1428   :  { %v4130_v53 = vpop.permute.xlu0 %4129 }
0x1429   :  { %4135 = vst.msk [vmem:[#allocation2 + $0x10] sm:$0xff] %vm1206_vm6, %v4130_v53  ;;  %v6469_v53 = vld [vmem:[%s8433_s11 + $0x124] ss:$16 sps:$4 sm:$0xff]  }
0x142c   :  { %v4132_v3 = vpop.permute.xlu1 %4131 }
0x142d   :  { %4136 = vst.msk [vmem:[#allocation2 + $0x18] sm:$0xff] %vm1206_vm6, %v4132_v3  ;;  %v6472_v3 = vld [vmem:[%s8433_s11 + $0x12c] ss:$16 sps:$4 sm:$0xff]  }
0x1430   :  { %v4139_v24 = vld [vmem:[#allocation2 + $0x10] sm:$0xff] }
0x1434   :  { %v4140_v54 = vld [vmem:[#allocation2 + $0x18] sm:$0xff] }
0x1435   :  { %v4142_v27 = vpack.c.bf16 %v4140_v54, %v4139_v24  ;;  %v6467_v24 = vld [vmem:[%s8433_s11 + $0x120] ss:$16 sps:$4 sm:$0xff]   ;;  %v6470_v54 = vld [vmem:[%s8433_s11 + $0x128] ss:$16 sps:$4 sm:$0xff]  }
0x1437   :  { %6209 = vmatmul.mubr.bf16.vlgmr.msra.gmra.mxu0 %v4142_v27  ;;  %v6475_v27 = vld [vmem:[%s8433_s11 + $0x104] ss:$16 sps:$4 sm:$0xff]  }
0x1438   :  { %4640 = vmatprep.mubr.bf16.mxu0 %v6868_v1 }
0x14f7   :  { %v6210_v14 = vpop.f32.mrf.mxu0 }
0x14f8   :  { %v4259_v37 = vadd.f32 %v6210_v14, %v5563_v39  ;;  %v6478_v14 = vld [vmem:[%s8433_s11 + $0x10c] ss:$16 sps:$4 sm:$0xff]  }
0x14f9   :  { %v4250_v57 = vpop.f32.mrf.mxu0 }
0x14fa   :  { %v4251_v58 = vadd.f32 %v5563_v39, %v4250_v57  ;;  %v8090_v44 = vadd.f32 %v4259_v37, %v7754_v35  ;;  %v6433_v35 = vld [vmem:[%s8433_s11 + $0x1e4] ss:$16 sps:$4 sm:$0xff]   ;;  %v6476_v57 = vld [vmem:[%s8433_s11 + $0x108] ss:$16 sps:$4 sm:$0xff]  }
0x14fb   :  { %v6211_v33 = vpop.f32.mrf.mxu0  ;;  %4555 = vmatprep.subr.bf16.mxu1 %v6433_v35 }
0x14fc   :  { %v8086_v29 = vadd.f32 %v4251_v58, %v7736_v47  ;;  %v4262_v46 = vadd.f32 %v6211_v33, %v5563_v39  ;;  %v6431_v47 = vld [vmem:[%s8433_s11 + $0x1e0] ss:$16 sps:$4 sm:$0xff]  }
0x14fd   :  { %v4253_v41 = vpop.f32.mrf.mxu0  ;;  %4556 = vmatpush1.bf16.msra.mxu1 %v6431_v47 }
0x14fe   :  { %v4254_v49 = vadd.f32 %v5563_v39, %v4253_v41  ;;  %4273 = vadd.xlane.f32.xlu0 %v8086_v29  ;;  %v8098_v23 = vadd.f32 %v4262_v46, %v7758_v5  ;;  %4557 = vmatprep.subr.bf16.mxu1 %v6439_v42  ;;  %v6473_v39 = vld [vmem:[%s8433_s11 + $0x100] ss:$16 sps:$4 sm:$0xff]  }
0x1500   :  { %v8093_v32 = vadd.f32 %v4254_v49, %v7740_v22  ;;  %v6434_v22 = vld [vmem:[%s8433_s11 + $0x1e8] ss:$16 sps:$4 sm:$0xff]  }
0x1501   :  { %4609 = vmatpush1.bf16.msra.mxu0 %v6434_v22  ;;  %4558 = vmatpush1.bf16.msra.mxu1 %v6437_v12 }
0x1502   :  { %4275 = vadd.xlane.f32.xlu1 %v8093_v32  ;;  %4277 = vadd.xlane.f32.xlu0 %v8090_v44 }
0x1503   :  { %4610 = vmatprep.subr.bf16.mxu0 %v6442_v6  ;;  %4559 = vmatprep.subr.bf16.mxu1 %v6445_v34 }
0x1505   :  { %4611 = vmatpush1.bf16.msra.mxu0 %v6440_v4  ;;  %4560 = vmatpush1.bf16.msra.mxu1 %v6443_v61 }
0x1506   :  { %4279 = vadd.xlane.f32.xlu0 %v8098_v23  ;;  %4612 = vmatprep.subr.bf16.mxu0 %v6448_v7 }
0x1507   :  { %4561 = vmatprep.subr.bf16.mxu1 %v6451_v43  ;;  %v6479_v43 = vld [vmem:[#allocation8 + $0x178] sm:$0xff]  }
0x1509   :  { %4613 = vmatpush1.bf16.msra.mxu0 %v6446_v38  ;;  %4562 = vmatpush1.bf16.msra.mxu1 %v6449_v13  ;;  %v6481_v13 = vld [vmem:[#allocation8 + $0x138] sm:$0xff]  }
0x150a   :  { %4614 = vmatprep.subr.bf16.mxu0 %v6454_v2  ;;  %4563 = vmatprep.subr.bf16.mxu1 %v6457_v40  ;;  %v6480_v2 = vld [vmem:[#allocation8 + $0x1f8] sm:$0xff]   ;;  %v6486_v40 = vld [vmem:[#allocation8 + $0x1b0] sm:$0xff]  }
0x150d   :  { %4615 = vmatpush1.bf16.msra.mxu0 %v6452_v18  ;;  %4564 = vmatpush1.bf16.msra.mxu1 %v6455_v51  ;;  %v6484_v18 = vld [vmem:[#allocation8 + $0x1f0] sm:$0xff]  }
0x150e   :  { %4616 = vmatprep.subr.bf16.mxu0 %v6460_v45  ;;  %4565 = vmatprep.subr.bf16.mxu1 %v6463_v8  ;;  %v6485_v51 = vld [vmem:[#allocation8 + $0x130] sm:$0xff]   ;;  %v6489_v45 = vld [vmem:[#allocation8 + $0x128] sm:$0xff]  }
0x150f   :  { %v6490_v8 = vld [vmem:[#allocation8 + $0x1a8] sm:$0xff]  }
0x1511   :  { %4617 = vmatpush1.bf16.msra.mxu0 %v6458_v26  ;;  %4566 = vmatpush1.bf16.msra.mxu1 %v6461_v10  ;;  %v6488_v26 = vld [vmem:[#allocation8 + $0x1e8] sm:$0xff]   ;;  %v6492_v10 = vld [vmem:[#allocation8 + $0x1e0] sm:$0xff]  }
0x1512   :  { %4618 = vmatprep.subr.bf16.mxu0 %v6466_v30  ;;  %4567 = vmatprep.subr.bf16.mxu1 %v6469_v53  ;;  %v6491_v30 = vld [vmem:[#allocation8 + $0x160] sm:$0xff]  }
0x1513   :  { %v6494_v53 = vld [vmem:[#allocation8 + $0x1a0] sm:$0xff]  }
0x1515   :  { %4619 = vmatpush1.bf16.msra.mxu0 %v6464_v59  ;;  %4568 = vmatpush1.bf16.msra.mxu1 %v6467_v24  ;;  %v6493_v59 = vld [vmem:[#allocation8 + $0x120] sm:$0xff]   ;;  %v6496_v24 = vld [vmem:[#allocation8 + $0x1d8] sm:$0xff]  }
0x1516   :  { %4620 = vmatprep.subr.bf16.mxu0 %v6472_v3  ;;  %4569 = vmatprep.subr.bf16.mxu1 %v6475_v27  ;;  %v6495_v3 = vld [vmem:[#allocation8 + $0x158] sm:$0xff]  }
0x1517   :  { %v6498_v27 = vld [vmem:[#allocation8 + $0x198] sm:$0xff]  }
0x1519   :  { %4621 = vmatpush1.bf16.msra.mxu0 %v6470_v54  ;;  %4570 = vmatpush1.bf16.msra.mxu1 %v6473_v39  ;;  %v6497_v54 = vld [vmem:[#allocation8 + $0x118] sm:$0xff]   ;;  %v6500_v39 = vld [vmem:[#allocation8 + $0x1d0] sm:$0xff]  }
0x151a   :  { %4622 = vmatprep.subr.bf16.mxu0 %v6478_v14  ;;  %5874 = vmatprep.subr.bf16.mxu1 %v6479_v43  ;;  %v6499_v14 = vld [vmem:[#allocation8 + $0x150] sm:$0xff]  }
0x151d   :  { %4623 = vmatpush1.bf16.msra.mxu0 %v6476_v57  ;;  %v6501_v57 = vld [vmem:[#allocation8 + $0x110] sm:$0xff]  }
0x151e   :  { %5902 = vmatprep.subr.bf16.mxu0 %v6480_v2 }
0x1587   :  { %v4274_v5 = vpop.xlane.xlu0 %4273 }
0x1588   :  { %v4281_v20 = vmul.f32 0.0078125, %v4274_v5 }
0x158a   :  { %v8114_v48 = vsub.f32 %v8086_v29, %v4281_v20 }
0x158b   :  { %v4276_v21 = vpop.xlane.xlu1 %4275  ;;  %v4278_v50 = vpop.xlane.xlu0 %4277 }
0x158c   :  { %v4282_v16 = vmul.f32 0.0078125, %v4276_v21  ;;  %v4283_v17 = vmul.f32 0.0078125, %v4278_v50  ;;  %v4289_v19 = vmul.f32 %v8114_v48, %v8114_v48 }
0x158e   :  { %v8119_v0 = vsub.f32 %v8093_v32, %v4282_v16  ;;  %v8122_v25 = vsub.f32 %v8090_v44, %v4283_v17  ;;  %4293 = vadd.xlane.f32.xlu0 %v4289_v19  ;;  %v5574_v16 = vld [vmem:[%s8431_s9 + $0x1] ss:$0 sm:$0xff] }
0x158f   :  { %v4280_v60 = vpop.xlane.xlu0 %4279 }
0x1590   :  { %v4284_v55 = vmul.f32 0.0078125, %v4280_v60  ;;  %v4290_v28 = vmul.f32 %v8119_v0, %v8119_v0  ;;  %v4291_v62 = vmul.f32 %v8122_v25, %v8122_v25 }
0x1592   :  { %v8129_v31 = vsub.f32 %v8098_v23, %v4284_v55  ;;  %4295 = vadd.xlane.f32.xlu1 %v4290_v28  ;;  %4297 = vadd.xlane.f32.xlu0 %v4291_v62  ;;  %v5575_v28 = vld [vmem:[%s8432_s10 + $0x1] ss:$0 sm:$0xff] }
0x1594   :  { %v4292_v36 = vmul.f32 %v8129_v31, %v8129_v31 }
0x1596   :  { %4299 = vadd.xlane.f32.xlu1 %v4292_v36 }
0x1617   :  { %v4294_v58 = vpop.xlane.xlu0 %4293 }
0x1618   :  { %v4301_v33 = vmul.f32 0.0078125, %v4294_v58  ;;  %v6502_v58 = vld [vmem:[#allocation8 + $0x190] sm:$0xff]  }
0x161a   :  { %v4305_v37 = vadd.f32 1e-05, %v4301_v33  ;;  %v6503_v33 = vld [vmem:[#allocation8 + $0x148] sm:$0xff]  }
0x161b   :  { %v4296_v41 = vpop.xlane.xlu1 %4295  ;;  %v4298_v49 = vpop.xlane.xlu0 %4297 }
0x161c   :  { %6703 = vrsqrt.f32 %v4305_v37  ;;  %v4302_v46 = vmul.f32 0.0078125, %v4296_v41  ;;  %v4303_v47 = vmul.f32 0.0078125, %v4298_v49  ;;  %v6504_v37 = vld [vmem:[#allocation8 + $0x1c8] sm:$0xff]  }
0x161d   :  { %v6505_v41 = vld [vmem:[#allocation8 + $0x108] sm:$0xff]  }
0x161e   :  { %v4306_v35 = vadd.f32 1e-05, %v4302_v46  ;;  %v4307_v22 = vadd.f32 1e-05, %v4303_v47  ;;  %v6506_v49 = vld [vmem:[#allocation8 + $0x188] sm:$0xff]   ;;  %v6507_v46 = vld [vmem:[#allocation8 + $0x140] sm:$0xff]  }
0x161f   :  { %v4300_v11 = vpop.xlane.xlu1 %4299  ;;  %v6508_v47 = vld [vmem:[#allocation8 + $0x1c0] sm:$0xff]  }
0x1620   :  { %6705 = vrsqrt.f32 %v4306_v35  ;;  %v4304_v5 = vmul.f32 0.0078125, %v4300_v11  ;;  %v6509_v35 = vld [vmem:[#allocation8 + $0x100] sm:$0xff]  }
0x1621   :  { %6707 = vrsqrt.f32 %v4307_v22  ;;  %v6510_v22 = vld [vmem:[#allocation8 + $0x180] sm:$0xff]  }
0x1622   :  { %v4308_v20 = vadd.f32 1e-05, %v4304_v5  ;;  %v5608_v11 = vld [vmem:[%s8434_s12 + $0x4] sm:$0xf] }
0x1623   :  { %v8233_v5 = vrot.slane %v5608_v11, %v7108_v63 }
0x1624   :  { %6709 = vrsqrt.f32 %v4308_v20  ;;  %v8236_v20 = vrot.slane %v5608_v11, %v7123_v9 }
0x1629   :  { %v6704_v21 = vpop.eup %6703 }
0x162a   :  { %v4313_v50 = vmul.f32 %v6704_v21, %v8114_v48  ;;  %v8239_v21 = vrot.slane %v5608_v11, %v7101_v52 }
0x162c   :  { %v4323_v60 = vmul.f32 %v5574_v16, %v4313_v50  ;;  %v8243_v50 = vrot.slane %v5608_v11, %v1967_v15 }
0x162d   :  { %v6706_v17 = vpop.eup %6705 }
0x162e   :  { %v4314_v19 = vmul.f32 %v6706_v17, %v8119_v0  ;;  %v6708_v55 = vpop.eup %6707  ;;  %v4333_v42 = vadd.f32 %v5575_v28, %v4323_v60 }
0x162f   :  { %v4315_v12 = vmul.f32 %v6708_v55, %v8122_v25  ;;  %v6482_v25 = vld [vmem:[#allocation8 + $0x1b8] sm:$0xff]  }
0x1630   :  { %v4324_v62 = vmul.f32 %v5574_v16, %v4314_v19 }
0x1631   :  { %v6710_v36 = vpop.eup %6709  ;;  %v4325_v7 = vmul.f32 %v5574_v16, %v4315_v12 }
0x1632   :  { %v4334_v6 = vadd.f32 %v5575_v28, %v4324_v62  ;;  %v4316_v48 = vmul.f32 %v6710_v36, %v8129_v31  ;;  %v6483_v31 = vld [vmem:[#allocation8 + $0x170] sm:$0xff]  }
0x1633   :  { %v4335_v61 = vadd.f32 %v5575_v28, %v4325_v7 }
0x1634   :  { %v4337_v4 = vpack.c.bf16 %v4334_v6, %v4333_v42  ;;  %v4326_v34 = vmul.f32 %v5574_v16, %v4316_v48 }
0x1636   :  { %4588 = vmatmul.mubr.bf16.vlgmr.msra.gmra.mxu1 %v4337_v4  ;;  %4641 = vmatmul.mubr.bf16.vlgmr.msra.gmra.mxu0 %v4337_v4  ;;  %v4336_v0 = vadd.f32 %v5575_v28, %v4326_v34 }
0x1637   :  { %4597 = vmatprep.mubr.bf16.mxu1 %v6868_v1  ;;  %4650 = vmatprep.mubr.bf16.mxu0 %v6868_v1  ;;  %v6487_v1 = vld [vmem:[#allocation8 + $0x168] sm:$0xff]  }
0x1638   :  { %v4338_v38 = vpack.c.bf16 %v4336_v0, %v4335_v61  ;;  %5875 = vmatpush3.bf16.msra.mxu1 %v6481_v13  ;;  %5903 = vmatpush3.bf16.msra.mxu0 %v6482_v25 }
0x1639   :  { %5876 = vmatprep.subr.bf16.mxu1 %v6483_v31  ;;  %5904 = vmatprep.subr.bf16.mxu0 %v6484_v18 }
0x163c   :  { %5877 = vmatpush3.bf16.msra.mxu1 %v6485_v51  ;;  %5905 = vmatpush3.bf16.msra.mxu0 %v6486_v40 }
0x163d   :  { %5878 = vmatprep.subr.bf16.mxu1 %v6487_v1  ;;  %5906 = vmatprep.subr.bf16.mxu0 %v6488_v26 }
0x163e   :  { %4598 = vmatmul.mubr.bf16.gmra.mxu1 %v4338_v38  ;;  %4651 = vmatmul.mubr.bf16.gmra.mxu0 %v4338_v38 }
0x1640   :  { %5879 = vmatpush3.bf16.msra.mxu1 %v6489_v45  ;;  %5907 = vmatpush3.bf16.msra.mxu0 %v6490_v8 }
0x1641   :  { %5880 = vmatprep.subr.bf16.mxu1 %v6491_v30  ;;  %5908 = vmatprep.subr.bf16.mxu0 %v6492_v10 }
0x1644   :  { %5881 = vmatpush3.bf16.msra.mxu1 %v6493_v59  ;;  %5909 = vmatpush3.bf16.msra.mxu0 %v6494_v53 }
0x1645   :  { %5882 = vmatprep.subr.bf16.mxu1 %v6495_v3  ;;  %5910 = vmatprep.subr.bf16.mxu0 %v6496_v24 }
0x1648   :  { %5883 = vmatpush3.bf16.msra.mxu1 %v6497_v54  ;;  %5911 = vmatpush3.bf16.msra.mxu0 %v6498_v27 }
0x1649   :  { %5884 = vmatprep.subr.bf16.mxu1 %v6499_v14  ;;  %5912 = vmatprep.subr.bf16.mxu0 %v6500_v39 }
0x164c   :  { %5885 = vmatpush3.bf16.msra.mxu1 %v6501_v57  ;;  %5913 = vmatpush3.bf16.msra.mxu0 %v6502_v58 }
0x164d   :  { %5886 = vmatprep.subr.bf16.mxu1 %v6503_v33  ;;  %5914 = vmatprep.subr.bf16.mxu0 %v6504_v37 }
0x1650   :  { %5887 = vmatpush3.bf16.msra.mxu1 %v6505_v41  ;;  %5915 = vmatpush3.bf16.msra.mxu0 %v6506_v49 }
0x1651   :  { %5888 = vmatprep.subr.bf16.mxu1 %v6507_v46  ;;  %5916 = vmatprep.subr.bf16.mxu0 %v6508_v47 }
0x1654   :  { %5889 = vmatpush3.bf16.msra.mxu1 %v6509_v35  ;;  %5917 = vmatpush3.bf16.msra.mxu0 %v6510_v22 }
0x16f6   :  { %v4589_v16 = vpop.f32.mrf.mxu1  ;;  %v4642_v17 = vpop.f32.mrf.mxu0 }
0x16f7   :  { %v8246_v19 = vadd.f32 %v4589_v16, %v8233_v5  ;;  %v8249_v60 = vadd.f32 %v4642_v17, %v8236_v20 }
0x16f8   :  { %v4591_v63 = vpop.f32.mrf.mxu1  ;;  %v4644_v55 = vpop.f32.mrf.mxu0 }
0x16f9   :  { %v4661_v9 = vmul.f32 %v8246_v19, %v8246_v19  ;;  %v4663_v52 = vmul.f32 %v8249_v60, %v8249_v60  ;;  %v8256_v56 = vadd.f32 %v4591_v63, %v8239_v21  ;;  %v8259_v15 = vadd.f32 %v4644_v55, %v8243_v50 }
0x16fa   :  { %v4593_v28 = vpop.f32.mrf.mxu1  ;;  %v4646_v62 = vpop.f32.mrf.mxu0 }
0x16fb   :  { %v4677_v36 = vmul.f32 %v4661_v9, %v8246_v19  ;;  %v4679_v42 = vmul.f32 %v4663_v52, %v8249_v60  ;;  %v4662_v6 = vmul.f32 %v8256_v56, %v8256_v56  ;;  %v4664_v12 = vmul.f32 %v8259_v15, %v8259_v15 }
0x16fc   :  { %v8268_v48 = vadd.f32 %v4593_v28, %v8233_v5  ;;  %v8271_v4 = vadd.f32 %v4646_v62, %v8236_v20  ;;  %v4595_v34 = vpop.f32.mrf.mxu1  ;;  %v4648_v7 = vpop.f32.mrf.mxu0 }
0x16fd   :  { %v4693_v0 = vmul.f32 0.044715, %v4677_v36  ;;  %v4695_v61 = vmul.f32 0.044715, %v4679_v42  ;;  %v4678_v38 = vmul.f32 %v4662_v6, %v8256_v56  ;;  %v4680_v43 = vmul.f32 %v4664_v12, %v8259_v15 }
0x16fe   :  { %v4665_v2 = vmul.f32 %v8268_v48, %v8268_v48  ;;  %v4667_v13 = vmul.f32 %v8271_v4, %v8271_v4  ;;  %v8280_v25 = vadd.f32 %v4595_v34, %v8239_v21  ;;  %v8283_v31 = vadd.f32 %v4648_v7, %v8243_v50  ;;  %v4599_v18 = vpop.f32.mrf.mxu1  ;;  %v4652_v51 = vpop.f32.mrf.mxu0 }
0x16ff   :  { %v4709_v40 = vadd.f32 %v4693_v0, %v8246_v19  ;;  %v4711_v1 = vadd.f32 %v4695_v61, %v8249_v60  ;;  %v4694_v26 = vmul.f32 0.044715, %v4678_v38  ;;  %v4696_v45 = vmul.f32 0.044715, %v4680_v43 }
0x1700   :  { %v4681_v8 = vmul.f32 %v4665_v2, %v8268_v48  ;;  %v4683_v30 = vmul.f32 %v4667_v13, %v8271_v4  ;;  %v4666_v10 = vmul.f32 %v8280_v25, %v8280_v25  ;;  %v4668_v59 = vmul.f32 %v8283_v31, %v8283_v31  ;;  %v4601_v27 = vpop.f32.mrf.mxu1  ;;  %v4654_v33 = vpop.f32.mrf.mxu0 }
0x1701   :  { %v4725_v53 = vmul.f32 0.7978846, %v4709_v40  ;;  %v4727_v3 = vmul.f32 0.7978846, %v4711_v1  ;;  %v4710_v24 = vadd.f32 %v4694_v26, %v8256_v56  ;;  %v4712_v54 = vadd.f32 %v4696_v45, %v8259_v15 }
0x1702   :  { %v4697_v14 = vmul.f32 0.044715, %v4681_v8  ;;  %v4699_v39 = vmul.f32 0.044715, %v4683_v30  ;;  %v4682_v57 = vmul.f32 %v4666_v10, %v8280_v25  ;;  %v4684_v58 = vmul.f32 %v4668_v59, %v8283_v31  ;;  %v4603_v17 = vpop.f32.mrf.mxu1  ;;  %v4656_v52 = vpop.f32.mrf.mxu0 }
0x1703   :  { %6711 = vtanh.f32 %v4725_v53  ;;  %v4726_v37 = vmul.f32 0.7978846, %v4710_v24  ;;  %v4728_v41 = vmul.f32 0.7978846, %v4712_v54  ;;  %v8298_v49 = vadd.f32 %v4599_v18, %v8233_v5 }
0x1704   :  { %6713 = vtanh.f32 %v4727_v3  ;;  %v4713_v46 = vadd.f32 %v4697_v14, %v8268_v48  ;;  %v4715_v47 = vadd.f32 %v4699_v39, %v8271_v4  ;;  %v4698_v35 = vmul.f32 0.044715, %v4682_v57  ;;  %v4605_v38 = vpop.f32.mrf.mxu1  ;;  %v4658_v18 = vpop.f32.mrf.mxu0 }
0x1705   :  { %6715 = vtanh.f32 %v4726_v37  ;;  %v4700_v22 = vmul.f32 0.044715, %v4684_v58  ;;  %v4669_v11 = vmul.f32 %v8298_v49, %v8298_v49  ;;  %v8305_v16 = vadd.f32 %v4652_v51, %v8236_v20 }
0x1706   :  { %6717 = vtanh.f32 %v4728_v41  ;;  %v4729_v63 = vmul.f32 0.7978846, %v4713_v46  ;;  %v4731_v55 = vmul.f32 0.7978846, %v4715_v47  ;;  %v4714_v9 = vadd.f32 %v4698_v35, %v8280_v25 }
0x1707   :  { %v4716_v28 = vadd.f32 %v4700_v22, %v8283_v31  ;;  %v4685_v62 = vmul.f32 %v4669_v11, %v8298_v49  ;;  %v4671_v36 = vmul.f32 %v8305_v16, %v8305_v16  ;;  %v8313_v42 = vadd.f32 %v4601_v27, %v8239_v21 }
0x1708   :  { %6719 = vtanh.f32 %v4729_v63  ;;  %v4730_v6 = vmul.f32 0.7978846, %v4714_v9  ;;  %v8316_v12 = vadd.f32 %v4654_v33, %v8243_v50  ;;  %v8319_v34 = vadd.f32 %v4603_v17, %v8233_v5 }
0x1709   :  { %6721 = vtanh.f32 %v4731_v55  ;;  %v4732_v7 = vmul.f32 0.7978846, %v4716_v28  ;;  %v4701_v0 = vmul.f32 0.044715, %v4685_v62  ;;  %v4687_v61 = vmul.f32 %v4671_v36, %v8305_v16 }
0x170a   :  { %6723 = vtanh.f32 %v4730_v6  ;;  %v4670_v43 = vmul.f32 %v8313_v42, %v8313_v42  ;;  %v4672_v2 = vmul.f32 %v8316_v12, %v8316_v12  ;;  %v4673_v13 = vmul.f32 %v8319_v34, %v8319_v34 }
0x170b   :  { %6725 = vtanh.f32 %v4732_v7  ;;  %v4717_v5 = vadd.f32 %v4701_v0, %v8298_v49  ;;  %v4703_v51 = vmul.f32 0.044715, %v4687_v61  ;;  %v8330_v40 = vadd.f32 %v4656_v52, %v8236_v20 }
0x170c   :  { %v4686_v1 = vmul.f32 %v4670_v43, %v8313_v42  ;;  %v4688_v26 = vmul.f32 %v4672_v2, %v8316_v12  ;;  %v4689_v45 = vmul.f32 %v4673_v13, %v8319_v34  ;;  %v8336_v8 = vadd.f32 %v4605_v38, %v8239_v21 }
0x170d   :  { %v4733_v30 = vmul.f32 0.7978846, %v4717_v5  ;;  %v4719_v10 = vadd.f32 %v4703_v51, %v8305_v16  ;;  %v4675_v59 = vmul.f32 %v8330_v40, %v8330_v40  ;;  %v8342_v53 = vadd.f32 %v4658_v18, %v8243_v50 }
0x170e   :  { %v4702_v20 = vmul.f32 0.044715, %v4686_v1  ;;  %v4704_v3 = vmul.f32 0.044715, %v4688_v26  ;;  %v4705_v24 = vmul.f32 0.044715, %v4689_v45  ;;  %v4674_v54 = vmul.f32 %v8336_v8, %v8336_v8 }
0x170f   :  { %v4735_v27 = vmul.f32 0.7978846, %v4719_v10  ;;  %v4691_v14 = vmul.f32 %v4675_v59, %v8330_v40  ;;  %v4676_v21 = vmul.f32 %v8342_v53, %v8342_v53  ;;  %6727 = vtanh.f32 %v4733_v30 }
0x1710   :  { %v6712_v39 = vpop.eup %6711  ;;  %v4718_v57 = vadd.f32 %v4702_v20, %v8313_v42  ;;  %v4720_v58 = vadd.f32 %v4704_v3, %v8316_v12  ;;  %v4721_v50 = vadd.f32 %v4705_v24, %v8319_v34  ;;  %v4690_v33 = vmul.f32 %v4674_v54, %v8336_v8 }
0x1711   :  { %v6714_v37 = vpop.eup %6713  ;;  %v4707_v41 = vmul.f32 0.044715, %v4691_v14  ;;  %v4692_v46 = vmul.f32 %v4676_v21, %v8342_v53  ;;  %6729 = vtanh.f32 %v4735_v27  ;;  %v4757_v62 = vadd.f32 1.0, %v6712_v39 }
0x1712   :  { %v6716_v47 = vpop.eup %6715  ;;  %v4734_v35 = vmul.f32 0.7978846, %v4718_v57  ;;  %v4736_v22 = vmul.f32 0.7978846, %v4720_v58  ;;  %v4737_v17 = vmul.f32 0.7978846, %v4721_v50 }
0x1713   :  { %v6718_v11 = vpop.eup %6717  ;;  %v4723_v63 = vadd.f32 %v4707_v41, %v8330_v40  ;;  %v4706_v55 = vmul.f32 0.044715, %v4690_v33  ;;  %v4708_v9 = vmul.f32 0.044715, %v4692_v46  ;;  %v4758_v52 = vadd.f32 1.0, %v6716_v47 }
0x1714   :  { %6731 = vtanh.f32 %v4734_v35  ;;  %v4759_v0 = vadd.f32 1.0, %v6714_v37  ;;  %v4760_v45 = vadd.f32 1.0, %v6718_v11  ;;  %v4773_v30 = vmul.f32 0.5, %v4757_v62 }
0x1715   :  { %v6720_v28 = vpop.eup %6719  ;;  %6733 = vtanh.f32 %v4736_v22  ;;  %v4739_v36 = vmul.f32 0.7978846, %v4723_v63  ;;  %v4722_v6 = vadd.f32 %v4706_v55, %v8336_v8  ;;  %v4724_v38 = vadd.f32 %v4708_v9, %v8342_v53 }
0x1716   :  { %v6722_v7 = vpop.eup %6721  ;;  %v4761_v61 = vadd.f32 1.0, %v6720_v28  ;;  %6735 = vtanh.f32 %v4737_v17  ;;  %v4774_v18 = vmul.f32 0.5, %v4758_v52  ;;  %v4775_v20 = vmul.f32 0.5, %v4759_v0 }
0x1717   :  { %v6724_v43 = vpop.eup %6723  ;;  %v4763_v2 = vadd.f32 1.0, %v6722_v7  ;;  %6737 = vtanh.f32 %v4739_v36  ;;  %v4738_v13 = vmul.f32 0.7978846, %v4722_v6  ;;  %v4740_v1 = vmul.f32 0.7978846, %v4724_v38 }
0x1718   :  { %v6726_v5 = vpop.eup %6725  ;;  %v4777_v51 = vmul.f32 0.5, %v4761_v61  ;;  %v4762_v26 = vadd.f32 1.0, %v6724_v43  ;;  %v4776_v24 = vmul.f32 0.5, %v4760_v45  ;;  %v4790_v21 = vmul.f32 %v4774_v18, %v8256_v56 }
0x1719   :  { %v4779_v10 = vmul.f32 0.5, %v4763_v2  ;;  %6739 = vtanh.f32 %v4738_v13  ;;  %v4764_v59 = vadd.f32 1.0, %v6726_v5  ;;  %v4789_v57 = vmul.f32 %v4773_v30, %v8246_v19 }
0x171a   :  { %6741 = vtanh.f32 %v4740_v1  ;;  %v4778_v3 = vmul.f32 0.5, %v4762_v26  ;;  %v4793_v54 = vmul.f32 %v4777_v51, %v8268_v48  ;;  %v4792_v58 = vmul.f32 %v4776_v24, %v8259_v15 }
0x171b   :  { %v4780_v27 = vmul.f32 0.5, %v4764_v59  ;;  %v4795_v14 = vmul.f32 %v4779_v10, %v8271_v4  ;;  %v4791_v33 = vmul.f32 %v4775_v20, %v8249_v60 }
0x171c   :  { %v4794_v39 = vmul.f32 %v4778_v3, %v8280_v25  ;;  %v6728_v41 = vpop.eup %6727  ;;  %v4805_v46 = vpack.c.bf16 %v4793_v54, %v4789_v57 }
0x171d   :  { %v4796_v50 = vmul.f32 %v4780_v27, %v8283_v31  ;;  %v4807_v35 = vpack.c.bf16 %v4795_v14, %v4791_v33  ;;  %v4765_v11 = vadd.f32 1.0, %v6728_v41 }
0x171e   :  { %v4806_v37 = vpack.c.bf16 %v4794_v39, %v4790_v21  ;;  %v6730_v48 = vpop.eup %6729 }
0x171f   :  { %v4808_v47 = vpack.c.bf16 %v4796_v50, %v4792_v58  ;;  %v4767_v17 = vadd.f32 1.0, %v6730_v48  ;;  %v4781_v7 = vmul.f32 0.5, %v4765_v11 }
0x1720   :  { %5110 = vmatprep.mubr.bf16.mxu1 %v4806_v37 }
0x1721   :  { %v6732_v4 = vpop.eup %6731  ;;  %5159 = vmatprep.mubr.bf16.mxu0 %v4808_v47  ;;  %5111 = vmatmul.mubr.bf16.vlgmr.msra.gmra.mxu1 %v4805_v46  ;;  %v4783_v0 = vmul.f32 0.5, %v4767_v17  ;;  %v4797_v1 = vmul.f32 %v4781_v7, %v8298_v49 }
0x1722   :  { %v6734_v56 = vpop.eup %6733  ;;  %5160 = vmatmul.mubr.bf16.vlgmr.msra.gmra.mxu0 %v4807_v35  ;;  %v4766_v19 = vadd.f32 1.0, %v6732_v4 }
0x1723   :  { %v6736_v25 = vpop.eup %6735  ;;  %v4768_v15 = vadd.f32 1.0, %v6734_v56  ;;  %v4799_v26 = vmul.f32 %v4783_v0, %v8305_v16 }
0x1724   :  { %v6738_v22 = vpop.eup %6737  ;;  %v4769_v31 = vadd.f32 1.0, %v6736_v25  ;;  %v4782_v62 = vmul.f32 0.5, %v4766_v19 }
0x1725   :  { %v4771_v60 = vadd.f32 1.0, %v6738_v22  ;;  %v4784_v6 = vmul.f32 0.5, %v4768_v15 }
0x1726   :  { %v6740_v63 = vpop.eup %6739  ;;  %v4785_v55 = vmul.f32 0.5, %v4769_v31  ;;  %v4798_v13 = vmul.f32 %v4782_v62, %v8313_v42 }
0x1727   :  { %v6742_v9 = vpop.eup %6741  ;;  %v4787_v52 = vmul.f32 0.5, %v4771_v60  ;;  %v4770_v28 = vadd.f32 1.0, %v6740_v63  ;;  %v4800_v5 = vmul.f32 %v4784_v6, %v8316_v12  ;;  %v5642_v12 = vld [vmem:[%s8436_s14 + $0x1] ss:$0 sm:$0xff] }
0x1728   :  { %v4772_v36 = vadd.f32 1.0, %v6742_v9  ;;  %v4801_v43 = vmul.f32 %v4785_v55, %v8319_v34 }
0x1729   :  { %v4786_v61 = vmul.f32 0.5, %v4770_v28  ;;  %v4803_v2 = vmul.f32 %v4787_v52, %v8330_v40 }
0x172a   :  { %v4788_v38 = vmul.f32 0.5, %v4772_v36  ;;  %v4809_v10 = vpack.c.bf16 %v4801_v43, %v4797_v1  ;;  %v6516_v1 = vld [vmem:[%s8439_s17 + $0x10] sm:$0xff]  }
0x172b   :  { %v4802_v18 = vmul.f32 %v4786_v61, %v8336_v8  ;;  %v4811_v59 = vpack.c.bf16 %v4803_v2, %v4799_v26  ;;  %v6511_v2 = vld [vmem:[%s8439_s17 + $0x38] sm:$0xff]   ;;  %v6517_v26 = vld [vmem:[%s8439_s17 + $0x8] sm:$0xff]  }
0x172c   :  { %v4804_v51 = vmul.f32 %v4788_v38, %v8342_v53  ;;  %6212 = vmatprep.subr.bf16.mxu1 %v6511_v2 }
0x172d   :  { %v4810_v45 = vpack.c.bf16 %v4802_v18, %v4798_v13  ;;  %6213 = vmatpush3.bf16.msra.mxu1 %v6511_v2  ;;  %v6512_v13 = vld [vmem:[%s8439_s17 + $0x30] sm:$0xff]   ;;  %v6513_v18 = vld [vmem:[%s8439_s17 + $0x28] sm:$0xff]  }
0x172e   :  { %v4812_v30 = vpack.c.bf16 %v4804_v51, %v4800_v5  ;;  %6214 = vmatprep.subr.bf16.mxu1 %v6512_v13  ;;  %v6514_v5 = vld [vmem:[%s8439_s17 + $0x20] sm:$0xff]   ;;  %v6515_v51 = vld [vmem:[%s8439_s17 + $0x18] sm:$0xff]  }
0x172f   :  { %5118 = vmatprep.mubr.bf16.mxu1 %v4810_v45  ;;  %v6518_v45 = vld [vmem:[%s8439_s17] sm:$0xff]  }
0x1730   :  { %5167 = vmatprep.mubr.bf16.mxu0 %v4812_v30  ;;  %5119 = vmatmul.mubr.bf16.gmra.mxu1 %v4809_v10 }
0x1731   :  { %5168 = vmatmul.mubr.bf16.gmra.mxu0 %v4811_v59  ;;  %6215 = vmatpush3.bf16.msra.mxu1 %v6512_v13 }
0x1732   :  { %6216 = vmatprep.subr.bf16.mxu1 %v6513_v18 }
0x1735   :  { %6217 = vmatpush3.bf16.msra.mxu1 %v6513_v18 }
0x1736   :  { %6218 = vmatprep.subr.bf16.mxu1 %v6514_v5 }
0x1739   :  { %6219 = vmatpush3.bf16.msra.mxu1 %v6514_v5 }
0x173a   :  { %6220 = vmatprep.subr.bf16.mxu1 %v6515_v51 }
0x173d   :  { %6221 = vmatpush3.bf16.msra.mxu1 %v6515_v51 }
0x173e   :  { %6222 = vmatprep.subr.bf16.mxu1 %v6516_v1 }
0x1741   :  { %6223 = vmatpush3.bf16.msra.mxu1 %v6516_v1 }
0x1742   :  { %6224 = vmatprep.subr.bf16.mxu1 %v6517_v26 }
0x1745   :  { %6225 = vmatpush3.bf16.msra.mxu1 %v6517_v26 }
0x1746   :  { %6226 = vmatprep.subr.bf16.mxu1 %v6518_v45 }
0x1749   :  { %6227 = vmatpush3.bf16.msra.mxu1 %v6518_v45 }
0x17e1   :  { %v5890_v34 = vpop.f32.mrf.mxu1 }
0x17e2   :  { %v5918_v42 = vpop.f32.mrf.mxu0 }
0x17e3   :  { %v5891_v40 = vpop.f32.mrf.mxu1 }
0x17e4   :  { %v5892_v8 = vadd.f32 %v5891_v40, %v5890_v34  ;;  %v5919_v53 = vpop.f32.mrf.mxu0 }
0x17e5   :  { %v5893_v49 = vpop.f32.mrf.mxu1  ;;  %v5920_v16 = vadd.f32 %v5919_v53, %v5918_v42 }
0x17e6   :  { %v5113_v20 = vadd.f32 %v5892_v8, %v5642_v12  ;;  %v5921_v3 = vpop.f32.mrf.mxu0 }
0x17e7   :  { %v5894_v24 = vpop.f32.mrf.mxu1 }
0x17e8   :  { %v5162_v54 = vadd.f32 %v5920_v16, %v5113_v20  ;;  %v5895_v27 = vadd.f32 %v5894_v24, %v5893_v49  ;;  %v5922_v14 = vpop.f32.mrf.mxu0  ;;  %v5675_v24 = vld [vmem:[%s8437_s15] ss:$0 sm:$0xff] }
0x17e9   :  { %v5923_v39 = vadd.f32 %v5922_v14, %v5921_v3 }
0x17ea   :  { %v5116_v21 = vadd.f32 %v5895_v27, %v5642_v12  ;;  %v5176_v57 = vadd.f32 %v5162_v54, %v8086_v29 }
0x17ec   :  { %v5165_v58 = vadd.f32 %v5923_v39, %v5116_v21  ;;  %5182 = vadd.xlane.f32.xlu0 %v5176_v57  ;;  %v5676_v39 = vld [vmem:[%s8438_s16] ss:$0 sm:$0xff] }
0x17ee   :  { %v5177_v50 = vadd.f32 %v5165_v58, %v8093_v32 }
0x17f0   :  { %v5896_v33 = vpop.f32.mrf.mxu1  ;;  %5184 = vadd.xlane.f32.xlu1 %v5177_v50 }
0x17f1   :  { %v5924_v37 = vpop.f32.mrf.mxu0 }
0x17f2   :  { %v5897_v41 = vpop.f32.mrf.mxu1 }
0x17f3   :  { %v5898_v46 = vadd.f32 %v5897_v41, %v5896_v33  ;;  %v5925_v47 = vpop.f32.mrf.mxu0 }
0x17f4   :  { %v5899_v48 = vpop.f32.mrf.mxu1  ;;  %v5926_v4 = vadd.f32 %v5925_v47, %v5924_v37 }
0x17f5   :  { %v5121_v35 = vadd.f32 %v5898_v46, %v5642_v12  ;;  %v5927_v56 = vpop.f32.mrf.mxu0 }
0x17f6   :  { %v5900_v25 = vpop.f32.mrf.mxu1 }
0x17f7   :  { %v5170_v19 = vadd.f32 %v5926_v4, %v5121_v35  ;;  %v5901_v22 = vadd.f32 %v5900_v25, %v5899_v48  ;;  %v5928_v15 = vpop.f32.mrf.mxu0 }
0x17f8   :  { %v5929_v29 = vadd.f32 %v5928_v15, %v5927_v56 }
0x17f9   :  { %v5124_v11 = vadd.f32 %v5901_v22, %v5642_v12  ;;  %v5178_v31 = vadd.f32 %v5170_v19, %v8090_v44  ;;  %v5677_v19 = vld [vmem:[#allocation10] ss:$0 sm:$0xff] }
0x17fb   :  { %v5173_v17 = vadd.f32 %v5929_v29, %v5124_v11  ;;  %5186 = vadd.xlane.f32.xlu0 %v5178_v31 }
0x17fd   :  { %v5179_v32 = vadd.f32 %v5173_v17, %v8098_v23 }
0x17ff   :  { %5188 = vadd.xlane.f32.xlu1 %v5179_v32 }
0x1875   :  { %v5183_v60 = vpop.xlane.xlu0 %5182 }
0x1876   :  { %v5190_v63 = vmul.f32 0.0078125, %v5183_v60 }
0x1878   :  { %v5194_v55 = vsub.f32 %v5176_v57, %v5190_v63 }
0x1879   :  { %v5185_v9 = vpop.xlane.xlu1 %5184 }
0x187a   :  { %v5191_v52 = vmul.f32 0.0078125, %v5185_v9  ;;  %v5198_v28 = vmul.f32 %v5194_v55, %v5194_v55 }
0x187c   :  { %v5195_v62 = vsub.f32 %v5177_v50, %v5191_v52  ;;  %5202 = vadd.xlane.f32.xlu0 %v5198_v28 }
0x187e   :  { %v5199_v36 = vmul.f32 %v5195_v62, %v5195_v62 }
0x1880   :  { %5204 = vadd.xlane.f32.xlu1 %v5199_v36 }
0x1884   :  { %v5187_v6 = vpop.xlane.xlu0 %5186 }
0x1885   :  { %v5192_v7 = vmul.f32 0.0078125, %v5187_v6 }
0x1887   :  { %v5196_v0 = vsub.f32 %v5178_v31, %v5192_v7 }
0x1888   :  { %v5189_v61 = vpop.xlane.xlu1 %5188 }
0x1889   :  { %v5193_v44 = vmul.f32 0.0078125, %v5189_v61  ;;  %v5200_v38 = vmul.f32 %v5196_v0, %v5196_v0 }
0x188b   :  { %v5197_v43 = vsub.f32 %v5179_v32, %v5193_v44  ;;  %5206 = vadd.xlane.f32.xlu0 %v5200_v38 }
0x188d   :  { %v5201_v23 = vmul.f32 %v5197_v43, %v5197_v43 }
0x188f   :  { %5208 = vadd.xlane.f32.xlu1 %v5201_v23 }
0x1905   :  { %v5203_v30 = vpop.xlane.xlu0 %5202 }
0x1906   :  { %v5210_v10 = vmul.f32 0.0078125, %v5203_v30 }
0x1908   :  { %v5214_v59 = vadd.f32 1e-05, %v5210_v10 }
0x1909   :  { %v5205_v34 = vpop.xlane.xlu1 %5204 }
0x190a   :  { %6743 = vrsqrt.f32 %v5214_v59  ;;  %v5211_v42 = vmul.f32 0.0078125, %v5205_v34 }
0x190c   :  { %v5215_v12 = vadd.f32 1e-05, %v5211_v42 }
0x190e   :  { %6745 = vrsqrt.f32 %v5215_v12 }
0x1914   :  { %v5207_v40 = vpop.xlane.xlu0 %5206 }
0x1915   :  { %v5212_v8 = vmul.f32 0.0078125, %v5207_v40 }
0x1917   :  { %v6744_v53 = vpop.eup %6743  ;;  %v5216_v49 = vadd.f32 1e-05, %v5212_v8 }
0x1918   :  { %v5209_v20 = vpop.xlane.xlu1 %5208  ;;  %v5222_v16 = vmul.f32 %v6744_v53, %v5194_v55 }
0x1919   :  { %6747 = vrsqrt.f32 %v5216_v49  ;;  %v5213_v3 = vmul.f32 0.0078125, %v5209_v20 }
0x191a   :  { %v5232_v21 = vmul.f32 %v5675_v24, %v5222_v16 }
0x191b   :  { %v6746_v54 = vpop.eup %6745  ;;  %v5217_v27 = vadd.f32 1e-05, %v5213_v3 }
0x191c   :  { %v5223_v14 = vmul.f32 %v6746_v54, %v5195_v62  ;;  %v5242_v58 = vadd.f32 %v5676_v39, %v5232_v21 }
0x191d   :  { %6749 = vrsqrt.f32 %v5217_v27 }
0x191e   :  { %v5233_v57 = vmul.f32 %v5675_v24, %v5223_v14 }
0x1920   :  { %v5243_v50 = vadd.f32 %v5676_v39, %v5233_v57 }
0x1922   :  { %v5246_v33 = vpack.c.bf16 %v5243_v50, %v5242_v58 }
0x1924   :  { %6228 = vmatprep.mubr.bf16.mxu1 %v5246_v33 }
0x1926   :  { %v6748_v37 = vpop.eup %6747 }
0x1927   :  { %v5224_v41 = vmul.f32 %v6748_v37, %v5196_v0 }
0x1929   :  { %v5234_v48 = vmul.f32 %v5675_v24, %v5224_v41 }
0x192a   :  { %v6750_v46 = vpop.eup %6749 }
0x192b   :  { %v5225_v47 = vmul.f32 %v6750_v46, %v5197_v43  ;;  %v5244_v4 = vadd.f32 %v5676_v39, %v5234_v48 }
0x192d   :  { %v5235_v35 = vmul.f32 %v5675_v24, %v5225_v47 }
0x192f   :  { %v5245_v56 = vadd.f32 %v5676_v39, %v5235_v35 }
0x1931   :  { %v5247_v25 = vpack.c.bf16 %v5245_v56, %v5244_v4 }
0x1933   :  { %6229 = vmatmul.mubr.bf16.vlgmr.msra.gmra.mxu1 %v5247_v25 }
0x19f3   :  { %v6230_v22 = vpop.f32.mrf.mxu1 }
0x19f4   :  { %v5362_v15 = vadd.f32 %v6230_v22, %v5677_v19 }
0x19f5   :  { %v5353_v11 = vpop.f32.mrf.mxu1 }
0x19f6   :  { %5370 = vst [vmem:[%s8441_s19 + $0x10] sm:$0xff] %v5362_v15  ;;  %v5354_v29 = vadd.f32 %v5677_v19, %v5353_v11 }
0x19f7   :  { %v6231_v31 = vpop.f32.mrf.mxu1 }
0x19f8   :  { %5368 = vst [vmem:[%s8441_s19] sm:$0xff] %v5354_v29  ;;  %v5365_v17 = vadd.f32 %v6231_v31, %v5677_v19 }
0x19f9   :  { %v5356_v32 = vpop.f32.mrf.mxu1 }
0x19fa   :  { %5371 = vst [vmem:[%s8441_s19 + $0x18] sm:$0xff] %v5365_v17  ;;  %v5357_v60 = vadd.f32 %v5677_v19, %v5356_v32 }
0x19fc   :  { %5369 = vst [vmem:[%s8441_s19 + $0x8] sm:$0xff] %v5357_v60 }
0x19fd   :  { %5376 = vsyncpa [#allocation4], 1 }
0x19fe   :  { %5377 = vsyncpa [#allocation6], 1 }
0x19ff   :  { %5378 = vsyncpa [#allocation9], 1 }

</bundles_post_ra>
